<compile_context>
chip_gen: v7x
topology: tpu7x:2x2x1
jax: 0.10.0
libtpu: 0.0.40
codegen_flags: <defaults>
</compile_context>

<pallas_src>
import jax
import jax.numpy as jnp
from jax.experimental import pallas as pl
from jax.experimental.pallas import tpu as pltpu


def wavelet_unpool_kernel(x_ref, o_ref):
    # x_ref block: (1, 4, Cblk, Hblk, W)  -- the four wavelet sub-bands.
    # o_ref block: (1, Cblk, 2*Hblk, 2*W) -- fully interleaved, lane-dense.
    x1 = x_ref[0, 0].astype(jnp.float32) * 0.5   # (Cblk, Hblk, W)
    x2 = x_ref[0, 1].astype(jnp.float32) * 0.5
    x3 = x_ref[0, 2].astype(jnp.float32) * 0.5
    x4 = x_ref[0, 3].astype(jnp.float32) * 0.5

    a = x1 - x2 - x3 + x4   # -> out[0::2, 0::2]
    b = x1 - x2 + x3 - x4   # -> out[1::2, 0::2]
    c = x1 + x2 - x3 - x4   # -> out[0::2, 1::2]
    d = x1 + x2 + x3 + x4   # -> out[1::2, 1::2]

    cblk, hblk, w = a.shape

    # Column interleave (lane zip), going straight to minor dim 2W.
    even_rows = jnp.stack([a, c], axis=-1).reshape(cblk, hblk, 2 * w)
    odd_rows = jnp.stack([b, d], axis=-1).reshape(cblk, hblk, 2 * w)

    # Row interleave as a sublane reshape: (Cblk, Hblk, 2, 2W) -> (Cblk, 2Hblk, 2W),
    # then a single dense store of the whole tile.
    out = jnp.stack([even_rows, odd_rows], axis=-2).reshape(cblk, 2 * hblk, 2 * w)
    o_ref[0] = out.astype(o_ref.dtype)


def _choose_blocks(c_out, H, W, itemsize, budget_bytes):
    """Pick (Cblk, Hblk) so one input block (4 * Cblk * Hblk * W elems) stays
    within `budget_bytes`.  Prefer full-H blocks with as many channels as fit;
    only tile H for very large images."""
    row_bytes = 4 * W * itemsize          # one spatial row across all 4 sub-bands
    full_image = row_bytes * H            # one output channel's worth of input
    if full_image <= budget_bytes:
        hblk = H
        cblk = max(1, min(c_out, budget_bytes // full_image))
        while c_out % cblk:               # largest divisor of c_out that fits
            cblk -= 1
    else:
        cblk = 1
        hblk = H                          # safe fallback: full H (always legal)
        cand = (min(H, budget_bytes // max(row_bytes, 1)) // 8) * 8
        while cand >= 8:                  # largest multiple-of-8 divisor of H
            if H % cand == 0:
                hblk = cand
                break
            cand -= 8
    return cblk, hblk


def wavelet_unpool(x, *, block_budget_bytes=2 << 20):
    """x: (B, C, H, W) with C % 4 == 0  ->  (B, C//4, 2H, 2W) float32."""
    bs, in_channels, H, W = x.shape
    assert in_channels % 4 == 0
    c_out = in_channels // 4

    # Free glue view: quarter k / out-channel co <-> input channel k*c_out + co.
    xr = x.reshape(bs, 4, c_out, H, W)

    cblk, hblk = _choose_blocks(c_out, H, W, x.dtype.itemsize, block_budget_bytes)
    grid = (bs, c_out // cblk, pl.cdiv(H, hblk))

    return pl.pallas_call(
        wavelet_unpool_kernel,
        out_shape=jax.ShapeDtypeStruct((bs, c_out, 2 * H, 2 * W), jnp.float32),
        grid=grid,
        in_specs=[
            pl.BlockSpec((1, 4, cblk, hblk, W), lambda b, c, h: (b, 0, c, h, 0)),
        ],
        out_specs=pl.BlockSpec(
            (1, cblk, 2 * hblk, 2 * W), lambda b, c, h: (b, c, h, 0)
        ),
        compiler_params=pltpu.CompilerParams(
            dimension_semantics=("parallel", "parallel", "parallel"),
            vmem_limit_bytes=32 * 1024 * 1024,
        ),
    )(xr)


def wavelet_unpool_ref(x):
    """Pure-JAX reference mirroring the PyTorch forward exactly."""
    bs, in_channels, H, W = x.shape
    c_out = in_channels // 4
    x = x.astype(jnp.float32)
    x1 = x[:, :c_out] / 2
    x2 = x[:, c_out:2 * c_out] / 2
    x3 = x[:, 2 * c_out:3 * c_out] / 2
    x4 = x[:, 3 * c_out:4 * c_out] / 2
    out = jnp.zeros((bs, c_out, 2 * H, 2 * W), jnp.float32)
    out = out.at[:, :, 0::2, 0::2].set(x1 - x2 - x3 + x4)
    out = out.at[:, :, 1::2, 0::2].set(x1 - x2 + x3 - x4)
    out = out.at[:, :, 0::2, 1::2].set(x1 + x2 - x3 - x4)
    out = out.at[:, :, 1::2, 1::2].set(x1 + x2 + x3 + x4)
    return out


if __name__ == "__main__":
    key = jax.random.PRNGKey(0)
    # Small NCHW input consistent with the module: C must be a multiple of 4.
    x = jax.random.normal(key, (2, 4, 16, 16), dtype=jnp.float32)

    out = wavelet_unpool(x)
    out = jax.block_until_ready(out)

    ref = wavelet_unpool_ref(x)
    assert out.shape == (2, 1, 32, 32)
    assert out.dtype == jnp.float32
    assert jnp.allclose(out, ref, atol=1e-6, rtol=1e-6)

    print("KERNEL_OK")
</pallas_src>

<mosaic_0001>
module attributes {stable_mosaic.version = 11 : i64} {
  func.func @wavelet_unpool_kernel(%arg0: i32, %arg1: i32, %arg2: i32, %arg3: memref<1x4x1x16x16xf32, #tpu.memory_space<vmem>>, %arg4: memref<1x1x32x32xf32, #tpu.memory_space<vmem>>) attributes {dimension_semantics = [#tpu.dimension_semantics<parallel>, #tpu.dimension_semantics<parallel>, #tpu.dimension_semantics<parallel>], iteration_bounds = array<i64: 2, 1, 1>, scalar_prefetch = 0 : i64, scratch_operands = 0 : i64, tpu.core_type = #tpu.core_type<tc>, window_params = [{transform_indices = @transform_0, window_bounds = array<i64: 1, 4, 1, 16, 16>}, {transform_indices = @transform_1, window_bounds = array<i64: 1, 1, 32, 32>}]} {
    %c0 = arith.constant 0 : index
    %c0_0 = arith.constant 0 : index
    %c0_1 = arith.constant 0 : index
    %c0_2 = arith.constant 0 : index
    %c0_3 = arith.constant 0 : index
    %0 = vector.load %arg3[%c0, %c0_0, %c0_1, %c0_2, %c0_3] : memref<1x4x1x16x16xf32, #tpu.memory_space<vmem>>, vector<1x1x1x16x16xf32>
    %1 = vector.shape_cast %0 : vector<1x1x1x16x16xf32> to vector<1x16x16xf32>
    %cst = arith.constant 5.000000e-01 : f32
    %2 = vector.broadcast %cst : f32 to vector<1x16x16xf32>
    %3 = arith.mulf %1, %2 : vector<1x16x16xf32>
    %c0_4 = arith.constant 0 : index
    %c1 = arith.constant 1 : index
    %c0_5 = arith.constant 0 : index
    %c0_6 = arith.constant 0 : index
    %c0_7 = arith.constant 0 : index
    %4 = vector.load %arg3[%c0_4, %c1, %c0_5, %c0_6, %c0_7] : memref<1x4x1x16x16xf32, #tpu.memory_space<vmem>>, vector<1x1x1x16x16xf32>
    %5 = vector.shape_cast %4 : vector<1x1x1x16x16xf32> to vector<1x16x16xf32>
    %cst_8 = arith.constant 5.000000e-01 : f32
    %6 = vector.broadcast %cst_8 : f32 to vector<1x16x16xf32>
    %7 = arith.mulf %5, %6 : vector<1x16x16xf32>
    %c0_9 = arith.constant 0 : index
    %c2 = arith.constant 2 : index
    %c0_10 = arith.constant 0 : index
    %c0_11 = arith.constant 0 : index
    %c0_12 = arith.constant 0 : index
    %8 = vector.load %arg3[%c0_9, %c2, %c0_10, %c0_11, %c0_12] : memref<1x4x1x16x16xf32, #tpu.memory_space<vmem>>, vector<1x1x1x16x16xf32>
    %9 = vector.shape_cast %8 : vector<1x1x1x16x16xf32> to vector<1x16x16xf32>
    %cst_13 = arith.constant 5.000000e-01 : f32
    %10 = vector.broadcast %cst_13 : f32 to vector<1x16x16xf32>
    %11 = arith.mulf %9, %10 : vector<1x16x16xf32>
    %c0_14 = arith.constant 0 : index
    %c3 = arith.constant 3 : index
    %c0_15 = arith.constant 0 : index
    %c0_16 = arith.constant 0 : index
    %c0_17 = arith.constant 0 : index
    %12 = vector.load %arg3[%c0_14, %c3, %c0_15, %c0_16, %c0_17] : memref<1x4x1x16x16xf32, #tpu.memory_space<vmem>>, vector<1x1x1x16x16xf32>
    %13 = vector.shape_cast %12 : vector<1x1x1x16x16xf32> to vector<1x16x16xf32>
    %cst_18 = arith.constant 5.000000e-01 : f32
    %14 = vector.broadcast %cst_18 : f32 to vector<1x16x16xf32>
    %15 = arith.mulf %13, %14 : vector<1x16x16xf32>
    %16 = arith.subf %3, %7 : vector<1x16x16xf32>
    %17 = arith.subf %16, %11 : vector<1x16x16xf32>
    %18 = arith.addf %17, %15 : vector<1x16x16xf32>
    %19 = arith.subf %3, %7 : vector<1x16x16xf32>
    %20 = arith.addf %19, %11 : vector<1x16x16xf32>
    %21 = arith.subf %20, %15 : vector<1x16x16xf32>
    %22 = arith.addf %3, %7 : vector<1x16x16xf32>
    %23 = arith.subf %22, %11 : vector<1x16x16xf32>
    %24 = arith.subf %23, %15 : vector<1x16x16xf32>
    %25 = arith.addf %3, %7 : vector<1x16x16xf32>
    %26 = arith.addf %25, %11 : vector<1x16x16xf32>
    %27 = arith.addf %26, %15 : vector<1x16x16xf32>
    %28 = vector.shape_cast %18 : vector<1x16x16xf32> to vector<1x16x16x1xf32>
    %29 = vector.shape_cast %24 : vector<1x16x16xf32> to vector<1x16x16x1xf32>
    %30 = tpu.concatenate %28, %29 in 3 : vector<1x16x16x1xf32>, vector<1x16x16x1xf32> -> vector<1x16x16x2xf32>
    %31 = vector.shape_cast %30 : vector<1x16x16x2xf32> to vector<1x16x32xf32>
    %32 = vector.shape_cast %21 : vector<1x16x16xf32> to vector<1x16x16x1xf32>
    %33 = vector.shape_cast %27 : vector<1x16x16xf32> to vector<1x16x16x1xf32>
    %34 = tpu.concatenate %32, %33 in 3 : vector<1x16x16x1xf32>, vector<1x16x16x1xf32> -> vector<1x16x16x2xf32>
    %35 = vector.shape_cast %34 : vector<1x16x16x2xf32> to vector<1x16x32xf32>
    %36 = vector.shape_cast %31 : vector<1x16x32xf32> to vector<1x16x1x32xf32>
    %37 = vector.shape_cast %35 : vector<1x16x32xf32> to vector<1x16x1x32xf32>
    %38 = tpu.concatenate %36, %37 in 2 : vector<1x16x1x32xf32>, vector<1x16x1x32xf32> -> vector<1x16x2x32xf32>
    %39 = vector.shape_cast %38 : vector<1x16x2x32xf32> to vector<1x32x32xf32>
    %c0_19 = arith.constant 0 : index
    %c0_20 = arith.constant 0 : index
    %c0_21 = arith.constant 0 : index
    %c0_22 = arith.constant 0 : index
    %40 = vector.load %arg4[%c0_19, %c0_20, %c0_21, %c0_22] : memref<1x1x32x32xf32, #tpu.memory_space<vmem>>, vector<1x1x32x32xf32>
    %41 = vector.shape_cast %40 : vector<1x1x32x32xf32> to vector<1x32x32xf32>
    %42 = vector.shape_cast %39 : vector<1x32x32xf32> to vector<1x1x32x32xf32>
    tpu.vector_store %arg4[%c0_19, %c0_20, %c0_21, %c0_22], %42 {strides = array<i32>} : memref<1x1x32x32xf32, #tpu.memory_space<vmem>>, vector<1x1x32x32xf32>,
    return
  }
  func.func @transform_0(%arg0: i32, %arg1: i32, %arg2: i32) -> (i32, i32, i32, i32, i32) {
    %c0_i32 = arith.constant 0 : i32
    %c0_i32_0 = arith.constant 0 : i32
    %c0_i32_1 = arith.constant 0 : i32
    return %arg0, %c0_i32, %arg1, %arg2, %c0_i32_0 : i32, i32, i32, i32, i32
  }
  func.func @transform_1(%arg0: i32, %arg1: i32, %arg2: i32) -> (i32, i32, i32, i32) {
    %c0_i32 = arith.constant 0 : i32
    %c0_i32_0 = arith.constant 0 : i32
    return %arg0, %arg1, %arg2, %c0_i32 : i32, i32, i32, i32
  }
}

</mosaic_0001>

<bundles_post_ra>
// kernel: tpu_custom_call.1
= control target key start
LH: loop header
LB: loop body
LE: loop exit
PB: predicated region body
PF: predicated region fallthrough
CT: control target
= control target key end

     0   :  { %6 = vsyncpa [#allocation3], 0  ;;  %s12226_s0 = inlined_call_operand.hbm [shape: f32[2,4,1,16,16], index: 0, kind: input, shape index: {}]   ;;  %s12227_s1 = inlined_call_operand.hbm [shape: f32[2,1,32,32], index: 1, kind: output, shape index: {}]  }
   0x1   :  { %8 = vsyncpa [#allocation3 + $0x1], 0 }
   0x2   :  { %9 = vsyncpa [#allocation4], 0 }
   0x3   :  { %11 = vsyncpa [#allocation4 + $0x1], 0  ;;  %s7050_s6 = smov 0   ;;  %s7052_s7 = smov 0  }
   0x4   :  { %s7054_s8 = smov 0   ;;  %s7056_s9 = smov 0  }
   0x5   :  { %s7058_s10 = smov 0   ;;  %s7060_s11 = smov 0  }
   0x6 LB: > { %s6797_s12 = sadd.s32 4294967295, %s7015_s11   ;;  %s6798_s13 = sadd.s32 4294967294, %s7015_s11   ;;  %s7015_s11 = sphi %s7060_s11, %s17_s11   ;;  %s7011_s10 = sphi %s7058_s10, %s13255_s10   ;;  %s7007_s9 = sphi %s7056_s9, %s13254_s9   ;;  %s7003_s8 = sphi %s7054_s8, %s13253_s8   ;;  %s6999_s7 = sphi %s7052_s7, %s13252_s7   ;;  %s6995_s6 = sphi %s7050_s6, %s13251_s6  }
   0x7   : > { %s36_s14 = sadd.s32 1, %s7011_s10  ;;  %s47_s15 = sadd.s32 1, %s7003_s8 }
   0x8   : > { %p38_p0 = scmp.ge.s32.totalorder %s36_s14, 2  ;;  %p54_p1 = scmp.ne.s32.totalorder %s7003_s8, %s6999_s7 }
   0x9   : > { %p55_p2 = scmp.eq.s32.totalorder %s7015_s11, 0  ;;  %p60_p3 = scmp.ne.s32.totalorder %s6999_s7, %s6995_s6 }
   0xa   : > { %s13257_s14 = smov (%p38_p0, %s36_s14), 0  ;;  %p61_p5 = scmp.eq.s32.totalorder %s6797_s12, 0 }
   0xb   : > { %p7091_p4 = por %p55_p2, %p54_p1  ;;  %s40_s17 = ssub.s32 %s7011_s10, %s13257_s14 }
   0xc   : > { %p88_p6 = scmp.eq.s32.totalorder %s6797_s12, 1  ;;  %p45_p7 = scmp.eq.s32.totalorder %s40_s17, 0 }
   0xd   : > { %p7097_p8 = por %p61_p5, %p60_p3  ;;  %p94_p10 = scmp.eq.s32.totalorder %s6798_s13, 1 }
   0xe   : > { %p7101_p9 = por %p88_p6, %p54_p1  ;;  %p6832_p13 = scmp.lt.s32.totalorder %s7015_s11, 2 }
   0xf   : > { %s7106_s20 = scalar_select %p45_p7, %s7003_s8, %s47_s15  }
  0x10   : > { %s12268_s19 = scalar_select %p7101_p9, 1, 0 }
  0x11   : > { %p7108_p11 = por %p94_p10, %p60_p3  ;;  %s114_s22 = sand.u32 1, %s7003_s8  }
  0x12   : > { %s6801_s23 = sshll.u32 %s114_s22, 6  ;;  %s6818_s24 = sshll.u32 %s7011_s10, 10 }
  0x13   : > { %s12269_s21 = scalar_select %p7108_p11, 1, 0 }
  0x14   : > { %s7119_s27 = scalar_lea.hbm %s12226_s0, %s6818_s24  ;;  %s118_s28 = scalar_lea.vmem [#allocation2], %s6801_s23 }
  0x15   : > { %s129_s29 = sshll.u32 %s118_s28, 4  ;;  %p7125_p0 = pnand %p6832_p13, %p7091_p4  ;;  %s7121_s29 = int_to_ptr.vmem [resolvable:$true] %s129_s29 }
  0x16   : > { %s7130_s2 = scalar_lea.sflag [#allocation3], %s114_s22  ;;  %s6903_s3 = scalar_lea.hbm %s7119_s27, 1024 }
  0x17   : > { %p6904_p2 = scmp.ne.s32.totalorder %s7119_s27, %s6903_s3  ;;  %p6905_p3 = pneg %p7125_p0 }
  0x18   : > { %s6908_s12 = scalar_lea.hbm %s12226_s0, 2048  ;;  %p6909_p4 = scmp.lt.u32.totalorder %s7119_s27, %s12226_s0 }
  0x19   : > { %p6906_p5 = pnand %p6905_p3, %p6904_p2  ;;  %p6910_p7 = scmp.lt.u32.totalorder %s6908_s12, %s6903_s3 }
  0x1a   : > { %p6912_p13 = scmp.lt.u32.totalorder %s6903_s3, %s7119_s27 }
  0x1b   : > { %p6907_p6 = pneg %p6906_p5  ;;  %p6911_p10 = por %p6910_p7, %p6909_p4 }
  0x1d   : > { %p6913_p12 = por %p6912_p13, %p6911_p10 }
  0x1f   : > { %p6914_p1 = pnand %p6913_p12, %p6907_p6 }
  0x21   : > { %6917 = shalt.err (!%p6914_p1)
}
  0x22   : > { %s6918_s16 = scalar_lea.vmem %s7121_s29, 1024  ;;  %s7017_s17 = smov [#allocation2]  }
  0x23   : > { %p6919_p2 = scmp.ne.s32.totalorder %s7121_s29, %s6918_s16  ;;  %s6923_s22 = sshll.u32 %s7017_s17, 4  ;;  %s6924_s22 = int_to_ptr.vmem [resolvable:$false] %s6923_s22 }
  0x24   : > { %s6925_s23 = scalar_lea.vmem %s6924_s22, 2048  ;;  %p6926_p9 = scmp.lt.s32.totalorder %s7121_s29, %s6924_s22 }
  0x25   : > { %p6921_p5 = pnand %p6919_p2, %p6905_p3  ;;  %p6927_p4 = scmp.lt.s32.totalorder %s6925_s23, %s6918_s16 }
  0x27   : > { %p6922_p11 = pneg %p6921_p5  ;;  %p6928_p7 = por %p6927_p4, %p6926_p9 }
  0x29   : > { %p6929_p10 = pnand %p6928_p7, %p6922_p11 }
  0x2b   : > { %6932 = shalt.err (!%p6929_p10)
}
  0x2c   : > { %s7018_s24 = smov 128   ;;  %s7019_s25 = smov 8  }
  0x2d   : > { %6827 = dma.hbm_to_vmem [thread:$0]  (!%p7125_p0), %s7119_s27, 1024, %s7121_s29, %s7130_s2, %s7018_s24, %s7018_s24, %s7019_s25  }
  0x2e   : > { %p137_p12 = scmp.lt.s32.totalorder %s7015_s11, 3  ;;  %p12271_p1 = scmp.ge.s32.totalorder %s7015_s11, 1 }
  0x30   : > { %p138_p3 = pnand %p12271_p1, %p137_p12 }
  0x32   : > { %141 = sbr.rel (%p138_p3) target bundleno = 1432 (0x598), region = 24 }
  0x39   : > { %s7162_s26 = sand.u32 1, %s6999_s7  }
  0x3a   : > { %s6805_s28 = sshll.u32 %s7162_s26, 6  ;;  %s144_s3 = scalar_lea.sflag [#allocation3], %s7162_s26 }
  0x3b   : > { %s7166_s4 = scalar_lea.vmem [#allocation2], %s6805_s28 }
  0x3c   : > { %6986 = dma.done.wait (%p7097_p8), %s144_s3, 1024  }
  0x3d   : > { %6988 = vsyncadd (%p7097_p8), %s144_s3, 4294966272  ;;  %v207_v0 = vlaneseq  ;;  %v168_v1 = vld [vmem:[%s7166_s4] sm:$0xff]  ;;  %v6807_v2 = vld [vmem:[%s7166_s4 + $0x10] sm:$0xff]  ;;  %vm559_vm0 = vcmask 7168   ;;  %s7023_s18 = smov 2   ;;  %s7024_s27 = smov 4  }
  0x3e   : > { %v6809_v3 = vld [vmem:[%s7166_s4 + $0x20] sm:$0xff]  ;;  %v170_v5 = vmul.f32 0.5, %v168_v1  ;;  %v175_v6 = vmul.f32 0.5, %v6807_v2  ;;  %v6811_v8 = vld [vmem:[%s7166_s4 + $0x30] sm:$0xff]  ;;  %v169_v9 = vld [vmem:[%s7166_s4 + $0x8] sm:$0xff]  ;;  %s7025_s29 = smov 6  }
  0x3f   : > { %v7175_v4 = vshrl.u32 %v207_v0, 7  ;;  %v7177_v7 = vmul.f32 0.5, %v6809_v3  ;;  %v6808_v10 = vld [vmem:[%s7166_s4 + $0x18] sm:$0xff]  ;;  %v171_v11 = vmul.f32 0.5, %v169_v9  ;;  %v7182_v13 = vmul.f32 0.5, %v6811_v8  ;;  %v6810_v30 = vld [vmem:[%s7166_s4 + $0x28] sm:$0xff] }
  0x40   : > { %v176_v12 = vmul.f32 0.5, %v6808_v10  ;;  %v7184_v14 = vsub.f32 %v170_v5, %v175_v6  ;;  %v7186_v15 = vadd.f32 %v175_v6, %v170_v5  ;;  %v7221_v33 = vmul.f32 0.5, %v6810_v30  ;;  %v6812_v35 = vld [vmem:[%s7166_s4 + $0x38] sm:$0xff]  ;;  %s7026_s30 = smov 8   ;;  %s7027_s2 = smov 10  }
  0x41   : > { %v7193_v18 = vsub.s32 1, %v7175_v4  ;;  %v7196_v19 = vsub.s32 0, %v7175_v4  ;;  %v7202_v23 = vsub.s32 2, %v7175_v4  ;;  %v7206_v25 = vsub.s32 3, %v7175_v4  ;;  %s7028_s5 = smov 12   ;;  %s7029_s12 = smov 14  }
  0x42   : > { %v7188_v16 = vadd.f32 %v176_v12, %v171_v11  ;;  %v189_v17 = vsub.f32 %v7184_v14, %v7177_v7  ;;  %v7210_v27 = vsub.s32 4, %v7175_v4  ;;  %v7214_v29 = vsub.s32 5, %v7175_v4  ;;  %s7030_s13 = smov 16   ;;  %s7031_s15 = smov 18  }
  0x43   : > { %v7219_v32 = vsub.s32 6, %v7175_v4  ;;  %v7223_v34 = vsub.f32 %v171_v11, %v176_v12  ;;  %v7228_v37 = vsub.s32 7, %v7175_v4  ;;  %v7230_v38 = vmul.f32 0.5, %v6812_v35  ;;  %s7032_s16 = smov 20   ;;  %s7033_s17 = smov 22  }
  0x44   : > { %v191_v20 = vadd.f32 %v189_v17, %v7182_v13  ;;  %v199_v49 = vsub.f32 %v7186_v15, %v7177_v7  ;;  %v200_v59 = vsub.f32 %v7188_v16, %v7221_v33  ;;  %v193_v9 = vadd.f32 %v7184_v14, %v7177_v7  ;;  %s7034_s22 = smov 24   ;;  %s7035_s23 = smov 26  }
  0x45   : > { %v190_v39 = vsub.f32 %v7223_v34, %v7221_v33  ;;  %s7036_s24 = smov 28   ;;  %s7037_s25 = smov 30   ;;  %vm3504_vm1 = vcmask 15360   ;;  %vm3521_vm2 = vcmask 31744   ;;  %vm3538_vm3 = vcmask 48128  }
  0x46   : > { %v221_v21 = vrot.slane %v191_v20, %v7193_v18  ;;  %v210_v22 = vrot.slane %v191_v20, %v7196_v19  ;;  %v232_v24 = vrot.slane %v191_v20, %v7202_v23  ;;  %v243_v26 = vrot.slane %v191_v20, %v7206_v25  ;;  %s6806_s28 = sshll.u32 %s7162_s26, 5  ;;  %s6819_s4 = sshll.u32 %s7007_s9, 9 }
  0x47   : > { %v254_v28 = vrot.slane %v191_v20, %v7210_v27  ;;  %v265_v31 = vrot.slane %v191_v20, %v7214_v29  ;;  %v276_v36 = vrot.slane %v191_v20, %v7219_v32  ;;  %v287_v40 = vrot.slane %v191_v20, %v7228_v37  ;;  %s12067_s3 = scalar_lea.vmem [#allocation5], %s6806_s28  ;;  %p13248_p9 = scmp.ne.s32.totalorder %s12268_s19, 0 }
  0x48   : > { %223 = vbcast.lane.b32.xlu1 %v221_v21, 256  ;;  %212 = vbcast.lane.b32.xlu0 %v210_v22, 256  ;;  %v192_v41 = vadd.f32 %v190_v39, %v7230_v38  ;;  %v201_v51 = vsub.f32 %v199_v49, %v7182_v13  ;;  %v202_v61 = vsub.f32 %v200_v59, %v7230_v38  ;;  %vm3555_vm4 = vcmask 64512  }
  0x49   : > { %v195_v17 = vsub.f32 %v193_v9, %v7182_v13  ;;  %v194_v49 = vadd.f32 %v7223_v34, %v7221_v33  ;;  %vm3572_vm5 = vcmask 80896   ;;  %vm3589_vm6 = vcmask 97280  }
  0x4a   : > { %v298_v42 = vrot.slane %v192_v41, %v7196_v19  ;;  %v309_v43 = vrot.slane %v192_v41, %v7193_v18  ;;  %v320_v44 = vrot.slane %v192_v41, %v7202_v23  ;;  %v331_v45 = vrot.slane %v192_v41, %v7206_v25 }
  0x4b   : > { %v342_v46 = vrot.slane %v192_v41, %v7210_v27  ;;  %v353_v47 = vrot.slane %v192_v41, %v7214_v29  ;;  %v364_v48 = vrot.slane %v192_v41, %v7219_v32  ;;  %v375_v50 = vrot.slane %v192_v41, %v7228_v37 }
  0x4c   : > { %227 = vbcast.lane.b32.xlu1 %v221_v21, 264  ;;  %216 = vbcast.lane.b32.xlu0 %v210_v22, 264  ;;  %v386_v52 = vrot.slane %v201_v51, %v7196_v19  ;;  %v397_v53 = vrot.slane %v201_v51, %v7193_v18  ;;  %v408_v54 = vrot.slane %v201_v51, %v7202_v23  ;;  %vm3606_vm7 = vcmask 113664  }
  0x4d   : > { %v419_v55 = vrot.slane %v201_v51, %v7206_v25  ;;  %v430_v56 = vrot.slane %v201_v51, %v7210_v27  ;;  %v441_v57 = vrot.slane %v201_v51, %v7214_v29  ;;  %v452_v58 = vrot.slane %v201_v51, %v7219_v32 }
  0x4e   : > { %v463_v60 = vrot.slane %v201_v51, %v7228_v37  ;;  %v474_v62 = vrot.slane %v202_v61, %v7196_v19  ;;  %v485_v63 = vrot.slane %v202_v61, %v7193_v18  ;;  %v496_v0 = vrot.slane %v202_v61, %v7202_v23 }
  0x4f   : > { %v507_v1 = vrot.slane %v202_v61, %v7206_v25  ;;  %v518_v2 = vrot.slane %v202_v61, %v7210_v27  ;;  %v529_v3 = vrot.slane %v202_v61, %v7214_v29  ;;  %v540_v8 = vrot.slane %v202_v61, %v7219_v32 }
  0x50   : > { %238 = vbcast.lane.b32.xlu1 %v232_v24, 264  ;;  %234 = vbcast.lane.b32.xlu0 %v232_v24, 256  ;;  %v551_v12 = vrot.slane %v202_v61, %v7228_v37  ;;  %v595_v22 = vrot.slane %v195_v17, %v7196_v19  ;;  %v628_v39 = vrot.slane %v195_v17, %v7206_v25  ;;  %vm3623_vm8 = vcmask 130048  }
  0x51   : > { %vm3640_vm9 = vcmask 146432   ;;  %vm3657_vm10 = vcmask 162816   ;;  %vm3674_vm11 = vcmask 179200   ;;  %vm3691_vm12 = vcmask 195584  }
  0x52   : > { %vm3708_vm13 = vcmask 211968   ;;  %vm3725_vm14 = vcmask 228352   ;;  %vm3742_vm15 = vcmask 244736  }
  0x54   : > { %249 = vbcast.lane.b32.xlu1 %v243_v26, 264  ;;  %245 = vbcast.lane.b32.xlu0 %v243_v26, 256  ;;  %v606_v26 = vrot.slane %v195_v17, %v7193_v18 }
  0x58   : > { %260 = vbcast.lane.b32.xlu1 %v254_v28, 264  ;;  %256 = vbcast.lane.b32.xlu0 %v254_v28, 256 }
  0x5c   : > { %271 = vbcast.lane.b32.xlu1 %v265_v31, 264  ;;  %267 = vbcast.lane.b32.xlu0 %v265_v31, 256  ;;  %v617_v31 = vrot.slane %v195_v17, %v7202_v23 }
  0x60   : > { %282 = vbcast.lane.b32.xlu1 %v276_v36, 264  ;;  %278 = vbcast.lane.b32.xlu0 %v276_v36, 256 }
  0x64   : > { %293 = vbcast.lane.b32.xlu1 %v287_v40, 264  ;;  %289 = vbcast.lane.b32.xlu0 %v287_v40, 256 }
  0x68   : > { %304 = vbcast.lane.b32.xlu1 %v298_v42, 264  ;;  %300 = vbcast.lane.b32.xlu0 %v298_v42, 256  ;;  %v639_v42 = vrot.slane %v195_v17, %v7210_v27 }
  0x6c   : > { %315 = vbcast.lane.b32.xlu1 %v309_v43, 264  ;;  %311 = vbcast.lane.b32.xlu0 %v309_v43, 256 }
  0x70   : > { %326 = vbcast.lane.b32.xlu1 %v320_v44, 264  ;;  %322 = vbcast.lane.b32.xlu0 %v320_v44, 256 }
  0x74   : > { %337 = vbcast.lane.b32.xlu1 %v331_v45, 264  ;;  %333 = vbcast.lane.b32.xlu0 %v331_v45, 256  ;;  %v650_v45 = vrot.slane %v195_v17, %v7214_v29 }
  0x78   : > { %348 = vbcast.lane.b32.xlu1 %v342_v46, 264  ;;  %344 = vbcast.lane.b32.xlu0 %v342_v46, 256 }
  0x7c   : > { %359 = vbcast.lane.b32.xlu1 %v353_v47, 264  ;;  %355 = vbcast.lane.b32.xlu0 %v353_v47, 256 }
  0x80   : > { %370 = vbcast.lane.b32.xlu1 %v364_v48, 264  ;;  %366 = vbcast.lane.b32.xlu0 %v364_v48, 256  ;;  %v661_v48 = vrot.slane %v195_v17, %v7219_v32 }
  0x84   : > { %381 = vbcast.lane.b32.xlu1 %v375_v50, 264  ;;  %377 = vbcast.lane.b32.xlu0 %v375_v50, 256 }
  0x88   : > { %392 = vbcast.lane.b32.xlu1 %v386_v52, 264  ;;  %388 = vbcast.lane.b32.xlu0 %v386_v52, 256  ;;  %v672_v52 = vrot.slane %v195_v17, %v7228_v37 }
  0x8c   : > { %403 = vbcast.lane.b32.xlu1 %v397_v53, 264  ;;  %399 = vbcast.lane.b32.xlu0 %v397_v53, 256  ;;  %v196_v53 = vsub.f32 %v194_v49, %v7230_v38 }
  0x8e   : > { %v705_v61 = vrot.slane %v196_v53, %v7202_v23 }
  0x90   : > { %414 = vbcast.lane.b32.xlu1 %v408_v54, 264  ;;  %410 = vbcast.lane.b32.xlu0 %v408_v54, 256 }
  0x94   : > { %425 = vbcast.lane.b32.xlu1 %v419_v55, 264  ;;  %421 = vbcast.lane.b32.xlu0 %v419_v55, 256 }
  0x98   : > { %436 = vbcast.lane.b32.xlu1 %v430_v56, 264  ;;  %432 = vbcast.lane.b32.xlu0 %v430_v56, 256  ;;  %v683_v56 = vrot.slane %v196_v53, %v7196_v19 }
  0x9c   : > { %447 = vbcast.lane.b32.xlu1 %v441_v57, 264  ;;  %443 = vbcast.lane.b32.xlu0 %v441_v57, 256 }
  0xa0   : > { %458 = vbcast.lane.b32.xlu1 %v452_v58, 264  ;;  %454 = vbcast.lane.b32.xlu0 %v452_v58, 256  ;;  %v694_v58 = vrot.slane %v196_v53, %v7193_v18 }
  0xa4   : > { %469 = vbcast.lane.b32.xlu1 %v463_v60, 264  ;;  %465 = vbcast.lane.b32.xlu0 %v463_v60, 256 }
  0xa8   : > { %480 = vbcast.lane.b32.xlu1 %v474_v62, 264  ;;  %476 = vbcast.lane.b32.xlu0 %v474_v62, 256 }
  0xac   : > { %491 = vbcast.lane.b32.xlu1 %v485_v63, 264  ;;  %487 = vbcast.lane.b32.xlu0 %v485_v63, 256 }
  0xb0   : > { %502 = vbcast.lane.b32.xlu1 %v496_v0, 264  ;;  %498 = vbcast.lane.b32.xlu0 %v496_v0, 256  ;;  %v716_v0 = vrot.slane %v196_v53, %v7206_v25 }
  0xb4   : > { %513 = vbcast.lane.b32.xlu1 %v507_v1, 264  ;;  %509 = vbcast.lane.b32.xlu0 %v507_v1, 256 }
  0xb8   : > { %524 = vbcast.lane.b32.xlu1 %v518_v2, 264  ;;  %520 = vbcast.lane.b32.xlu0 %v518_v2, 256 }
  0xba   : > { %v7264_v5 = vpop.permute.xlu1 %223  ;;  %v7266_v6 = vpop.permute.xlu0 %212 }
  0xbc   : > { %535 = vbcast.lane.b32.xlu1 %v529_v3, 264  ;;  %531 = vbcast.lane.b32.xlu0 %v529_v3, 256  ;;  %v727_v3 = vrot.slane %v196_v53, %v7210_v27 }
  0xbe   : > { %v7271_v10 = vpop.permute.xlu1 %227  ;;  %v7273_v11 = vpop.permute.xlu0 %216 }
  0xc0   : > { %546 = vbcast.lane.b32.xlu1 %v540_v8, 264  ;;  %542 = vbcast.lane.b32.xlu0 %v540_v8, 256 }
  0xc2   : > { %v7277_v20 = vpop.permute.xlu1 %238  ;;  %v7279_v21 = vpop.permute.xlu0 %234 }
  0xc4   : > { %557 = vbcast.lane.b32.xlu1 %v551_v12, 264  ;;  %553 = vbcast.lane.b32.xlu0 %v551_v12, 256  ;;  %v738_v12 = vrot.slane %v196_v53, %v7214_v29 }
  0xc6   : > { %v7282_v24 = vpop.permute.xlu1 %249  ;;  %v7284_v14 = vpop.permute.xlu0 %245 }
  0xc8   : > { %601 = vbcast.lane.b32.xlu1 %v595_v22, 264  ;;  %597 = vbcast.lane.b32.xlu0 %v595_v22, 256 }
  0xca   : > { %v7287_v28 = vpop.permute.xlu1 %260  ;;  %v7289_v30 = vpop.permute.xlu0 %256 }
  0xcc   : > { %612 = vbcast.lane.b32.xlu1 %v606_v26, 264  ;;  %608 = vbcast.lane.b32.xlu0 %v606_v26, 256  ;;  %v749_v26 = vrot.slane %v196_v53, %v7219_v32 }
  0xce   : > { %v7292_v35 = vpop.permute.xlu1 %271  ;;  %v7294_v36 = vpop.permute.xlu0 %267 }
  0xd0   : > { %623 = vbcast.lane.b32.xlu1 %v617_v31, 264  ;;  %619 = vbcast.lane.b32.xlu0 %v617_v31, 256  ;;  %v203_v31 = vadd.f32 %v7186_v15, %v7177_v7 }
  0xd2   : > { %v7297_v40 = vpop.permute.xlu1 %282  ;;  %v7299_v41 = vpop.permute.xlu0 %278 }
  0xd3   : > { %12272 = vst [vmem:[#allocation8_spill] sm:$0xff] %v7297_v40 }
  0xd4   : > { %634 = vbcast.lane.b32.xlu1 %v628_v39, 264  ;;  %630 = vbcast.lane.b32.xlu0 %v628_v39, 256 }
  0xd6   : > { %v7302_v43 = vpop.permute.xlu1 %293  ;;  %v7304_v44 = vpop.permute.xlu0 %289 }
  0xd8   : > { %645 = vbcast.lane.b32.xlu1 %v639_v42, 264  ;;  %641 = vbcast.lane.b32.xlu0 %v639_v42, 256 }
  0xda   : > { %v7307_v46 = vpop.permute.xlu1 %304  ;;  %v7309_v47 = vpop.permute.xlu0 %300 }
  0xdb   : > { %12273 = vst [vmem:[#allocation9_spill] sm:$0xff] %v7307_v46 }
  0xdc   : > { %656 = vbcast.lane.b32.xlu1 %v650_v45, 264  ;;  %652 = vbcast.lane.b32.xlu0 %v650_v45, 256  ;;  %v760_v45 = vrot.slane %v196_v53, %v7228_v37 }
  0xde   : > { %v7314_v50 = vpop.permute.xlu1 %315  ;;  %v7316_v51 = vpop.permute.xlu0 %311 }
  0xdf   : > { %12274 = vst [vmem:[#allocation10_spill] sm:$0xff] %v7314_v50 }
  0xe0   : > { %667 = vbcast.lane.b32.xlu1 %v661_v48, 264  ;;  %663 = vbcast.lane.b32.xlu0 %v661_v48, 256  ;;  %v205_v48 = vadd.f32 %v203_v31, %v7182_v13 }
  0xe2   : > { %v7320_v54 = vpop.permute.xlu1 %326  ;;  %v7322_v55 = vpop.permute.xlu0 %322 }
  0xe3   : > { %12275 = vst [vmem:[#allocation11_spill] sm:$0xff] %v7320_v54 }
  0xe4   : > { %678 = vbcast.lane.b32.xlu1 %v672_v52, 264  ;;  %674 = vbcast.lane.b32.xlu0 %v672_v52, 256 }
  0xe6   : > { %v7325_v57 = vpop.permute.xlu1 %337  ;;  %v7327_v34 = vpop.permute.xlu0 %333 }
  0xe7   : > { %12276 = vst [vmem:[#allocation12_spill] sm:$0xff] %v7325_v57  ;;  %v848_v57 = vrot.slane %v205_v48, %v7228_v37 }
  0xe8   : > { %689 = vbcast.lane.b32.xlu1 %v683_v56, 264  ;;  %685 = vbcast.lane.b32.xlu0 %v683_v56, 256  ;;  %v771_v56 = vrot.slane %v205_v48, %v7196_v19 }
  0xea   : > { %v7330_v59 = vpop.permute.xlu1 %348  ;;  %v7332_v60 = vpop.permute.xlu0 %344 }
  0xeb   : > { %12277 = vst [vmem:[#allocation13_spill] sm:$0xff] %v7330_v59 }
  0xec   : > { %700 = vbcast.lane.b32.xlu1 %v694_v58, 264  ;;  %696 = vbcast.lane.b32.xlu0 %v694_v58, 256  ;;  %v782_v58 = vrot.slane %v205_v48, %v7193_v18 }
  0xee   : > { %v7335_v62 = vpop.permute.xlu1 %359  ;;  %v7337_v63 = vpop.permute.xlu0 %355 }
  0xef   : > { %12278 = vst [vmem:[#allocation14_spill] sm:$0xff] %v7335_v62  ;;  %v204_v62 = vadd.f32 %v7188_v16, %v7221_v33 }
  0xf0   : > { %711 = vbcast.lane.b32.xlu1 %v705_v61, 264  ;;  %707 = vbcast.lane.b32.xlu0 %v705_v61, 256  ;;  %v793_v61 = vrot.slane %v205_v48, %v7202_v23 }
  0xf2   : > { %v7340_v1 = vpop.permute.xlu1 %370  ;;  %v7342_v2 = vpop.permute.xlu0 %366 }
  0xf3   : > { %12279 = vst [vmem:[#allocation15_spill] sm:$0xff] %v7340_v1 }
  0xf4   : > { %722 = vbcast.lane.b32.xlu1 %v716_v0, 264  ;;  %718 = vbcast.lane.b32.xlu0 %v716_v0, 256 }
  0xf6   : > { %v7345_v8 = vpop.permute.xlu1 %381  ;;  %v7347_v9 = vpop.permute.xlu0 %377 }
  0xf7   : > { %12280 = vst [vmem:[#allocation16_spill] sm:$0xff] %v7345_v8 }
  0xf8   : > { %733 = vbcast.lane.b32.xlu1 %v727_v3, 264  ;;  %729 = vbcast.lane.b32.xlu0 %v727_v3, 256 }
  0xfa   : > { %v7350_v17 = vpop.permute.xlu1 %392  ;;  %v7352_v22 = vpop.permute.xlu0 %388 }
  0xfc   : > { %744 = vbcast.lane.b32.xlu1 %v738_v12, 264  ;;  %740 = vbcast.lane.b32.xlu0 %v738_v12, 256  ;;  %v804_v12 = vrot.slane %v205_v48, %v7206_v25 }
  0xfe   : > { %v7357_v39 = vpop.permute.xlu1 %403  ;;  %v7359_v42 = vpop.permute.xlu0 %399 }
 0x100   : > { %755 = vbcast.lane.b32.xlu1 %v749_v26, 264  ;;  %751 = vbcast.lane.b32.xlu0 %v749_v26, 256 }
 0x102   : > { %v7363_v49 = vpop.permute.xlu1 %414  ;;  %v7365_v52 = vpop.permute.xlu0 %410 }
 0x104   : > { %766 = vbcast.lane.b32.xlu1 %v760_v45, 264  ;;  %762 = vbcast.lane.b32.xlu0 %v760_v45, 256  ;;  %v815_v45 = vrot.slane %v205_v48, %v7210_v27 }
 0x106   : > { %v7368_v7 = vpop.permute.xlu1 %425  ;;  %v7370_v15 = vpop.permute.xlu0 %421 }
 0x108   : > { %777 = vbcast.lane.b32.xlu1 %v771_v56, 264  ;;  %773 = vbcast.lane.b32.xlu0 %v771_v56, 256 }
 0x10a   : > { %v7373_v53 = vpop.permute.xlu1 %436  ;;  %v7375_v13 = vpop.permute.xlu0 %432 }
 0x10c   : > { %788 = vbcast.lane.b32.xlu1 %v782_v58, 264  ;;  %784 = vbcast.lane.b32.xlu0 %v782_v58, 256  ;;  %v826_v58 = vrot.slane %v205_v48, %v7214_v29 }
 0x10e   : > { %v7378_v0 = vpop.permute.xlu1 %447  ;;  %v7380_v3 = vpop.permute.xlu0 %443 }
 0x110   : > { %799 = vbcast.lane.b32.xlu1 %v793_v61, 264  ;;  %795 = vbcast.lane.b32.xlu0 %v793_v61, 256  ;;  %v837_v61 = vrot.slane %v205_v48, %v7219_v32 }
 0x112   : > { %v7383_v26 = vpop.permute.xlu1 %458  ;;  %v7385_v31 = vpop.permute.xlu0 %454 }
 0x114   : > { %810 = vbcast.lane.b32.xlu1 %v804_v12, 264  ;;  %806 = vbcast.lane.b32.xlu0 %v804_v12, 256 }
 0x116   : > { %v7388_v56 = vpop.permute.xlu1 %469  ;;  %v7390_v1 = vpop.permute.xlu0 %465 }
 0x118   : > { %821 = vbcast.lane.b32.xlu1 %v815_v45, 264  ;;  %817 = vbcast.lane.b32.xlu0 %v815_v45, 256  ;;  %v206_v45 = vadd.f32 %v204_v62, %v7230_v38 }
 0x11a   : > { %v7393_v8 = vpop.permute.xlu1 %480  ;;  %v7395_v59 = vpop.permute.xlu0 %476  ;;  %v859_v50 = vrot.slane %v206_v45, %v7196_v19  ;;  %v881_v62 = vrot.slane %v206_v45, %v7202_v23 }
 0x11b   : > { %12281 = vst [vmem:[#allocation17_spill] sm:$0xff] %v7393_v8 }
 0x11c   : > { %832 = vbcast.lane.b32.xlu1 %v826_v58, 264  ;;  %828 = vbcast.lane.b32.xlu0 %v826_v58, 256  ;;  %v870_v58 = vrot.slane %v206_v45, %v7193_v18 }
 0x11e   : > { %v7400_v12 = vpop.permute.xlu1 %491  ;;  %v7402_v54 = vpop.permute.xlu0 %487 }
 0x11f   : > { %12282 = vst [vmem:[#allocation18_spill] sm:$0xff] %v7400_v12  ;;  %v7021_v12 = vmov 1934713408  }
 0x120   : > { %843 = vbcast.lane.b32.xlu1 %v837_v61, 264  ;;  %839 = vbcast.lane.b32.xlu0 %v837_v61, 256  ;;  %v993_v40 = vunpack.c.l.s4 %v7021_v12  ;;  %v7451_v12 = vsel %vm559_vm0, %v7266_v6, %v7352_v22  ;;  %v7477_v6 = vsel %vm559_vm0, %v7279_v21, %v7365_v52  ;;  %v936_v22 = vrot.slane %v206_v45, %v7228_v37 }
 0x121   : > { %v7503_v52 = vsel %vm559_vm0, %v7294_v36, %v7380_v3 }
 0x122   : > { %v7406_v46 = vpop.permute.xlu1 %502  ;;  %v7408_v8 = vpop.permute.xlu0 %498 }
 0x123   : > { %12283 = vst [vmem:[#allocation19_spill] sm:$0xff] %v7406_v46 }
 0x124   : > { %854 = vbcast.lane.b32.xlu1 %v848_v57, 264  ;;  %850 = vbcast.lane.b32.xlu0 %v848_v57, 256  ;;  %v892_v57 = vrot.slane %v206_v45, %v7206_v25  ;;  %v914_v25 = vrot.slane %v206_v45, %v7214_v29  ;;  %v925_v29 = vrot.slane %v206_v45, %v7219_v32 }
 0x125   : > { %v7472_v32 = vsel %vm559_vm0, %v7284_v14, %v7370_v15  ;;  %v7508_v15 = vsel %vm559_vm0, %v7289_v30, %v7375_v13 }
 0x126   : > { %v7411_v16 = vpop.permute.xlu1 %513  ;;  %v7413_v33 = vpop.permute.xlu0 %509 }
 0x127   : > { %12284 = vst [vmem:[#allocation20_spill] sm:$0xff] %v7411_v16  ;;  %v903_v16 = vrot.slane %v206_v45, %v7210_v27  ;;  %v994_v27 = vunpack.c.0.s8 %v993_v40  ;;  %v12245_v45 = vmov 0.0  }
 0x128   : > { %865 = vbcast.lane.b32.xlu1 %v859_v50, 264  ;;  %861 = vbcast.lane.b32.xlu0 %v859_v50, 256  ;;  %v7020_v50 = vmov 1983009808  }
 0x12a   : > { %v7416_v48 = vpop.permute.xlu1 %524  ;;  %v7418_v38 = vpop.permute.xlu0 %520 }
 0x12b   : > { %12285 = vst [vmem:[#allocation21_spill] sm:$0xff] %v7416_v48  ;;  %v978_v48 = vunpack.c.l.s4 %v7020_v50 }
 0x12c   : > { %876 = vbcast.lane.b32.xlu1 %v870_v58, 264  ;;  %872 = vbcast.lane.b32.xlu0 %v870_v58, 256 }
 0x12e   : > { %v7421_v61 = vpop.permute.xlu1 %535  ;;  %v7423_v19 = vpop.permute.xlu0 %531 }
 0x12f   : > { %12286 = vst [vmem:[#allocation22_spill] sm:$0xff] %v7421_v61  ;;  %v979_v61 = vunpack.c.0.s8 %v978_v48 }
 0x130   : > { %887 = vbcast.lane.b32.xlu1 %v881_v62, 264  ;;  %883 = vbcast.lane.b32.xlu0 %v881_v62, 256 }
 0x131   : > { %v7441_v50 = vsub.s32 %v979_v61, %v7175_v4 }
 0x132   : > { %v7426_v46 = vpop.permute.xlu1 %546  ;;  %v7428_v18 = vpop.permute.xlu0 %542 }
 0x133   : > { %12287 = vst [vmem:[#allocation23_spill] sm:$0xff] %v7426_v46  ;;  %12289 = vst [vmem:[#allocation25_spill] sm:$0xff] %v7441_v50  ;;  %v7486_v61 = vrot.slane %v7472_v32, %v7441_v50  ;;  %v7498_v37 = vrot.slane %v7477_v6, %v7441_v50 }
 0x134   : > { %898 = vbcast.lane.b32.xlu1 %v892_v57, 264  ;;  %894 = vbcast.lane.b32.xlu0 %v892_v57, 256  ;;  %v7446_v57 = vsel %vm559_vm0, %v7264_v5, %v7359_v42  ;;  %v7463_v5 = vsub.s32 %v994_v27, %v7175_v4  ;;  %v7467_v42 = vrot.slane %v7451_v12, %v7441_v50 }
 0x136   : > { %v7431_v23 = vpop.permute.xlu1 %557  ;;  %v7433_v58 = vpop.permute.xlu0 %553  ;;  %v7494_v21 = vrot.slane %v7467_v42, %v7463_v5  ;;  %v7528_v13 = vrot.slane %v7498_v37, %v7463_v5 }
 0x138   : > { %909 = vbcast.lane.b32.xlu1 %v903_v16, 264  ;;  %905 = vbcast.lane.b32.xlu0 %v903_v16, 256  ;;  %v7456_v16 = vrot.slane %v7446_v57, %v7441_v50  ;;  %12294 = vst [vmem:[#allocation30_spill] sm:$0xff] %v7494_v21  ;;  %v1021_v30 = vcombine.high %v7494_v21, %v12245_v45  ;;  %12297 = vst [vmem:[#allocation33_spill] sm:$0xff] %v7528_v13 }
 0x13a   : > { %v7436_v62 = vpop.permute.xlu1 %601  ;;  %v7438_v46 = vpop.permute.xlu0 %597  ;;  %v7482_v4 = vrot.slane %v7456_v16, %v7463_v5 }
 0x13b   : > { %12288 = vst [vmem:[#allocation24_spill] sm:$0xff] %v7436_v62 }
 0x13c   : > { %920 = vbcast.lane.b32.xlu1 %v914_v25, 264  ;;  %916 = vbcast.lane.b32.xlu0 %v914_v25, 256  ;;  %12291 = vst [vmem:[#allocation27_spill] sm:$0xff] %v7482_v4  ;;  %v1119_v27 = vcombine.high %v7482_v4, %v12245_v45  ;;  %v7537_v4 = vsel %vm559_vm0, %v7304_v44, %v7390_v1 }
 0x13d   : > { %v7554_v44 = vrot.slane %v7537_v4, %v7441_v50 }
 0x13e   : > { %v7458_v48 = vpop.permute.xlu1 %612  ;;  %v7460_v40 = vpop.permute.xlu0 %608 }
 0x13f   : > { %12290 = vst [vmem:[#allocation26_spill] sm:$0xff] %v7458_v48  ;;  %v7586_v48 = vrot.slane %v7554_v44, %v7463_v5 }
 0x140   : > { %931 = vbcast.lane.b32.xlu1 %v925_v29, 264  ;;  %927 = vbcast.lane.b32.xlu0 %v925_v29, 256  ;;  %v7514_v29 = vrot.slane %v7486_v61, %v7463_v5 }
 0x141   : > { %12302 = vst [vmem:[#allocation38_spill] sm:$0xff] %v7586_v48 }
 0x142   : > { %v7488_v25 = vpop.permute.xlu1 %623  ;;  %v7490_v14 = vpop.permute.xlu0 %619  ;;  %12295 = vst [vmem:[#allocation31_spill] sm:$0xff] %v7514_v29  ;;  %v1315_v21 = vcombine.high %v7514_v29, %v12245_v45  ;;  %v7573_v29 = vsel %vm559_vm0, %v7316_v51, %v7402_v54 }
 0x143   : > { %12292 = vst [vmem:[#allocation28_spill] sm:$0xff] %v7488_v25  ;;  %12293 = vst [vmem:[#allocation29_spill] sm:$0xff] %v7490_v14  ;;  %v7518_v25 = vrot.slane %v7503_v52, %v7441_v50  ;;  %v7590_v51 = vrot.slane %v7573_v29, %v7441_v50 }
 0x144   : > { %942 = vbcast.lane.b32.xlu1 %v936_v22, 264  ;;  %938 = vbcast.lane.b32.xlu0 %v936_v22, 256  ;;  %v7532_v22 = vrot.slane %v7508_v15, %v7441_v50 }
 0x145   : > { %v7550_v62 = vrot.slane %v7518_v25, %v7463_v5 }
 0x146   : > { %v7520_v36 = vpop.permute.xlu1 %634  ;;  %v7522_v3 = vpop.permute.xlu0 %630 }
 0x147   : > { %12296 = vst [vmem:[#allocation32_spill] sm:$0xff] %v7520_v36  ;;  %v7542_v36 = vsel %vm559_vm0, %v7299_v41, %v7385_v31  ;;  %12298 = vst [vmem:[#allocation34_spill] sm:$0xff] %v7550_v62  ;;  %v1217_v31 = vcombine.high %v7528_v13, %v12245_v45  ;;  %v1511_v13 = vcombine.high %v7550_v62, %v12245_v45 }
 0x148   : > { %2562 = vrot.lane.b32.xlu1 %v1119_v27, %s7023_s18  ;;  %2560 = vrot.lane.b32.xlu0 %v1021_v30, %s7023_s18  ;;  %v7564_v27 = vrot.slane %v7532_v22, %v7463_v5  ;;  %v7568_v30 = vrot.slane %v7542_v36, %v7441_v50  ;;  %v7614_v62 = vsel %vm559_vm0, %v7322_v55, %v7408_v8 }
 0x14a   : > { %v7556_v1 = vpop.permute.xlu1 %645  ;;  %v7558_v41 = vpop.permute.xlu0 %641  ;;  %12301 = vst [vmem:[#allocation37_spill] sm:$0xff] %v7564_v27 }
 0x14b   : > { %12299 = vst [vmem:[#allocation35_spill] sm:$0xff] %v7556_v1  ;;  %12300 = vst [vmem:[#allocation36_spill] sm:$0xff] %v7558_v41  ;;  %v7578_v1 = vsel %vm559_vm0, %v7309_v47, %v7395_v59  ;;  %v1413_v47 = vcombine.high %v7564_v27, %v12245_v45  ;;  %v7600_v59 = vrot.slane %v7568_v30, %v7463_v5 }
 0x14c   : > { %2566 = vrot.lane.b32.xlu1 %v1315_v21, %s7023_s18  ;;  %2564 = vrot.lane.b32.xlu0 %v1217_v31, %s7023_s18  ;;  %v7604_v21 = vrot.slane %v7578_v1, %v7441_v50  ;;  %v7609_v31 = vsel %vm559_vm0, %v7327_v34, %v7413_v33  ;;  %v1707_v27 = vcombine.high %v7586_v48, %v12245_v45 }
 0x14d   : > { %12305 = vst [vmem:[#allocation41_spill] sm:$0xff] %v7600_v59  ;;  %v7626_v34 = vrot.slane %v7609_v31, %v7441_v50  ;;  %v1609_v55 = vcombine.high %v7600_v59, %v12245_v45  ;;  %v7650_v48 = vsel %vm559_vm0, %v7332_v60, %v7418_v38 }
 0x14e   : > { %v7592_v54 = vpop.permute.xlu1 %656  ;;  %v7594_v41 = vpop.permute.xlu0 %652  ;;  %v7636_v8 = vrot.slane %v7604_v21, %v7463_v5 }
 0x14f   : > { %12303 = vst [vmem:[#allocation39_spill] sm:$0xff] %v7592_v54  ;;  %12304 = vst [vmem:[#allocation40_spill] sm:$0xff] %v7594_v41  ;;  %v7622_v54 = vrot.slane %v7590_v51, %v7463_v5 }
 0x150   : > { %2570 = vrot.lane.b32.xlu1 %v1511_v13, %s7023_s18  ;;  %2568 = vrot.lane.b32.xlu0 %v1413_v47, %s7023_s18  ;;  %12309 = vst [vmem:[#allocation45_spill] sm:$0xff] %v7636_v8  ;;  %v7640_v13 = vrot.slane %v7614_v62, %v7441_v50  ;;  %v7645_v47 = vsel %vm559_vm0, %v7337_v63, %v7423_v19 }
 0x151   : > { %12306 = vst [vmem:[#allocation42_spill] sm:$0xff] %v7622_v54  ;;  %v1903_v59 = vcombine.high %v7622_v54, %v12245_v45  ;;  %v7662_v63 = vrot.slane %v7645_v47, %v7441_v50  ;;  %v1805_v60 = vcombine.high %v7636_v8, %v12245_v45  ;;  %v7686_v54 = vsel %vm559_vm0, %v7342_v2, %v7428_v18 }
 0x152   : > { %v7628_v33 = vpop.permute.xlu1 %667  ;;  %v7630_v41 = vpop.permute.xlu0 %663  ;;  %v7672_v38 = vrot.slane %v7640_v13, %v7463_v5 }
 0x153   : > { %12307 = vst [vmem:[#allocation43_spill] sm:$0xff] %v7628_v33  ;;  %12308 = vst [vmem:[#allocation44_spill] sm:$0xff] %v7630_v41  ;;  %v7658_v33 = vrot.slane %v7626_v34, %v7463_v5 }
 0x154   : > { %2574 = vrot.lane.b32.xlu1 %v1707_v27, %s7023_s18  ;;  %2572 = vrot.lane.b32.xlu0 %v1609_v55, %s7023_s18  ;;  %12313 = vst [vmem:[#allocation49_spill] sm:$0xff] %v7672_v38  ;;  %v7676_v27 = vrot.slane %v7650_v48, %v7441_v50  ;;  %v7681_v55 = vsel %vm559_vm0, %v7347_v9, %v7433_v58 }
 0x155   : > { %12310 = vst [vmem:[#allocation46_spill] sm:$0xff] %v7658_v33  ;;  %v2099_v8 = vcombine.high %v7658_v33, %v12245_v45  ;;  %v7698_v9 = vrot.slane %v7681_v55, %v7441_v50  ;;  %v2001_v2 = vcombine.high %v7672_v38, %v12245_v45 }
 0x156   : > { %v7664_v19 = vpop.permute.xlu1 %678  ;;  %v7666_v41 = vpop.permute.xlu0 %674  ;;  %v7708_v18 = vrot.slane %v7676_v27, %v7463_v5 }
 0x157   : > { %12311 = vst [vmem:[#allocation47_spill] sm:$0xff] %v7664_v19  ;;  %12312 = vst [vmem:[#allocation48_spill] sm:$0xff] %v7666_v41  ;;  %v7694_v19 = vrot.slane %v7662_v63, %v7463_v5  ;;  %v7720_v33 = vrot.slane %v7698_v9, %v7463_v5 }
 0x158   : > { %2578 = vrot.lane.b32.xlu1 %v1903_v59, %s7023_s18  ;;  %2576 = vrot.lane.b32.xlu0 %v1805_v60, %s7023_s18  ;;  %12317 = vst [vmem:[#allocation53_spill] sm:$0xff] %v7708_v18  ;;  %v7712_v59 = vrot.slane %v7686_v54, %v7441_v50 }
 0x159   : > { %12314 = vst [vmem:[#allocation50_spill] sm:$0xff] %v7694_v19  ;;  %v2295_v60 = vcombine.high %v7694_v19, %v12245_v45  ;;  %12318 = vst [vmem:[#allocation54_spill] sm:$0xff] %v7720_v33 }
 0x15a   : > { %v7700_v58 = vpop.permute.xlu1 %689  ;;  %v7702_v41 = vpop.permute.xlu0 %685  ;;  %v7730_v14 = vrot.slane %v7712_v59, %v7463_v5 }
 0x15b   : > { %12315 = vst [vmem:[#allocation51_spill] sm:$0xff] %v7700_v58  ;;  %12316 = vst [vmem:[#allocation52_spill] sm:$0xff] %v7702_v41  ;;  %v2197_v41 = vcombine.high %v7708_v18, %v12245_v45  ;;  %v991_v18 = vcombine.high %v7467_v42, %v12245_v45  ;;  %v1187_v42 = vcombine.high %v7498_v37, %v12245_v45 }
 0x15c   : > { %2582 = vrot.lane.b32.xlu1 %v2099_v8, %s7023_s18  ;;  %2580 = vrot.lane.b32.xlu0 %v2001_v2, %s7023_s18  ;;  %12321 = vst [vmem:[#allocation57_spill] sm:$0xff] %v7730_v14  ;;  %v1089_v8 = vcombine.high %v7456_v16, %v12245_v45  ;;  %v2491_v2 = vcombine.high %v7720_v33, %v12245_v45 }
 0x15d   : > { %v1285_v16 = vcombine.high %v7486_v61, %v12245_v45  ;;  %v1481_v61 = vcombine.high %v7518_v25, %v12245_v45  ;;  %v1383_v37 = vcombine.high %v7532_v22, %v12245_v45 }
 0x15e   : > { %v7722_v38 = vpop.permute.xlu1 %700  ;;  %v7724_v58 = vpop.permute.xlu0 %696 }
 0x15f   : > { %12319 = vst [vmem:[#allocation55_spill] sm:$0xff] %v7722_v38  ;;  %12320 = vst [vmem:[#allocation56_spill] sm:$0xff] %v7724_v58  ;;  %v2393_v58 = vcombine.high %v7730_v14, %v12245_v45  ;;  %v1495_v14 = vrot.slane %v1481_v61, %v7463_v5  ;;  %v1397_v25 = vrot.slane %v1383_v37, %v7463_v5 }
 0x160   : > { %2586 = vrot.lane.b32.xlu1 %v2295_v60, %s7023_s18  ;;  %2584 = vrot.lane.b32.xlu0 %v2197_v41, %s7023_s18  ;;  %v7749_v41 = vrot.slane %v1089_v8, %v7463_v5  ;;  %v1873_v61 = vcombine.high %v7590_v51, %v12245_v45  ;;  %v1775_v37 = vcombine.high %v7604_v21, %v12245_v45 }
 0x162   : > { %v7738_v19 = vpop.permute.xlu1 %711  ;;  %v7740_v38 = vpop.permute.xlu0 %707  ;;  %v1789_v51 = vrot.slane %v1775_v37, %v7463_v5  ;;  %v2167_v37 = vcombine.high %v7676_v27, %v12245_v45 }
 0x163   : > { %12322 = vst [vmem:[#allocation58_spill] sm:$0xff] %v7738_v19  ;;  %12323 = vst [vmem:[#allocation59_spill] sm:$0xff] %v7740_v38  ;;  %v1005_v19 = vrot.slane %v991_v18, %v7463_v5  ;;  %v1201_v18 = vrot.slane %v1187_v42, %v7463_v5 }
 0x164   : > { %2590 = vrot.lane.b32.xlu1 %v2491_v2, %s7023_s18  ;;  %2588 = vrot.lane.b32.xlu0 %v2393_v58, %s7023_s18  ;;  %v1299_v58 = vrot.slane %v1285_v16, %v7463_v5  ;;  %v1677_v16 = vcombine.high %v7554_v44, %v12245_v45 }
 0x166   : > { %v7753_v60 = vpop.permute.xlu1 %722  ;;  %v7755_v33 = vpop.permute.xlu0 %718  ;;  %v1691_v22 = vrot.slane %v1677_v16, %v7463_v5  ;;  %v2069_v16 = vcombine.high %v7626_v34, %v12245_v45 }
 0x167   : > { %12324 = vst [vmem:[#allocation60_spill] sm:$0xff] %v7753_v60  ;;  %12325 = vst [vmem:[#allocation61_spill] sm:$0xff] %v7755_v33  ;;  %v1022_v33 = vcombine.high %v1005_v19, %v12245_v45 }
 0x168   : > { %2626 = vrot.lane.b32.xlu1 %v7749_v41, %s7024_s27  ;;  %2624 = vrot.lane.b32.xlu0 %v1005_v19, %s7024_s27  ;;  %v2083_v21 = vrot.slane %v2069_v16, %v7463_v5  ;;  %v2461_v16 = vcombine.high %v7698_v9, %v12245_v45  ;;  %v1512_v19 = vcombine.high %v1495_v14, %v12245_v45 }
 0x16a   : > { %v7766_v8 = vpop.permute.xlu1 %733  ;;  %v7768_v2 = vpop.permute.xlu0 %729  ;;  %v2475_v27 = vrot.slane %v2461_v16, %v7463_v5 }
 0x16b   : > { %12326 = vst [vmem:[#allocation62_spill] sm:$0xff] %v7766_v8  ;;  %12327 = vst [vmem:[#allocation63_spill] sm:$0xff] %v7768_v2  ;;  %v1579_v8 = vcombine.high %v7568_v30, %v12245_v45  ;;  %v1887_v30 = vrot.slane %v1873_v61, %v7463_v5  ;;  %v2265_v61 = vcombine.high %v7662_v63, %v12245_v45 }
 0x16c   : > { %2630 = vrot.lane.b32.xlu1 %v1299_v58, %s7024_s27  ;;  %2628 = vrot.lane.b32.xlu0 %v1201_v18, %s7024_s27  ;;  %v2181_v63 = vrot.slane %v2167_v37, %v7463_v5 }
 0x16d   : > { %v1593_v44 = vrot.slane %v1579_v8, %v7463_v5  ;;  %v1971_v8 = vcombine.high %v7640_v13, %v12245_v45  ;;  %v2279_v13 = vrot.slane %v2265_v61, %v7463_v5 }
 0x16e   : > { %v7778_v60 = vpop.permute.xlu1 %744  ;;  %v7783_v42 = vpop.permute.xlu0 %740 }
 0x16f   : > { %12328 = vst [vmem:[#allocation64_spill] sm:$0xff] %v7778_v60  ;;  %12329 = vst [vmem:[#allocation65_spill] sm:$0xff] %v7783_v42  ;;  %v1985_v34 = vrot.slane %v1971_v8, %v7463_v5  ;;  %v2363_v8 = vcombine.high %v7712_v59, %v12245_v45  ;;  %v1120_v59 = vcombine.high %v7749_v41, %v12245_v45 }
 0x170   : > { %2634 = vrot.lane.b32.xlu1 %v1495_v14, %s7024_s27  ;;  %2632 = vrot.lane.b32.xlu0 %v1397_v25, %s7024_s27 }
 0x171   : > { %v2377_v61 = vrot.slane %v2363_v8, %v7463_v5  ;;  %v1316_v8 = vcombine.high %v1299_v58, %v12245_v45 }
 0x172   : > { %v7790_v2 = vpop.permute.xlu1 %755  ;;  %v7795_v60 = vpop.permute.xlu0 %751 }
 0x173   : > { %12330 = vst [vmem:[#allocation66_spill] sm:$0xff] %v7790_v2  ;;  %12331 = vst [vmem:[#allocation67_spill] sm:$0xff] %v7795_v60 }
 0x174   : > { %2638 = vrot.lane.b32.xlu1 %v1691_v22, %s7024_s27  ;;  %2636 = vrot.lane.b32.xlu0 %v1593_v44, %s7024_s27 }
 0x176   : > { %v7802_v42 = vpop.permute.xlu1 %766  ;;  %v7807_v2 = vpop.permute.xlu0 %762 }
 0x177   : > { %12332 = vst [vmem:[#allocation68_spill] sm:$0xff] %v7802_v42  ;;  %12333 = vst [vmem:[#allocation69_spill] sm:$0xff] %v7807_v2 }
 0x178   : > { %2642 = vrot.lane.b32.xlu1 %v1887_v30, %s7024_s27  ;;  %2640 = vrot.lane.b32.xlu0 %v1789_v51, %s7024_s27 }
 0x17a   : > { %v7814_v60 = vpop.permute.xlu1 %777  ;;  %v7819_v42 = vpop.permute.xlu0 %773 }
 0x17b   : > { %12334 = vst [vmem:[#allocation70_spill] sm:$0xff] %v7814_v60 }
 0x17c   : > { %2646 = vrot.lane.b32.xlu1 %v2083_v21, %s7024_s27  ;;  %2644 = vrot.lane.b32.xlu0 %v1985_v34, %s7024_s27 }
 0x17e   : > { %v7826_v2 = vpop.permute.xlu1 %788  ;;  %v7831_v60 = vpop.permute.xlu0 %784 }
 0x17f   : > { %12335 = vst [vmem:[#allocation71_spill] sm:$0xff] %v7826_v2 }
 0x180   : > { %2650 = vrot.lane.b32.xlu1 %v2279_v13, %s7024_s27  ;;  %2648 = vrot.lane.b32.xlu0 %v2181_v63, %s7024_s27 }
 0x182   : > { %v7836_v38 = vpop.permute.xlu1 %799  ;;  %v7839_v9 = vpop.permute.xlu0 %795 }
 0x183   : > { %12336 = vst [vmem:[#allocation72_spill] sm:$0xff] %v7836_v38  ;;  %12337 = vst [vmem:[#allocation73_spill] sm:$0xff] %v7839_v9 }
 0x184   : > { %2654 = vrot.lane.b32.xlu1 %v2475_v27, %s7024_s27  ;;  %2652 = vrot.lane.b32.xlu0 %v2377_v61, %s7024_s27 }
 0x186   : > { %v7843_v37 = vpop.permute.xlu1 %810  ;;  %v7847_v2 = vpop.permute.xlu0 %806 }
 0x187   : > { %12338 = vst [vmem:[#allocation74_spill] sm:$0xff] %v7843_v37  ;;  %v1218_v37 = vcombine.high %v1201_v18, %v12245_v45  ;;  %v1708_v18 = vcombine.high %v1691_v22, %v12245_v45 }
 0x188   : > { %2690 = vrot.lane.b32.xlu1 %v1120_v59, %s7025_s29  ;;  %2688 = vrot.lane.b32.xlu0 %v1022_v33, %s7025_s29  ;;  %v1414_v33 = vcombine.high %v1397_v25, %v12245_v45  ;;  %v1904_v25 = vcombine.high %v1887_v30, %v12245_v45  ;;  %v1074_v30 = vcombine.high %v7446_v57, %v12245_v45 }
 0x189   : > { %v1270_v57 = vcombine.high %v7472_v32, %v12245_v45 }
 0x18a   : > { %v7852_v16 = vpop.permute.xlu1 %821  ;;  %v7855_v38 = vpop.permute.xlu0 %817 }
 0x18b   : > { %12339 = vst [vmem:[#allocation75_spill] sm:$0xff] %v7852_v16  ;;  %12340 = vst [vmem:[#allocation76_spill] sm:$0xff] %v7855_v38 }
 0x18c   : > { %2694 = vrot.lane.b32.xlu1 %v1316_v8, %s7025_s29  ;;  %2692 = vrot.lane.b32.xlu0 %v1218_v37, %s7025_s29  ;;  %v1610_v37 = vcombine.high %v1593_v44, %v12245_v45  ;;  %v2100_v44 = vcombine.high %v2083_v21, %v12245_v45  ;;  %v2198_v21 = vcombine.high %v2181_v63, %v12245_v45 }
 0x18d   : > { %v1172_v63 = vcombine.high %v7477_v6, %v12245_v45 }
 0x18e   : > { %v7860_v41 = vpop.permute.xlu1 %832  ;;  %v7863_v9 = vpop.permute.xlu0 %828 }
 0x18f   : > { %12341 = vst [vmem:[#allocation77_spill] sm:$0xff] %v7860_v41  ;;  %12342 = vst [vmem:[#allocation78_spill] sm:$0xff] %v7863_v9  ;;  %v1956_v41 = vcombine.high %v7614_v62, %v12245_v45 }
 0x190   : > { %2698 = vrot.lane.b32.xlu1 %v1512_v19, %s7025_s29  ;;  %2696 = vrot.lane.b32.xlu0 %v1414_v33, %s7025_s29  ;;  %v1806_v19 = vcombine.high %v1789_v51, %v12245_v45 }
 0x192   : > { %v7868_v58 = vpop.permute.xlu1 %843  ;;  %v7871_v59 = vpop.permute.xlu0 %839 }
 0x193   : > { %12343 = vst [vmem:[#allocation79_spill] sm:$0xff] %v7868_v58  ;;  %12344 = vst [vmem:[#allocation80_spill] sm:$0xff] %v7871_v59  ;;  %v1760_v58 = vcombine.high %v7578_v1, %v12245_v45 }
 0x194   : > { %2702 = vrot.lane.b32.xlu1 %v1708_v18, %s7025_s29  ;;  %2700 = vrot.lane.b32.xlu0 %v1610_v37, %s7025_s29  ;;  %v2002_v18 = vcombine.high %v1985_v34, %v12245_v45  ;;  %v2296_v37 = vcombine.high %v2279_v13, %v12245_v45  ;;  %v7905_v34 = vrot.slane %v1074_v30, %v7441_v50 }
 0x195   : > { %v2492_v13 = vcombine.high %v2475_v27, %v12245_v45  ;;  %v7927_v27 = vrot.slane %v1270_v57, %v7441_v50  ;;  %v1466_v30 = vcombine.high %v7503_v52, %v12245_v45  ;;  %v8014_v16 = vrot.slane %v1760_v58, %v7441_v50 }
 0x196   : > { %v7876_v14 = vpop.permute.xlu1 %854  ;;  %v7879_v8 = vpop.permute.xlu0 %850  ;;  %v7924_v32 = vrot.slane %v7905_v34, %v7463_v5  ;;  %v2250_v58 = vcombine.high %v7645_v47, %v12245_v45 }
 0x197   : > { %12345 = vst [vmem:[#allocation81_spill] sm:$0xff] %v7876_v14  ;;  %12346 = vst [vmem:[#allocation82_spill] sm:$0xff] %v7879_v8  ;;  %v7950_v52 = vrot.slane %v7927_v27, %v7463_v5  ;;  %v7953_v57 = vrot.slane %v1466_v30, %v7441_v50  ;;  %v1797_v62 = vrot.slane %v8014_v16, %v7463_v5 }
 0x198   : > { %2706 = vrot.lane.b32.xlu1 %v1904_v25, %s7025_s29  ;;  %2704 = vrot.lane.b32.xlu0 %v1806_v19, %s7025_s29  ;;  %v976_v25 = vcombine.high %v7451_v12, %v12245_v45 }
 0x19a   : > { %v7884_v22 = vpop.permute.xlu1 %865  ;;  %v7887_v33 = vpop.permute.xlu0 %861  ;;  %v7913_v12 = vrot.slane %v976_v25, %v7441_v50 }
 0x19b   : > { %12347 = vst [vmem:[#allocation83_spill] sm:$0xff] %v7884_v22  ;;  %12348 = vst [vmem:[#allocation84_spill] sm:$0xff] %v7887_v33 }
 0x19c   : > { %2710 = vrot.lane.b32.xlu1 %v2100_v44, %s7025_s29  ;;  %2708 = vrot.lane.b32.xlu0 %v2002_v18, %s7025_s29  ;;  %v7935_v6 = vrot.slane %v7913_v12, %v7463_v5 }
 0x19e   : > { %v7894_v51 = vpop.permute.xlu1 %876  ;;  %v7899_v19 = vpop.permute.xlu0 %872 }
 0x19f   : > { %12349 = vst [vmem:[#allocation85_spill] sm:$0xff] %v7894_v51  ;;  %12350 = vst [vmem:[#allocation86_spill] sm:$0xff] %v7899_v19 }
 0x1a0   : > { %2714 = vrot.lane.b32.xlu1 %v2296_v37, %s7025_s29  ;;  %2712 = vrot.lane.b32.xlu0 %v2198_v21, %s7025_s29  ;;  %v2394_v37 = vcombine.high %v2377_v61, %v12245_v45  ;;  %v7938_v61 = vrot.slane %v1172_v63, %v7441_v50  ;;  %v1368_v21 = vcombine.high %v7508_v15, %v12245_v45 }
 0x1a1   : > { %v1662_v63 = vcombine.high %v7537_v4, %v12245_v45  ;;  %v7976_v4 = vrot.slane %v7953_v57, %v7463_v5 }
 0x1a2   : > { %v7909_v44 = vpop.permute.xlu1 %887  ;;  %v7917_v18 = vpop.permute.xlu0 %883 }
 0x1a3   : > { %12351 = vst [vmem:[#allocation87_spill] sm:$0xff] %v7909_v44  ;;  %12352 = vst [vmem:[#allocation88_spill] sm:$0xff] %v7917_v18  ;;  %v7964_v44 = vrot.slane %v1368_v21, %v7441_v50  ;;  %v7979_v30 = vrot.slane %v1662_v63, %v7441_v50  ;;  %v1858_v21 = vcombine.high %v7573_v29, %v12245_v45 }
 0x1a4   : > { %2718 = vrot.lane.b32.xlu1 %v2492_v13, %s7025_s29  ;;  %2716 = vrot.lane.b32.xlu0 %v2394_v37, %s7025_s29  ;;  %v7961_v37 = vrot.slane %v7938_v61, %v7463_v5 }
 0x1a5   : > { %v8002_v29 = vrot.slane %v7979_v30, %v7463_v5  ;;  %v8005_v63 = vrot.slane %v1858_v21, %v7441_v50 }
 0x1a6   : > { %v7931_v25 = vpop.permute.xlu1 %898  ;;  %v7942_v13 = vpop.permute.xlu0 %894 }
 0x1a7   : > { %12353 = vst [vmem:[#allocation89_spill] sm:$0xff] %v7931_v25  ;;  %12354 = vst [vmem:[#allocation90_spill] sm:$0xff] %v7942_v13  ;;  %v1564_v25 = vcombine.high %v7542_v36, %v12245_v45  ;;  %v7987_v36 = vrot.slane %v7964_v44, %v7463_v5  ;;  %v2348_v13 = vcombine.high %v7686_v54, %v12245_v45 }
 0x1a8   : > { %2754 = vrot.lane.b32.xlu1 %v7924_v32, %s7026_s30  ;;  %2752 = vrot.lane.b32.xlu0 %v7935_v6, %s7026_s30 }
 0x1a9   : > { %v7990_v51 = vrot.slane %v1564_v25, %v7441_v50  ;;  %v2054_v25 = vcombine.high %v7609_v31, %v12245_v45  ;;  %v1895_v31 = vrot.slane %v8005_v63, %v7463_v5  ;;  %v8073_v19 = vrot.slane %v2348_v13, %v7441_v50 }
 0x1aa   : > { %v7957_v15 = vpop.permute.xlu1 %909  ;;  %v7968_v22 = vpop.permute.xlu0 %905 }
 0x1ab   : > { %12355 = vst [vmem:[#allocation91_spill] sm:$0xff] %v7957_v15  ;;  %12356 = vst [vmem:[#allocation92_spill] sm:$0xff] %v7968_v22  ;;  %v1601_v1 = vrot.slane %v7990_v51, %v7463_v5  ;;  %v8026_v21 = vrot.slane %v2054_v25, %v7441_v50  ;;  %v8046_v25 = vrot.slane %v2250_v58, %v7441_v50 }
 0x1ac   : > { %2758 = vrot.lane.b32.xlu1 %v7950_v52, %s7026_s30  ;;  %2756 = vrot.lane.b32.xlu0 %v7961_v37, %s7026_s30 }
 0x1ad   : > { %v2091_v47 = vrot.slane %v8026_v21, %v7463_v5 }
 0x1ae   : > { %v7983_v15 = vpop.permute.xlu1 %920  ;;  %v7994_v14 = vpop.permute.xlu0 %916 }
 0x1af   : > { %12357 = vst [vmem:[#allocation93_spill] sm:$0xff] %v7983_v15  ;;  %12358 = vst [vmem:[#allocation94_spill] sm:$0xff] %v7994_v14  ;;  %v2152_v14 = vcombine.high %v7650_v48, %v12245_v45 }
 0x1b0   : > { %2762 = vrot.lane.b32.xlu1 %v7976_v4, %s7026_s30  ;;  %2760 = vrot.lane.b32.xlu0 %v7987_v36, %s7026_s30 }
 0x1b2   : > { %v8009_v15 = vpop.permute.xlu1 %931  ;;  %v8018_v22 = vpop.permute.xlu0 %927 }
 0x1b3   : > { %12359 = vst [vmem:[#allocation95_spill] sm:$0xff] %v8009_v15  ;;  %12360 = vst [vmem:[#allocation96_spill] sm:$0xff] %v8018_v22  ;;  %v8035_v22 = vrot.slane %v1956_v41, %v7441_v50 }
 0x1b4   : > { %2766 = vrot.lane.b32.xlu1 %v8002_v29, %s7026_s30  ;;  %2764 = vrot.lane.b32.xlu0 %v1601_v1, %s7026_s30 }
 0x1b5   : > { %v1993_v48 = vrot.slane %v8035_v22, %v7463_v5 }
 0x1b6   : > { %v8030_v15 = vpop.permute.xlu1 %942  ;;  %v8039_v18 = vpop.permute.xlu0 %938 }
 0x1b7   : > { %12361 = vst [vmem:[#allocation97_spill] sm:$0xff] %v8030_v15  ;;  %12362 = vst [vmem:[#allocation98_spill] sm:$0xff] %v8039_v18  ;;  %v2446_v15 = vcombine.high %v7681_v55, %v12245_v45  ;;  %v8055_v18 = vrot.slane %v2152_v14, %v7441_v50  ;;  %v2287_v55 = vrot.slane %v8046_v25, %v7463_v5 }
 0x1b8   : > { %2770 = vrot.lane.b32.xlu1 %v1895_v31, %s7026_s30  ;;  %2768 = vrot.lane.b32.xlu0 %v1797_v62, %s7026_s30 }
 0x1b9   : > { %v8066_v58 = vrot.slane %v2446_v15, %v7441_v50  ;;  %v2189_v14 = vrot.slane %v8055_v18, %v7463_v5  ;;  %v2385_v15 = vrot.slane %v8073_v19, %v7463_v5 }
 0x1ba   : > { %v8050_v41 = vpop.permute.xlu1 %2562  ;;  %v8059_v33 = vpop.permute.xlu0 %2560 }
 0x1bb   : > { %12363 = vst [vmem:[#allocation99_spill] sm:$0xff] %v8050_v41  ;;  %12364 = vst [vmem:[#allocation100_spill] sm:$0xff] %v8059_v33  ;;  %v2483_v45 = vrot.slane %v8066_v58, %v7463_v5 }
 0x1bc   : > { %2774 = vrot.lane.b32.xlu1 %v2091_v47, %s7026_s30  ;;  %2772 = vrot.lane.b32.xlu0 %v1993_v48, %s7026_s30 }
 0x1be   : > { %v8068_v41 = vpop.permute.xlu1 %2566  ;;  %v8075_v54 = vpop.permute.xlu0 %2564 }
 0x1bf   : > { %12365 = vst [vmem:[#allocation101_spill] sm:$0xff] %v8068_v41  ;;  %12366 = vst [vmem:[#allocation102_spill] sm:$0xff] %v8075_v54  ;;  %v12370_v54 = vmov 0.0  }
 0x1c0   : > { %2778 = vrot.lane.b32.xlu1 %v2287_v55, %s7026_s30  ;;  %2776 = vrot.lane.b32.xlu0 %v2189_v14, %s7026_s30  ;;  %v1121_v59 = vcombine.high %v7924_v32, %v12370_v54  ;;  %v1023_v38 = vcombine.high %v7935_v6, %v12370_v54  ;;  %v1219_v32 = vcombine.high %v7961_v37, %v12370_v54 }
 0x1c2   : > { %v8081_v33 = vpop.permute.xlu1 %2570  ;;  %v8085_v41 = vpop.permute.xlu0 %2568 }
 0x1c3   : > { %12367 = vst [vmem:[#allocation103_spill] sm:$0xff] %v8081_v33  ;;  %12368 = vst [vmem:[#allocation104_spill] sm:$0xff] %v8085_v41  ;;  %v1317_v33 = vcombine.high %v7950_v52, %v12370_v54 }
 0x1c4   : > { %2782 = vrot.lane.b32.xlu1 %v2483_v45, %s7026_s30  ;;  %2780 = vrot.lane.b32.xlu0 %v2385_v15, %s7026_s30 }
 0x1c6   : > { %v8089_v13 = vpop.permute.xlu1 %2574  ;;  %v8093_v8 = vpop.permute.xlu0 %2572 }
 0x1c7   : > { %12369 = vst [vmem:[#allocation105_spill] sm:$0xff] %v8089_v13  ;;  %12371 = vst [vmem:[#allocation106_spill] sm:$0xff] %v8093_v8 }
 0x1c8   : > { %2818 = vrot.lane.b32.xlu1 %v1121_v59, %s7027_s2  ;;  %2816 = vrot.lane.b32.xlu0 %v1023_v38, %s7027_s2  ;;  %v1513_v59 = vcombine.high %v7976_v4, %v12370_v54 }
 0x1ca   : > { %v8099_v41 = vpop.permute.xlu1 %2578  ;;  %v8103_v9 = vpop.permute.xlu0 %2576 }
 0x1cb   : > { %12372 = vst [vmem:[#allocation107_spill] sm:$0xff] %v8099_v41  ;;  %12373 = vst [vmem:[#allocation108_spill] sm:$0xff] %v8103_v9  ;;  %v1415_v41 = vcombine.high %v7987_v36, %v12370_v54  ;;  %v1905_v36 = vcombine.high %v1895_v31, %v12370_v54 }
 0x1cc   : > { %2822 = vrot.lane.b32.xlu1 %v1317_v33, %s7027_s2  ;;  %2820 = vrot.lane.b32.xlu0 %v1219_v32, %s7027_s2  ;;  %v1709_v33 = vcombine.high %v8002_v29, %v12370_v54  ;;  %v1611_v32 = vcombine.high %v1601_v1, %v12370_v54  ;;  %v2101_v1 = vcombine.high %v2091_v47, %v12370_v54 }
 0x1cd   : > { %v1104_v47 = vcombine.high %v7905_v34, %v12370_v54 }
 0x1ce   : > { %v8109_v6 = vpop.permute.xlu1 %2582  ;;  %v8113_v38 = vpop.permute.xlu0 %2580 }
 0x1cf   : > { %12374 = vst [vmem:[#allocation109_spill] sm:$0xff] %v8109_v6  ;;  %12375 = vst [vmem:[#allocation110_spill] sm:$0xff] %v8113_v38  ;;  %v1118_v34 = vrot.slane %v1104_v47, %v7463_v5  ;;  %v1398_v47 = vcombine.high %v7964_v44, %v12370_v54 }
 0x1d0   : > { %2826 = vrot.lane.b32.xlu1 %v1513_v59, %s7027_s2  ;;  %2824 = vrot.lane.b32.xlu0 %v1415_v41, %s7027_s2  ;;  %v1807_v41 = vcombine.high %v1797_v62, %v12370_v54  ;;  %v2297_v62 = vcombine.high %v2287_v55, %v12370_v54  ;;  %v2395_v55 = vcombine.high %v2385_v15, %v12370_v54 }
 0x1d1   : > { %v1496_v15 = vcombine.high %v7953_v57, %v12370_v54  ;;  %v1412_v44 = vrot.slane %v1398_v47, %v7463_v5  ;;  %v2084_v47 = vcombine.high %v8026_v21, %v12370_v54 }
 0x1d2   : > { %v8119_v52 = vpop.permute.xlu1 %2586  ;;  %v8123_v37 = vpop.permute.xlu0 %2584 }
 0x1d3   : > { %12376 = vst [vmem:[#allocation111_spill] sm:$0xff] %v8119_v52  ;;  %12377 = vst [vmem:[#allocation112_spill] sm:$0xff] %v8123_v37  ;;  %v1510_v57 = vrot.slane %v1496_v15, %v7463_v5  ;;  %v1790_v15 = vcombine.high %v8014_v16, %v12370_v54  ;;  %v2098_v21 = vrot.slane %v2084_v47, %v7463_v5 }
 0x1d4   : > { %2830 = vrot.lane.b32.xlu1 %v1709_v33, %s7027_s2  ;;  %2828 = vrot.lane.b32.xlu0 %v1611_v32, %s7027_s2  ;;  %v2003_v33 = vcombine.high %v1993_v48, %v12370_v54  ;;  %v2378_v47 = vcombine.high %v8073_v19, %v12370_v54 }
 0x1d5   : > { %v1804_v16 = vrot.slane %v1790_v15, %v7463_v5  ;;  %v2476_v15 = vcombine.high %v8066_v58, %v12370_v54 }
 0x1d6   : > { %v8128_v4 = vpop.permute.xlu1 %2590  ;;  %v8131_v59 = vpop.permute.xlu0 %2588 }
 0x1d7   : > { %12378 = vst [vmem:[#allocation113_spill] sm:$0xff] %v8128_v4  ;;  %12379 = vst [vmem:[#allocation114_spill] sm:$0xff] %v8131_v59 }
 0x1d8   : > { %2834 = vrot.lane.b32.xlu1 %v1905_v36, %s7027_s2  ;;  %2832 = vrot.lane.b32.xlu0 %v1807_v41, %s7027_s2  ;;  %v2199_v36 = vcombine.high %v2189_v14, %v12370_v54  ;;  %v2493_v41 = vcombine.high %v2483_v45, %v12370_v54  ;;  %v1300_v14 = vcombine.high %v7927_v27, %v12370_v54 }
 0x1d9   : > { %v1202_v45 = vcombine.high %v7938_v61, %v12370_v54 }
 0x1da   : > { %v8136_v29 = vpop.permute.xlu1 %2626  ;;  %v8139_v37 = vpop.permute.xlu0 %2624 }
 0x1db   : > { %12380 = vst [vmem:[#allocation115_spill] sm:$0xff] %v8136_v29  ;;  %12381 = vst [vmem:[#allocation116_spill] sm:$0xff] %v8139_v37  ;;  %v12444_v37 = vld [vmem:[#allocation23_spill] sm:$0xff] }
 0x1dc   : > { %2838 = vrot.lane.b32.xlu1 %v2101_v1, %s7027_s2  ;;  %2836 = vrot.lane.b32.xlu0 %v2003_v33, %s7027_s2  ;;  %v1006_v1 = vcombine.high %v7913_v12, %v12370_v54  ;;  %v12445_v29 = vld [vmem:[#allocation15_spill] sm:$0xff] }
 0x1dd   : > { %v8533_v59 = vsel %vm559_vm0, %v12445_v29, %v12444_v37 }
 0x1de   : > { %v8144_v31 = vpop.permute.xlu1 %2630  ;;  %v8147_v32 = vpop.permute.xlu0 %2628  ;;  %v1020_v12 = vrot.slane %v1006_v1, %v7463_v5  ;;  %v1692_v1 = vcombine.high %v7979_v30, %v12370_v54  ;;  %v8549_v37 = vrot.slane %v8533_v59, %v7441_v50 }
 0x1df   : > { %12382 = vst [vmem:[#allocation117_spill] sm:$0xff] %v8144_v31  ;;  %12383 = vst [vmem:[#allocation118_spill] sm:$0xff] %v8147_v32 }
 0x1e0   : > { %2842 = vrot.lane.b32.xlu1 %v2297_v62, %s7027_s2  ;;  %2840 = vrot.lane.b32.xlu0 %v2199_v36, %s7027_s2  ;;  %v1706_v30 = vrot.slane %v1692_v1, %v7463_v5  ;;  %v1986_v1 = vcombine.high %v8035_v22, %v12370_v54 }
 0x1e2   : > { %v8154_v48 = vpop.permute.xlu1 %2634  ;;  %v8159_v33 = vpop.permute.xlu0 %2632  ;;  %v2000_v22 = vrot.slane %v1986_v1, %v7463_v5 }
 0x1e3   : > { %12384 = vst [vmem:[#allocation119_spill] sm:$0xff] %v8154_v48  ;;  %12385 = vst [vmem:[#allocation120_spill] sm:$0xff] %v8159_v33  ;;  %v12440_v33 = vld [vmem:[#allocation13_spill] sm:$0xff] }
 0x1e4   : > { %2846 = vrot.lane.b32.xlu1 %v2493_v41, %s7027_s2  ;;  %2844 = vrot.lane.b32.xlu0 %v2395_v55, %s7027_s2  ;;  %v1314_v41 = vrot.slane %v1300_v14, %v7463_v5  ;;  %v1216_v55 = vrot.slane %v1202_v45, %v7463_v5  ;;  %v1594_v14 = vcombine.high %v7990_v51, %v12370_v54 }
 0x1e5   : > { %v1888_v45 = vcombine.high %v8005_v63, %v12370_v54 }
 0x1e6   : > { %v8166_v62 = vpop.permute.xlu1 %2638  ;;  %v8171_v36 = vpop.permute.xlu0 %2636  ;;  %v1608_v51 = vrot.slane %v1594_v14, %v7463_v5  ;;  %v2280_v14 = vcombine.high %v8046_v25, %v12370_v54 }
 0x1e7   : > { %12386 = vst [vmem:[#allocation121_spill] sm:$0xff] %v8166_v62  ;;  %12387 = vst [vmem:[#allocation122_spill] sm:$0xff] %v8171_v36  ;;  %v1902_v63 = vrot.slane %v1888_v45, %v7463_v5  ;;  %v2182_v45 = vcombine.high %v8055_v18, %v12370_v54  ;;  %v12439_v62 = vld [vmem:[#allocation21_spill] sm:$0xff] }
 0x1e8   : > { %2882 = vrot.lane.b32.xlu1 %v1118_v34, %s7028_s5  ;;  %2880 = vrot.lane.b32.xlu0 %v1020_v12, %s7028_s5  ;;  %v2294_v25 = vrot.slane %v2280_v14, %v7463_v5  ;;  %v1122_v14 = vcombine.high %v1118_v34, %v12370_v54  ;;  %v8505_v48 = vsel %vm559_vm0, %v12440_v33, %v12439_v62  ;;  %v12442_v62 = vld [vmem:[#allocation16_spill] sm:$0xff] }
 0x1e9   : > { %v2196_v18 = vrot.slane %v2182_v45, %v7463_v5  ;;  %v8521_v33 = vrot.slane %v8505_v48, %v7441_v50 }
 0x1ea   : > { %v8178_v27 = vpop.permute.xlu1 %2642  ;;  %v8183_v61 = vpop.permute.xlu0 %2640 }
 0x1eb   : > { %12388 = vst [vmem:[#allocation123_spill] sm:$0xff] %v8178_v27  ;;  %12389 = vst [vmem:[#allocation124_spill] sm:$0xff] %v8183_v61 }
 0x1ec   : > { %2886 = vrot.lane.b32.xlu1 %v1314_v41, %s7028_s5  ;;  %2884 = vrot.lane.b32.xlu0 %v1216_v55, %s7028_s5 }
 0x1ee   : > { %v8190_v36 = vpop.permute.xlu1 %2646  ;;  %v8195_v27 = vpop.permute.xlu0 %2644 }
 0x1ef   : > { %12390 = vst [vmem:[#allocation125_spill] sm:$0xff] %v8190_v36  ;;  %12391 = vst [vmem:[#allocation126_spill] sm:$0xff] %v8195_v27 }
 0x1f0   : > { %2890 = vrot.lane.b32.xlu1 %v1510_v57, %s7028_s5  ;;  %2888 = vrot.lane.b32.xlu0 %v1412_v44, %s7028_s5 }
 0x1f2   : > { %v8202_v61 = vpop.permute.xlu1 %2650  ;;  %v8207_v36 = vpop.permute.xlu0 %2648 }
 0x1f3   : > { %12392 = vst [vmem:[#allocation127_spill] sm:$0xff] %v8202_v61  ;;  %12393 = vst [vmem:[#allocation128_spill] sm:$0xff] %v8207_v36 }
 0x1f4   : > { %2894 = vrot.lane.b32.xlu1 %v1706_v30, %s7028_s5  ;;  %2892 = vrot.lane.b32.xlu0 %v1608_v51, %s7028_s5 }
 0x1f6   : > { %v8214_v27 = vpop.permute.xlu1 %2654  ;;  %v8219_v61 = vpop.permute.xlu0 %2652 }
 0x1f7   : > { %12394 = vst [vmem:[#allocation129_spill] sm:$0xff] %v8214_v27  ;;  %12395 = vst [vmem:[#allocation130_spill] sm:$0xff] %v8219_v61 }
 0x1f8   : > { %2898 = vrot.lane.b32.xlu1 %v1902_v63, %s7028_s5  ;;  %2896 = vrot.lane.b32.xlu0 %v1804_v16, %s7028_s5 }
 0x1fa   : > { %v8226_v36 = vpop.permute.xlu1 %2690  ;;  %v8231_v27 = vpop.permute.xlu0 %2688 }
 0x1fb   : > { %12396 = vst [vmem:[#allocation131_spill] sm:$0xff] %v8226_v36  ;;  %12397 = vst [vmem:[#allocation132_spill] sm:$0xff] %v8231_v27  ;;  %v2490_v27 = vrot.slane %v2476_v15, %v7463_v5 }
 0x1fc   : > { %2902 = vrot.lane.b32.xlu1 %v2098_v21, %s7028_s5  ;;  %2900 = vrot.lane.b32.xlu0 %v2000_v22, %s7028_s5 }
 0x1fe   : > { %v8238_v61 = vpop.permute.xlu1 %2694  ;;  %v8243_v36 = vpop.permute.xlu0 %2692 }
 0x1ff   : > { %12398 = vst [vmem:[#allocation133_spill] sm:$0xff] %v8238_v61  ;;  %12399 = vst [vmem:[#allocation134_spill] sm:$0xff] %v8243_v36  ;;  %v2392_v61 = vrot.slane %v2378_v47, %v7463_v5  ;;  %v1024_v36 = vcombine.high %v1020_v12, %v12370_v54  ;;  %v1318_v47 = vcombine.high %v1314_v41, %v12370_v54 }
 0x200   : > { %2906 = vrot.lane.b32.xlu1 %v2294_v25, %s7028_s5  ;;  %2904 = vrot.lane.b32.xlu0 %v2196_v18, %s7028_s5  ;;  %v1514_v12 = vcombine.high %v1510_v57, %v12370_v54 }
 0x202   : > { %v8248_v1 = vpop.permute.xlu1 %2698  ;;  %v8251_v58 = vpop.permute.xlu0 %2696 }
 0x203   : > { %12400 = vst [vmem:[#allocation135_spill] sm:$0xff] %v8248_v1  ;;  %12401 = vst [vmem:[#allocation136_spill] sm:$0xff] %v8251_v58  ;;  %v1220_v1 = vcombine.high %v1216_v55, %v12370_v54  ;;  %v1710_v55 = vcombine.high %v1706_v30, %v12370_v54 }
 0x204   : > { %2910 = vrot.lane.b32.xlu1 %v2490_v27, %s7028_s5  ;;  %2908 = vrot.lane.b32.xlu0 %v2392_v61, %s7028_s5 }
 0x206   : > { %v8256_v19 = vpop.permute.xlu1 %2702  ;;  %v8259_v45 = vpop.permute.xlu0 %2700 }
 0x207   : > { %12402 = vst [vmem:[#allocation137_spill] sm:$0xff] %v8256_v19  ;;  %12403 = vst [vmem:[#allocation138_spill] sm:$0xff] %v8259_v45 }
 0x208   : > { %2946 = vrot.lane.b32.xlu1 %v1122_v14, %s7029_s12  ;;  %2944 = vrot.lane.b32.xlu0 %v1024_v36, %s7029_s12  ;;  %v1416_v36 = vcombine.high %v1412_v44, %v12370_v54  ;;  %v1906_v44 = vcombine.high %v1902_v63, %v12370_v54 }
 0x20a   : > { %v8264_v15 = vpop.permute.xlu1 %2706  ;;  %v8267_v58 = vpop.permute.xlu0 %2704 }
 0x20b   : > { %12404 = vst [vmem:[#allocation139_spill] sm:$0xff] %v8264_v15  ;;  %12405 = vst [vmem:[#allocation140_spill] sm:$0xff] %v8267_v58 }
 0x20c   : > { %2950 = vrot.lane.b32.xlu1 %v1318_v47, %s7029_s12  ;;  %2948 = vrot.lane.b32.xlu0 %v1220_v1, %s7029_s12  ;;  %v1612_v1 = vcombine.high %v1608_v51, %v12370_v54  ;;  %v2102_v51 = vcombine.high %v2098_v21, %v12370_v54  ;;  %v2200_v21 = vcombine.high %v2196_v18, %v12370_v54 }
 0x20d   : > { %v2396_v18 = vcombine.high %v2392_v61, %v12370_v54 }
 0x20e   : > { %v8272_v34 = vpop.permute.xlu1 %2710  ;;  %v8275_v45 = vpop.permute.xlu0 %2708 }
 0x20f   : > { %12406 = vst [vmem:[#allocation141_spill] sm:$0xff] %v8272_v34  ;;  %12407 = vst [vmem:[#allocation142_spill] sm:$0xff] %v8275_v45  ;;  %v12434_v45 = vld [vmem:[#allocation11_spill] sm:$0xff] }
 0x210   : > { %2954 = vrot.lane.b32.xlu1 %v1514_v12, %s7029_s12  ;;  %2952 = vrot.lane.b32.xlu0 %v1416_v36, %s7029_s12  ;;  %v1808_v12 = vcombine.high %v1804_v16, %v12370_v54  ;;  %v2298_v16 = vcombine.high %v2294_v25, %v12370_v54 }
 0x212   : > { %v8280_v41 = vpop.permute.xlu1 %2714  ;;  %v8283_v14 = vpop.permute.xlu0 %2712 }
 0x213   : > { %12408 = vst [vmem:[#allocation143_spill] sm:$0xff] %v8280_v41  ;;  %12409 = vst [vmem:[#allocation144_spill] sm:$0xff] %v8283_v14  ;;  %v12433_v41 = vld [vmem:[#allocation19_spill] sm:$0xff] }
 0x214   : > { %2958 = vrot.lane.b32.xlu1 %v1710_v55, %s7029_s12  ;;  %2956 = vrot.lane.b32.xlu0 %v1612_v1, %s7029_s12  ;;  %v2004_v55 = vcombine.high %v2000_v22, %v12370_v54  ;;  %v8310_v1 = vsel %vm559_vm0, %v7271_v10, %v7357_v39  ;;  %v8318_v22 = vsel %vm559_vm0, %v7273_v11, %v7350_v17 }
 0x215   : > { %v8324_v25 = vrot.slane %v8310_v1, %v7441_v50  ;;  %v2494_v10 = vcombine.high %v2490_v27, %v12370_v54  ;;  %v8331_v39 = vrot.slane %v8318_v22, %v7441_v50  ;;  %v8336_v11 = vsel %vm559_vm0, %v7282_v24, %v7368_v7 }
 0x216   : > { %v8288_v57 = vpop.permute.xlu1 %2718  ;;  %v8291_v47 = vpop.permute.xlu0 %2716  ;;  %v8354_v24 = vrot.slane %v8336_v11, %v7441_v50  ;;  %v8476_v34 = vsel %vm559_vm0, %v12434_v45, %v12433_v41  ;;  %v12436_v41 = vld [vmem:[#allocation22_spill] sm:$0xff] }
 0x217   : > { %12410 = vst [vmem:[#allocation145_spill] sm:$0xff] %v8288_v57  ;;  %12411 = vst [vmem:[#allocation146_spill] sm:$0xff] %v8291_v47  ;;  %v8350_v27 = vrot.slane %v8324_v25, %v7463_v5  ;;  %v8360_v61 = vrot.slane %v8331_v39, %v7463_v5  ;;  %v12431_v47 = vld [vmem:[#allocation12_spill] sm:$0xff]  ;;  %v8493_v45 = vrot.slane %v8476_v34, %v7441_v50 }
 0x218   : > { %2962 = vrot.lane.b32.xlu1 %v1906_v44, %s7029_s12  ;;  %2960 = vrot.lane.b32.xlu0 %v1808_v12, %s7029_s12 }
 0x219   : > { %v1070_v9 = vcombine.high %v8360_v61, %v12370_v54 }
 0x21a   : > { %v8296_v30 = vpop.permute.xlu1 %2754  ;;  %v8299_v36 = vpop.permute.xlu0 %2752 }
 0x21b   : > { %12412 = vst [vmem:[#allocation147_spill] sm:$0xff] %v8296_v30  ;;  %12413 = vst [vmem:[#allocation148_spill] sm:$0xff] %v8299_v36  ;;  %v12428_v36 = vld [vmem:[#allocation9_spill] sm:$0xff] }
 0x21c   : > { %2966 = vrot.lane.b32.xlu1 %v2102_v51, %s7029_s12  ;;  %2964 = vrot.lane.b32.xlu0 %v2004_v55, %s7029_s12  ;;  %v8344_v51 = vsel %vm559_vm0, %v7277_v20, %v7363_v49  ;;  %v8369_v49 = vsel %vm559_vm0, %v7292_v35, %v7378_v0 }
 0x21d   : > { %v8364_v20 = vrot.slane %v8344_v51, %v7441_v50  ;;  %v8388_v35 = vrot.slane %v8369_v49, %v7441_v50 }
 0x21e   : > { %v8304_v63 = vpop.permute.xlu1 %2758  ;;  %v8312_v44 = vpop.permute.xlu0 %2756 }
 0x21f   : > { %12414 = vst [vmem:[#allocation149_spill] sm:$0xff] %v8304_v63  ;;  %12415 = vst [vmem:[#allocation150_spill] sm:$0xff] %v8312_v44  ;;  %v12427_v63 = vld [vmem:[#allocation17_spill] sm:$0xff] }
 0x220   : > { %2970 = vrot.lane.b32.xlu1 %v2298_v16, %s7029_s12  ;;  %2968 = vrot.lane.b32.xlu0 %v2200_v21, %s7029_s12  ;;  %v8376_v16 = vsel %vm559_vm0, %v7287_v28, %v7373_v53  ;;  %v8384_v21 = vrot.slane %v8354_v24, %v7463_v5  ;;  %v8394_v28 = vrot.slane %v8364_v20, %v7463_v5 }
 0x221   : > { %v8398_v53 = vrot.slane %v8376_v16, %v7441_v50  ;;  %v8444_v30 = vsel %vm559_vm0, %v12428_v36, %v12427_v63 }
 0x222   : > { %v8326_v12 = vpop.permute.xlu1 %2762  ;;  %v8338_v17 = vpop.permute.xlu0 %2760  ;;  %v8464_v63 = vrot.slane %v8444_v30, %v7441_v50 }
 0x223   : > { %12416 = vst [vmem:[#allocation151_spill] sm:$0xff] %v8326_v12  ;;  %12417 = vst [vmem:[#allocation152_spill] sm:$0xff] %v8338_v17  ;;  %v12425_v17 = vld [vmem:[#allocation10_spill] sm:$0xff] }
 0x224   : > { %2974 = vrot.lane.b32.xlu1 %v2494_v10, %s7029_s12  ;;  %2972 = vrot.lane.b32.xlu0 %v2396_v18, %s7029_s12  ;;  %v8403_v10 = vsel %vm559_vm0, %v7302_v43, %v7388_v56 }
 0x225   : > { %v8422_v43 = vrot.slane %v8403_v10, %v7441_v50 }
 0x226   : > { %v8356_v7 = vpop.permute.xlu1 %2766  ;;  %v8371_v55 = vpop.permute.xlu0 %2764 }
 0x227   : > { %12418 = vst [vmem:[#allocation153_spill] sm:$0xff] %v8356_v7  ;;  %12419 = vst [vmem:[#allocation154_spill] sm:$0xff] %v8371_v55  ;;  %v12422_v55 = vld [vmem:[#allocation8_spill] sm:$0xff] }
 0x228   : > { %3010 = vrot.lane.b32.xlu1 %v8350_v27, %s7030_s13  ;;  %3008 = vrot.lane.b32.xlu0 %v8360_v61, %s7030_s13  ;;  %v8410_v7 = vsel %vm559_vm0, %v12422_v55, %v7383_v26  ;;  %v8428_v26 = vrot.slane %v8398_v53, %v7463_v5 }
 0x229   : > { %v8432_v55 = vrot.slane %v8410_v7, %v7441_v50 }
 0x22a   : > { %v8390_v0 = vpop.permute.xlu1 %2770  ;;  %v8405_v18 = vpop.permute.xlu0 %2768 }
 0x22b   : > { %12420 = vst [vmem:[#allocation155_spill] sm:$0xff] %v8390_v0  ;;  %12421 = vst [vmem:[#allocation156_spill] sm:$0xff] %v8405_v18  ;;  %v8418_v0 = vrot.slane %v8388_v35, %v7463_v5  ;;  %v12424_v18 = vld [vmem:[#allocation18_spill] sm:$0xff]  ;;  %v1635_v36 = vrot.slane %v8432_v55, %v7463_v5 }
 0x22c   : > { %3014 = vrot.lane.b32.xlu1 %v8384_v21, %s7030_s13  ;;  %3012 = vrot.lane.b32.xlu0 %v8394_v28, %s7030_s13  ;;  %v8437_v12 = vsel %vm559_vm0, %v12425_v17, %v12424_v18 }
 0x22d   : > { %v8456_v17 = vrot.slane %v8437_v12, %v7441_v50  ;;  %v1560_v61 = vcombine.high %v8418_v0, %v12370_v54 }
 0x22e   : > { %v8424_v56 = vpop.permute.xlu1 %2774  ;;  %v8439_v44 = vpop.permute.xlu0 %2772 }
 0x22f   : > { %12423 = vst [vmem:[#allocation8_spill] sm:$0xff] %v8424_v56  ;;  %12426 = vst [vmem:[#allocation18_spill] sm:$0xff] %v8439_v44  ;;  %v8452_v56 = vrot.slane %v8422_v43, %v7463_v5  ;;  %v12430_v44 = vld [vmem:[#allocation20_spill] sm:$0xff] }
 0x230   : > { %3018 = vrot.lane.b32.xlu1 %v8418_v0, %s7030_s13  ;;  %3016 = vrot.lane.b32.xlu0 %v8428_v26, %s7030_s13  ;;  %v8469_v57 = vsel %vm559_vm0, %v12431_v47, %v12430_v44  ;;  %v1831_v44 = vrot.slane %v8464_v63, %v7463_v5 }
 0x231   : > { %v8485_v58 = vrot.slane %v8469_v57, %v7441_v50 }
 0x232   : > { %v8458_v18 = vpop.permute.xlu1 %2778  ;;  %v8471_v14 = vpop.permute.xlu0 %2776 }
 0x233   : > { %12429 = vst [vmem:[#allocation10_spill] sm:$0xff] %v8458_v18  ;;  %12432 = vst [vmem:[#allocation17_spill] sm:$0xff] %v8471_v14  ;;  %v1929_v18 = vrot.slane %v8456_v17, %v7463_v5  ;;  %v12437_v14 = vld [vmem:[#allocation14_spill] sm:$0xff] }
 0x234   : > { %3022 = vrot.lane.b32.xlu1 %v8452_v56, %s7030_s13  ;;  %3020 = vrot.lane.b32.xlu0 %v1635_v36, %s7030_s13  ;;  %v8498_v15 = vsel %vm559_vm0, %v12437_v14, %v12436_v41  ;;  %v2027_v41 = vrot.slane %v8493_v45, %v7463_v5 }
 0x235   : > { %v8513_v32 = vrot.slane %v8498_v15, %v7441_v50  ;;  %v1952_v0 = vcombine.high %v1929_v18, %v12370_v54 }
 0x236   : > { %v8487_v47 = vpop.permute.xlu1 %2782  ;;  %v8500_v19 = vpop.permute.xlu0 %2780 }
 0x237   : > { %12435 = vst [vmem:[#allocation9_spill] sm:$0xff] %v8487_v47  ;;  %12438 = vst [vmem:[#allocation20_spill] sm:$0xff] %v8500_v19  ;;  %v2125_v47 = vrot.slane %v8485_v58, %v7463_v5  ;;  %v8526_v19 = vsel %vm559_vm0, %v12442_v62, %v7431_v23  ;;  %v2223_v62 = vrot.slane %v8521_v33, %v7463_v5 }
 0x238   : > { %3026 = vrot.lane.b32.xlu1 %v1929_v18, %s7030_s13  ;;  %3024 = vrot.lane.b32.xlu0 %v1831_v44, %s7030_s13  ;;  %v8541_v4 = vrot.slane %v8526_v19, %v7441_v50 }
 0x23a   : > { %v8515_v14 = vpop.permute.xlu1 %2818  ;;  %v8528_v31 = vpop.permute.xlu0 %2816 }
 0x23b   : > { %12441 = vst [vmem:[#allocation12_spill] sm:$0xff] %v8515_v14  ;;  %12443 = vst [vmem:[#allocation19_spill] sm:$0xff] %v8528_v31  ;;  %v2321_v14 = vrot.slane %v8513_v32, %v7463_v5  ;;  %v2517_v31 = vrot.slane %v8541_v4, %v7463_v5 }
 0x23c   : > { %3030 = vrot.lane.b32.xlu1 %v2125_v47, %s7030_s13  ;;  %3028 = vrot.lane.b32.xlu0 %v2027_v41, %s7030_s13 }
 0x23d   : > { %v2344_v18 = vcombine.high %v2321_v14, %v12370_v54 }
 0x23e   : > { %v8543_v23 = vpop.permute.xlu1 %2822  ;;  %v8551_v29 = vpop.permute.xlu0 %2820 }
 0x23f   : > { %12446 = vst [vmem:[#allocation11_spill] sm:$0xff] %v8543_v23  ;;  %12447 = vst [vmem:[#allocation22_spill] sm:$0xff] %v8551_v29  ;;  %v2419_v23 = vrot.slane %v8549_v37, %v7463_v5  ;;  %v1168_v29 = vcombine.high %v8350_v27, %v12370_v54  ;;  %v1266_v27 = vcombine.high %v8394_v28, %v12370_v54 }
 0x240   : > { %3034 = vrot.lane.b32.xlu1 %v2321_v14, %s7030_s13  ;;  %3032 = vrot.lane.b32.xlu0 %v2223_v62, %s7030_s13  ;;  %v1756_v28 = vcombine.high %v8452_v56, %v12370_v54  ;;  %v2148_v56 = vcombine.high %v2125_v47, %v12370_v54  ;;  %v1138_v47 = vcombine.high %v8324_v25, %v12370_v54 }
 0x241   : > { %v1040_v14 = vcombine.high %v8331_v39, %v12370_v54  ;;  %v1334_v25 = vcombine.high %v8354_v24, %v12370_v54  ;;  %v1236_v39 = vcombine.high %v8364_v20, %v12370_v54  ;;  %v1530_v24 = vcombine.high %v8388_v35, %v12370_v54 }
 0x242   : > { %v8557_v52 = vpop.permute.xlu1 %2826  ;;  %v8561_v38 = vpop.permute.xlu0 %2824  ;;  %v1432_v20 = vcombine.high %v8398_v53, %v12370_v54 }
 0x243   : > { %12448 = vst [vmem:[#allocation14_spill] sm:$0xff] %v8557_v52  ;;  %12449 = vst [vmem:[#allocation21_spill] sm:$0xff] %v8561_v38  ;;  %v1364_v38 = vcombine.high %v8384_v21, %v12370_v54 }
 0x244   : > { %3038 = vrot.lane.b32.xlu1 %v2517_v31, %s7030_s13  ;;  %3036 = vrot.lane.b32.xlu0 %v2419_v23, %s7030_s13  ;;  %v1446_v35 = vrot.slane %v1432_v20, %v7463_v5  ;;  %v1824_v20 = vcombine.high %v8464_v63, %v12370_v54 }
 0x246   : > { %v8567_v6 = vpop.permute.xlu1 %2830  ;;  %v8571_v8 = vpop.permute.xlu0 %2828 }
 0x247   : > { %12450 = vst [vmem:[#allocation13_spill] sm:$0xff] %v8567_v6  ;;  %12451 = vst [vmem:[#allocation16_spill] sm:$0xff] %v8571_v8 }
 0x248   : > { %3074 = vrot.lane.b32.xlu1 %v1168_v29, %s7031_s15  ;;  %3072 = vrot.lane.b32.xlu0 %v1070_v9, %s7031_s15  ;;  %v1462_v9 = vcombine.high %v8428_v26, %v12370_v54 }
 0x24a   : > { %v8577_v52 = vpop.permute.xlu1 %2834  ;;  %v8581_v13 = vpop.permute.xlu0 %2832 }
 0x24b   : > { %12452 = vst [vmem:[#allocation23_spill] sm:$0xff] %v8577_v52  ;;  %12453 = vst [vmem:[#allocation15_spill] sm:$0xff] %v8581_v13 }
 0x24c   : > { %3078 = vrot.lane.b32.xlu1 %v1364_v38, %s7031_s15  ;;  %3076 = vrot.lane.b32.xlu0 %v1266_v27, %s7031_s15  ;;  %v1658_v27 = vcombine.high %v1635_v36, %v12370_v54 }
 0x24e   : > { %v8587_v29 = vpop.permute.xlu1 %2838  ;;  %v8591_v21 = vpop.permute.xlu0 %2836 }
 0x24f   : > { %12454 = vst [vmem:[#allocation157_spill] sm:$0xff] %v8587_v29  ;;  %12455 = vst [vmem:[#allocation158_spill] sm:$0xff] %v8591_v21 }
 0x250   : > { %3082 = vrot.lane.b32.xlu1 %v1560_v61, %s7031_s15  ;;  %3080 = vrot.lane.b32.xlu0 %v1462_v9, %s7031_s15  ;;  %v1854_v61 = vcombine.high %v1831_v44, %v12370_v54 }
 0x252   : > { %v8597_v38 = vpop.permute.xlu1 %2842  ;;  %v8600_v13 = vpop.permute.xlu0 %2840 }
 0x253   : > { %12456 = vst [vmem:[#allocation159_spill] sm:$0xff] %v8597_v38  ;;  %12457 = vst [vmem:[#allocation160_spill] sm:$0xff] %v8600_v13 }
 0x254   : > { %3086 = vrot.lane.b32.xlu1 %v1756_v28, %s7031_s15  ;;  %3084 = vrot.lane.b32.xlu0 %v1658_v27, %s7031_s15  ;;  %v2050_v28 = vcombine.high %v2027_v41, %v12370_v54  ;;  %v2246_v27 = vcombine.high %v2223_v62, %v12370_v54  ;;  %v2540_v41 = vcombine.high %v2517_v31, %v12370_v54 }
 0x255   : > { %v8641_v62 = vrot.slane %v1138_v47, %v7463_v5 }
 0x256   : > { %v8605_v26 = vpop.permute.xlu1 %2846  ;;  %v8608_v9 = vpop.permute.xlu0 %2844 }
 0x257   : > { %12458 = vst [vmem:[#allocation161_spill] sm:$0xff] %v8605_v26  ;;  %12459 = vst [vmem:[#allocation162_spill] sm:$0xff] %v8608_v9 }
 0x258   : > { %3090 = vrot.lane.b32.xlu1 %v1952_v0, %s7031_s15  ;;  %3088 = vrot.lane.b32.xlu0 %v1854_v61, %s7031_s15 }
 0x25a   : > { %v8613_v36 = vpop.permute.xlu1 %2882  ;;  %v8616_v13 = vpop.permute.xlu0 %2880 }
 0x25b   : > { %12460 = vst [vmem:[#allocation163_spill] sm:$0xff] %v8613_v36  ;;  %12461 = vst [vmem:[#allocation164_spill] sm:$0xff] %v8616_v13 }
 0x25c   : > { %3094 = vrot.lane.b32.xlu1 %v2148_v56, %s7031_s15  ;;  %3092 = vrot.lane.b32.xlu0 %v2050_v28, %s7031_s15  ;;  %v2442_v56 = vcombine.high %v2419_v23, %v12370_v54 }
 0x25e   : > { %v8621_v44 = vpop.permute.xlu1 %2886  ;;  %v8624_v0 = vpop.permute.xlu0 %2884 }
 0x25f   : > { %12462 = vst [vmem:[#allocation165_spill] sm:$0xff] %v8621_v44  ;;  %12463 = vst [vmem:[#allocation166_spill] sm:$0xff] %v8624_v0 }
 0x260   : > { %3098 = vrot.lane.b32.xlu1 %v2344_v18, %s7031_s15  ;;  %3096 = vrot.lane.b32.xlu0 %v2246_v27, %s7031_s15  ;;  %v8648_v18 = vrot.slane %v1040_v14, %v7463_v5  ;;  %v1348_v27 = vrot.slane %v1334_v25, %v7463_v5  ;;  %v1726_v25 = vcombine.high %v8422_v43, %v12370_v54 }
 0x262   : > { %v8631_v61 = vpop.permute.xlu1 %2890  ;;  %v8636_v28 = vpop.permute.xlu0 %2888  ;;  %v1740_v53 = vrot.slane %v1726_v25, %v7463_v5  ;;  %v2118_v25 = vcombine.high %v8485_v58, %v12370_v54 }
 0x263   : > { %12464 = vst [vmem:[#allocation167_spill] sm:$0xff] %v8631_v61  ;;  %12465 = vst [vmem:[#allocation168_spill] sm:$0xff] %v8636_v28  ;;  %v12605_v28 = vld [vmem:[#allocation96_spill] sm:$0xff] }
 0x264   : > { %3102 = vrot.lane.b32.xlu1 %v2540_v41, %s7031_s15  ;;  %3100 = vrot.lane.b32.xlu0 %v2442_v56, %s7031_s15  ;;  %v1250_v41 = vrot.slane %v1236_v39, %v7463_v5  ;;  %v1544_v56 = vrot.slane %v1530_v24, %v7463_v5  ;;  %v1628_v39 = vcombine.high %v8432_v55, %v12370_v54 }
 0x265   : > { %v1922_v24 = vcombine.high %v8456_v17, %v12370_v54  ;;  %v1838_v17 = vrot.slane %v1824_v20, %v7463_v5  ;;  %v2132_v63 = vrot.slane %v2118_v25, %v7463_v5  ;;  %v2216_v20 = vcombine.high %v8521_v33, %v12370_v54 }
 0x266   : > { %v8645_v31 = vpop.permute.xlu1 %2894  ;;  %v8652_v23 = vpop.permute.xlu0 %2892  ;;  %v1642_v43 = vrot.slane %v1628_v39, %v7463_v5  ;;  %v2020_v39 = vcombine.high %v8493_v45, %v12370_v54  ;;  %v2510_v25 = vcombine.high %v8541_v4, %v12370_v54 }
 0x267   : > { %12466 = vst [vmem:[#allocation169_spill] sm:$0xff] %v8645_v31  ;;  %12467 = vst [vmem:[#allocation170_spill] sm:$0xff] %v8652_v23  ;;  %v1936_v55 = vrot.slane %v1922_v24, %v7463_v5  ;;  %v2314_v24 = vcombine.high %v8513_v32, %v12370_v54  ;;  %v2230_v32 = vrot.slane %v2216_v20, %v7463_v5 }
 0x268   : > { %3138 = vrot.lane.b32.xlu1 %v8641_v62, %s7032_s16  ;;  %3136 = vrot.lane.b32.xlu0 %v8648_v18, %s7032_s16  ;;  %v2034_v58 = vrot.slane %v2020_v39, %v7463_v5  ;;  %v2412_v39 = vcombine.high %v8549_v37, %v12370_v54  ;;  %v2524_v33 = vrot.slane %v2510_v25, %v7463_v5 }
 0x269   : > { %v2328_v45 = vrot.slane %v2314_v24, %v7463_v5  ;;  %v1169_v37 = vcombine.high %v8641_v62, %v12370_v54  ;;  %v1071_v25 = vcombine.high %v8648_v18, %v12370_v54  ;;  %v1561_v18 = vcombine.high %v1544_v56, %v12370_v54 }
 0x26a   : > { %v8661_v47 = vpop.permute.xlu1 %2898  ;;  %v8666_v14 = vpop.permute.xlu0 %2896  ;;  %v2426_v24 = vrot.slane %v2412_v39, %v7463_v5 }
 0x26b   : > { %12468 = vst [vmem:[#allocation171_spill] sm:$0xff] %v8661_v47  ;;  %12469 = vst [vmem:[#allocation172_spill] sm:$0xff] %v8666_v14 }
 0x26c   : > { %3142 = vrot.lane.b32.xlu1 %v1348_v27, %s7032_s16  ;;  %3140 = vrot.lane.b32.xlu0 %v1250_v41, %s7032_s16 }
 0x26e   : > { %v8673_v23 = vpop.permute.xlu1 %2902  ;;  %v8678_v47 = vpop.permute.xlu0 %2900 }
 0x26f   : > { %12470 = vst [vmem:[#allocation173_spill] sm:$0xff] %v8673_v23  ;;  %12471 = vst [vmem:[#allocation174_spill] sm:$0xff] %v8678_v47 }
 0x270   : > { %3146 = vrot.lane.b32.xlu1 %v1544_v56, %s7032_s16  ;;  %3144 = vrot.lane.b32.xlu0 %v1446_v35, %s7032_s16 }
 0x272   : > { %v8685_v14 = vpop.permute.xlu1 %2906  ;;  %v8690_v23 = vpop.permute.xlu0 %2904 }
 0x273   : > { %12472 = vst [vmem:[#allocation175_spill] sm:$0xff] %v8685_v14  ;;  %12473 = vst [vmem:[#allocation176_spill] sm:$0xff] %v8690_v23 }
 0x274   : > { %3150 = vrot.lane.b32.xlu1 %v1740_v53, %s7032_s16  ;;  %3148 = vrot.lane.b32.xlu0 %v1642_v43, %s7032_s16 }
 0x276   : > { %v8697_v47 = vpop.permute.xlu1 %2910  ;;  %v8702_v14 = vpop.permute.xlu0 %2908 }
 0x277   : > { %12474 = vst [vmem:[#allocation177_spill] sm:$0xff] %v8697_v47  ;;  %12475 = vst [vmem:[#allocation178_spill] sm:$0xff] %v8702_v14 }
 0x278   : > { %3154 = vrot.lane.b32.xlu1 %v1936_v55, %s7032_s16  ;;  %3152 = vrot.lane.b32.xlu0 %v1838_v17, %s7032_s16 }
 0x27a   : > { %v8709_v23 = vpop.permute.xlu1 %2946  ;;  %v8714_v47 = vpop.permute.xlu0 %2944 }
 0x27b   : > { %12476 = vst [vmem:[#allocation179_spill] sm:$0xff] %v8709_v23  ;;  %12477 = vst [vmem:[#allocation180_spill] sm:$0xff] %v8714_v47 }
 0x27c   : > { %3158 = vrot.lane.b32.xlu1 %v2132_v63, %s7032_s16  ;;  %3156 = vrot.lane.b32.xlu0 %v2034_v58, %s7032_s16 }
 0x27e   : > { %v8721_v14 = vpop.permute.xlu1 %2950  ;;  %v8726_v23 = vpop.permute.xlu0 %2948 }
 0x27f   : > { %12478 = vst [vmem:[#allocation181_spill] sm:$0xff] %v8721_v14  ;;  %12479 = vst [vmem:[#allocation182_spill] sm:$0xff] %v8726_v23 }
 0x280   : > { %3162 = vrot.lane.b32.xlu1 %v2328_v45, %s7032_s16  ;;  %3160 = vrot.lane.b32.xlu0 %v2230_v32, %s7032_s16 }
 0x282   : > { %v8731_v47 = vpop.permute.xlu1 %2954  ;;  %v8734_v4 = vpop.permute.xlu0 %2952 }
 0x283   : > { %12480 = vst [vmem:[#allocation183_spill] sm:$0xff] %v8731_v47  ;;  %12481 = vst [vmem:[#allocation184_spill] sm:$0xff] %v8734_v4  ;;  %v1365_v4 = vcombine.high %v1348_v27, %v12370_v54 }
 0x284   : > { %3166 = vrot.lane.b32.xlu1 %v2524_v33, %s7032_s16  ;;  %3164 = vrot.lane.b32.xlu0 %v2426_v24, %s7032_s16 }
 0x286   : > { %v8738_v20 = vpop.permute.xlu1 %2958  ;;  %v8742_v23 = vpop.permute.xlu0 %2956 }
 0x287   : > { %12482 = vst [vmem:[#allocation185_spill] sm:$0xff] %v8738_v20  ;;  %12483 = vst [vmem:[#allocation186_spill] sm:$0xff] %v8742_v23  ;;  %v1267_v20 = vcombine.high %v1250_v41, %v12370_v54  ;;  %v1757_v41 = vcombine.high %v1740_v53, %v12370_v54 }
 0x288   : > { %3202 = vrot.lane.b32.xlu1 %v1169_v37, %s7033_s17  ;;  %3200 = vrot.lane.b32.xlu0 %v1071_v25, %s7033_s17  ;;  %v1463_v37 = vcombine.high %v1446_v35, %v12370_v54  ;;  %v1953_v35 = vcombine.high %v1936_v55, %v12370_v54  ;;  %v1123_v55 = vcombine.high %v8310_v1, %v12370_v54 }
 0x289   : > { %v1319_v1 = vcombine.high %v8336_v11, %v12370_v54 }
 0x28a   : > { %v8748_v39 = vpop.permute.xlu1 %2962  ;;  %v8751_v47 = vpop.permute.xlu0 %2960 }
 0x28b   : > { %12484 = vst [vmem:[#allocation187_spill] sm:$0xff] %v8748_v39  ;;  %12485 = vst [vmem:[#allocation188_spill] sm:$0xff] %v8751_v47 }
 0x28c   : > { %3206 = vrot.lane.b32.xlu1 %v1365_v4, %s7033_s17  ;;  %3204 = vrot.lane.b32.xlu0 %v1267_v20, %s7033_s17  ;;  %v1659_v4 = vcombine.high %v1642_v43, %v12370_v54  ;;  %v2149_v43 = vcombine.high %v2132_v63, %v12370_v54  ;;  %v2247_v63 = vcombine.high %v2230_v32, %v12370_v54 }
 0x28d   : > { %v1221_v32 = vcombine.high %v8344_v51, %v12370_v54 }
 0x28e   : > { %v8756_v62 = vpop.permute.xlu1 %2966  ;;  %v8759_v23 = vpop.permute.xlu0 %2964 }
 0x28f   : > { %12486 = vst [vmem:[#allocation189_spill] sm:$0xff] %v8756_v62  ;;  %12487 = vst [vmem:[#allocation190_spill] sm:$0xff] %v8759_v23 }
 0x290   : > { %3210 = vrot.lane.b32.xlu1 %v1561_v18, %s7033_s17  ;;  %3208 = vrot.lane.b32.xlu0 %v1463_v37, %s7033_s17  ;;  %v1855_v18 = vcombine.high %v1838_v17, %v12370_v54 }
 0x292   : > { %v8764_v27 = vpop.permute.xlu1 %2970  ;;  %v8767_v25 = vpop.permute.xlu0 %2968 }
 0x293   : > { %12488 = vst [vmem:[#allocation191_spill] sm:$0xff] %v8764_v27  ;;  %12489 = vst [vmem:[#allocation192_spill] sm:$0xff] %v8767_v25 }
 0x294   : > { %3214 = vrot.lane.b32.xlu1 %v1757_v41, %s7033_s17  ;;  %3212 = vrot.lane.b32.xlu0 %v1659_v4, %s7033_s17  ;;  %v2051_v41 = vcombine.high %v2034_v58, %v12370_v54  ;;  %v2345_v4 = vcombine.high %v2328_v45, %v12370_v54  ;;  %v8801_v58 = vrot.slane %v1123_v55, %v7441_v50 }
 0x295   : > { %v2541_v45 = vcombine.high %v2524_v33, %v12370_v54  ;;  %v8823_v33 = vrot.slane %v1319_v1, %v7441_v50  ;;  %v1515_v55 = vcombine.high %v8369_v49, %v12370_v54 }
 0x296   : > { %v8772_v56 = vpop.permute.xlu1 %2974  ;;  %v8775_v20 = vpop.permute.xlu0 %2972  ;;  %v8820_v11 = vrot.slane %v8801_v58, %v7463_v5 }
 0x297   : > { %12490 = vst [vmem:[#allocation193_spill] sm:$0xff] %v8772_v56  ;;  %12491 = vst [vmem:[#allocation194_spill] sm:$0xff] %v8775_v20  ;;  %v8846_v49 = vrot.slane %v8823_v33, %v7463_v5  ;;  %v8849_v1 = vrot.slane %v1515_v55, %v7441_v50  ;;  %v2397_v56 = vcombine.high %v8533_v59, %v12370_v54 }
 0x298   : > { %3218 = vrot.lane.b32.xlu1 %v1953_v35, %s7033_s17  ;;  %3216 = vrot.lane.b32.xlu0 %v1855_v18, %s7033_s17  ;;  %v1025_v35 = vcombine.high %v8318_v22, %v12370_v54 }
 0x299   : > { %v8969_v27 = vrot.slane %v2397_v56, %v7441_v50 }
 0x29a   : > { %v8780_v53 = vpop.permute.xlu1 %3010  ;;  %v8783_v37 = vpop.permute.xlu0 %3008  ;;  %v8809_v22 = vrot.slane %v1025_v35, %v7441_v50 }
 0x29b   : > { %12492 = vst [vmem:[#allocation195_spill] sm:$0xff] %v8780_v53  ;;  %12493 = vst [vmem:[#allocation196_spill] sm:$0xff] %v8783_v37  ;;  %v2201_v53 = vcombine.high %v8505_v48, %v12370_v54 }
 0x29c   : > { %3222 = vrot.lane.b32.xlu1 %v2149_v43, %s7033_s17  ;;  %3220 = vrot.lane.b32.xlu0 %v2051_v41, %s7033_s17  ;;  %v8831_v51 = vrot.slane %v8809_v22, %v7463_v5 }
 0x29e   : > { %v8790_v17 = vpop.permute.xlu1 %3014  ;;  %v8795_v18 = vpop.permute.xlu0 %3012  ;;  %v1072_v47 = vcombine.high %v8831_v51, %v12370_v54 }
 0x29f   : > { %12494 = vst [vmem:[#allocation197_spill] sm:$0xff] %v8790_v17  ;;  %12495 = vst [vmem:[#allocation198_spill] sm:$0xff] %v8795_v18  ;;  %v2005_v17 = vcombine.high %v8476_v34, %v12370_v54 }
 0x2a0   : > { %3226 = vrot.lane.b32.xlu1 %v2345_v4, %s7033_s17  ;;  %3224 = vrot.lane.b32.xlu0 %v2247_v63, %s7033_s17  ;;  %v2443_v4 = vcombine.high %v2426_v24, %v12370_v54  ;;  %v8834_v24 = vrot.slane %v1221_v32, %v7441_v50  ;;  %v1417_v63 = vcombine.high %v8376_v16, %v12370_v54 }
 0x2a1   : > { %v1711_v32 = vcombine.high %v8403_v10, %v12370_v54  ;;  %v8872_v10 = vrot.slane %v8849_v1, %v7463_v5 }
 0x2a2   : > { %v8805_v43 = vpop.permute.xlu1 %3018  ;;  %v8813_v41 = vpop.permute.xlu0 %3016 }
 0x2a3   : > { %12496 = vst [vmem:[#allocation199_spill] sm:$0xff] %v8805_v43  ;;  %12497 = vst [vmem:[#allocation200_spill] sm:$0xff] %v8813_v41  ;;  %v8875_v55 = vrot.slane %v1711_v32, %v7441_v50  ;;  %v1809_v43 = vcombine.high %v8444_v30, %v12370_v54 }
 0x2a4   : > { %3230 = vrot.lane.b32.xlu1 %v2541_v45, %s7033_s17  ;;  %3228 = vrot.lane.b32.xlu0 %v2443_v4, %s7033_s17  ;;  %v8857_v4 = vrot.slane %v8834_v24, %v7463_v5 }
 0x2a6   : > { %v8827_v35 = vpop.permute.xlu1 %3022  ;;  %v8838_v45 = vpop.permute.xlu0 %3020 }
 0x2a7   : > { %12498 = vst [vmem:[#allocation201_spill] sm:$0xff] %v8827_v35  ;;  %12499 = vst [vmem:[#allocation202_spill] sm:$0xff] %v8838_v45  ;;  %v8860_v45 = vrot.slane %v1417_v63, %v7441_v50  ;;  %v1613_v35 = vcombine.high %v8410_v7, %v12370_v54  ;;  %v1907_v63 = vcombine.high %v8437_v12, %v12370_v54 }
 0x2a8   : > { %3266 = vrot.lane.b32.xlu1 %v8820_v11, %s7034_s22  ;;  %3264 = vrot.lane.b32.xlu0 %v8831_v51, %s7034_s22  ;;  %v8898_v12 = vrot.slane %v8875_v55, %v7463_v5 }
 0x2a9   : > { %v8883_v7 = vrot.slane %v8860_v45, %v7463_v5  ;;  %v8901_v32 = vrot.slane %v1907_v63, %v7441_v50 }
 0x2aa   : > { %v8853_v16 = vpop.permute.xlu1 %3026  ;;  %v8864_v41 = vpop.permute.xlu0 %3024 }
 0x2ab   : > { %12500 = vst [vmem:[#allocation203_spill] sm:$0xff] %v8853_v16  ;;  %12501 = vst [vmem:[#allocation204_spill] sm:$0xff] %v8864_v41  ;;  %v8886_v41 = vrot.slane %v1613_v35, %v7441_v50  ;;  %v2103_v35 = vcombine.high %v8469_v57, %v12370_v54  ;;  %v1944_v57 = vrot.slane %v8901_v32, %v7463_v5 }
 0x2ac   : > { %3270 = vrot.lane.b32.xlu1 %v8846_v49, %s7034_s22  ;;  %3268 = vrot.lane.b32.xlu0 %v8857_v4, %s7034_s22 }
 0x2ad   : > { %v1650_v30 = vrot.slane %v8886_v41, %v7463_v5  ;;  %v8922_v63 = vrot.slane %v2103_v35, %v7441_v50 }
 0x2ae   : > { %v8879_v16 = vpop.permute.xlu1 %3030  ;;  %v8890_v18 = vpop.permute.xlu0 %3028 }
 0x2af   : > { %12502 = vst [vmem:[#allocation205_spill] sm:$0xff] %v8879_v16  ;;  %12503 = vst [vmem:[#allocation206_spill] sm:$0xff] %v8890_v18  ;;  %v8910_v18 = vrot.slane %v1809_v43, %v7441_v50  ;;  %v2299_v43 = vcombine.high %v8498_v15, %v12370_v54  ;;  %v2140_v15 = vrot.slane %v8922_v63, %v7463_v5 }
 0x2b0   : > { %3274 = vrot.lane.b32.xlu1 %v8872_v10, %s7034_s22  ;;  %3272 = vrot.lane.b32.xlu0 %v8883_v7, %s7034_s22 }
 0x2b1   : > { %v1846_v34 = vrot.slane %v8910_v18, %v7463_v5  ;;  %v8942_v35 = vrot.slane %v2299_v43, %v7441_v50 }
 0x2b2   : > { %v8905_v16 = vpop.permute.xlu1 %3034  ;;  %v8914_v37 = vpop.permute.xlu0 %3032 }
 0x2b3   : > { %12504 = vst [vmem:[#allocation207_spill] sm:$0xff] %v8905_v16  ;;  %12505 = vst [vmem:[#allocation208_spill] sm:$0xff] %v8914_v37  ;;  %v8931_v37 = vrot.slane %v2005_v17, %v7441_v50 }
 0x2b4   : > { %3278 = vrot.lane.b32.xlu1 %v8898_v12, %s7034_s22  ;;  %3276 = vrot.lane.b32.xlu0 %v1650_v30, %s7034_s22 }
 0x2b5   : > { %v2042_v48 = vrot.slane %v8931_v37, %v7463_v5 }
 0x2b6   : > { %v8926_v16 = vpop.permute.xlu1 %3038  ;;  %v8935_v20 = vpop.permute.xlu0 %3036 }
 0x2b7   : > { %12506 = vst [vmem:[#allocation209_spill] sm:$0xff] %v8926_v16  ;;  %12507 = vst [vmem:[#allocation210_spill] sm:$0xff] %v8935_v20  ;;  %v2495_v16 = vcombine.high %v8526_v19, %v12370_v54  ;;  %v8951_v20 = vrot.slane %v2201_v53, %v7441_v50  ;;  %v2336_v19 = vrot.slane %v8942_v35, %v7463_v5 }
 0x2b8   : > { %3282 = vrot.lane.b32.xlu1 %v1944_v57, %s7034_s22  ;;  %3280 = vrot.lane.b32.xlu0 %v1846_v34, %s7034_s22 }
 0x2b9   : > { %v8962_v43 = vrot.slane %v2495_v16, %v7441_v50  ;;  %v2238_v53 = vrot.slane %v8951_v20, %v7463_v5  ;;  %v2434_v16 = vrot.slane %v8969_v27, %v7463_v5 }
 0x2ba   : > { %v8946_v17 = vpop.permute.xlu1 %3074  ;;  %v8955_v25 = vpop.permute.xlu0 %3072 }
 0x2bb   : > { %12508 = vst [vmem:[#allocation211_spill] sm:$0xff] %v8946_v17  ;;  %12509 = vst [vmem:[#allocation212_spill] sm:$0xff] %v8955_v25  ;;  %v2532_v25 = vrot.slane %v8962_v43, %v7463_v5 }
 0x2bc   : > { %3286 = vrot.lane.b32.xlu1 %v2140_v15, %s7034_s22  ;;  %3284 = vrot.lane.b32.xlu0 %v2042_v48, %s7034_s22 }
 0x2be   : > { %v8964_v17 = vpop.permute.xlu1 %3078  ;;  %v8971_v59 = vpop.permute.xlu0 %3076 }
 0x2bf   : > { %12510 = vst [vmem:[#allocation213_spill] sm:$0xff] %v8964_v17  ;;  %12511 = vst [vmem:[#allocation214_spill] sm:$0xff] %v8971_v59  ;;  %v1170_v59 = vcombine.high %v8820_v11, %v12370_v54  ;;  %v1268_v11 = vcombine.high %v8857_v4, %v12370_v54 }
 0x2c0   : > { %3290 = vrot.lane.b32.xlu1 %v2336_v19, %s7034_s22  ;;  %3288 = vrot.lane.b32.xlu0 %v2238_v53, %s7034_s22 }
 0x2c2   : > { %v8977_v23 = vpop.permute.xlu1 %3082  ;;  %v8981_v17 = vpop.permute.xlu0 %3080 }
 0x2c3   : > { %12512 = vst [vmem:[#allocation215_spill] sm:$0xff] %v8977_v23  ;;  %12513 = vst [vmem:[#allocation216_spill] sm:$0xff] %v8981_v17  ;;  %v1366_v23 = vcombine.high %v8846_v49, %v12370_v54 }
 0x2c4   : > { %3294 = vrot.lane.b32.xlu1 %v2532_v25, %s7034_s22  ;;  %3292 = vrot.lane.b32.xlu0 %v2434_v16, %s7034_s22 }
 0x2c6   : > { %v8985_v56 = vpop.permute.xlu1 %3086  ;;  %v8989_v62 = vpop.permute.xlu0 %3084 }
 0x2c7   : > { %12514 = vst [vmem:[#allocation217_spill] sm:$0xff] %v8985_v56  ;;  %12515 = vst [vmem:[#allocation218_spill] sm:$0xff] %v8989_v62 }
 0x2c8   : > { %3330 = vrot.lane.b32.xlu1 %v1170_v59, %s7035_s23  ;;  %3328 = vrot.lane.b32.xlu0 %v1072_v47, %s7035_s23  ;;  %v1562_v59 = vcombine.high %v8872_v10, %v12370_v54 }
 0x2ca   : > { %v8995_v17 = vpop.permute.xlu1 %3090  ;;  %v8999_v39 = vpop.permute.xlu0 %3088 }
 0x2cb   : > { %12516 = vst [vmem:[#allocation219_spill] sm:$0xff] %v8995_v17  ;;  %12517 = vst [vmem:[#allocation220_spill] sm:$0xff] %v8999_v39  ;;  %v1464_v17 = vcombine.high %v8883_v7, %v12370_v54  ;;  %v1954_v7 = vcombine.high %v1944_v57, %v12370_v54 }
 0x2cc   : > { %3334 = vrot.lane.b32.xlu1 %v1366_v23, %s7035_s23  ;;  %3332 = vrot.lane.b32.xlu0 %v1268_v11, %s7035_s23  ;;  %v1758_v23 = vcombine.high %v8898_v12, %v12370_v54  ;;  %v1660_v11 = vcombine.high %v1650_v30, %v12370_v54  ;;  %v2150_v30 = vcombine.high %v2140_v15, %v12370_v54 }
 0x2cd   : > { %v1153_v15 = vcombine.high %v8801_v58, %v12370_v54 }
 0x2ce   : > { %v9005_v51 = vpop.permute.xlu1 %3094  ;;  %v9009_v47 = vpop.permute.xlu0 %3092 }
 0x2cf   : > { %12518 = vst [vmem:[#allocation221_spill] sm:$0xff] %v9005_v51  ;;  %12519 = vst [vmem:[#allocation222_spill] sm:$0xff] %v9009_v47  ;;  %v1167_v58 = vrot.slane %v1153_v15, %v7463_v5  ;;  %v1447_v15 = vcombine.high %v8860_v45, %v12370_v54  ;;  %v12597_v51 = vld [vmem:[#allocation92_spill] sm:$0xff] }
 0x2d0   : > { %3338 = vrot.lane.b32.xlu1 %v1562_v59, %s7035_s23  ;;  %3336 = vrot.lane.b32.xlu0 %v1464_v17, %s7035_s23  ;;  %v1856_v17 = vcombine.high %v1846_v34, %v12370_v54  ;;  %v2346_v34 = vcombine.high %v2336_v19, %v12370_v54  ;;  %v2444_v19 = vcombine.high %v2434_v16, %v12370_v54 }
 0x2d1   : > { %v1545_v16 = vcombine.high %v8849_v1, %v12370_v54  ;;  %v1461_v45 = vrot.slane %v1447_v15, %v7463_v5  ;;  %v2133_v15 = vcombine.high %v8922_v63, %v12370_v54 }
 0x2d2   : > { %v9015_v49 = vpop.permute.xlu1 %3098  ;;  %v9019_v4 = vpop.permute.xlu0 %3096 }
 0x2d3   : > { %12520 = vst [vmem:[#allocation223_spill] sm:$0xff] %v9015_v49  ;;  %12521 = vst [vmem:[#allocation224_spill] sm:$0xff] %v9019_v4  ;;  %v1559_v1 = vrot.slane %v1545_v16, %v7463_v5  ;;  %v1839_v16 = vcombine.high %v8910_v18, %v12370_v54  ;;  %v2147_v63 = vrot.slane %v2133_v15, %v7463_v5 }
 0x2d4   : > { %3342 = vrot.lane.b32.xlu1 %v1758_v23, %s7035_s23  ;;  %3340 = vrot.lane.b32.xlu0 %v1660_v11, %s7035_s23  ;;  %v2052_v23 = vcombine.high %v2042_v48, %v12370_v54  ;;  %v2427_v15 = vcombine.high %v8969_v27, %v12370_v54 }
 0x2d5   : > { %v1853_v18 = vrot.slane %v1839_v16, %v7463_v5  ;;  %v2525_v16 = vcombine.high %v8962_v43, %v12370_v54 }
 0x2d6   : > { %v9024_v10 = vpop.permute.xlu1 %3102  ;;  %v9027_v59 = vpop.permute.xlu0 %3100 }
 0x2d7   : > { %12522 = vst [vmem:[#allocation225_spill] sm:$0xff] %v9024_v10  ;;  %12523 = vst [vmem:[#allocation226_spill] sm:$0xff] %v9027_v59 }
 0x2d8   : > { %3346 = vrot.lane.b32.xlu1 %v1954_v7, %s7035_s23  ;;  %3344 = vrot.lane.b32.xlu0 %v1856_v17, %s7035_s23  ;;  %v2248_v7 = vcombine.high %v2238_v53, %v12370_v54  ;;  %v2542_v17 = vcombine.high %v2532_v25, %v12370_v54  ;;  %v1349_v53 = vcombine.high %v8823_v33, %v12370_v54 }
 0x2d9   : > { %v1251_v25 = vcombine.high %v8834_v24, %v12370_v54 }
 0x2da   : > { %v9032_v12 = vpop.permute.xlu1 %3138  ;;  %v9035_v4 = vpop.permute.xlu0 %3136 }
 0x2db   : > { %12524 = vst [vmem:[#allocation227_spill] sm:$0xff] %v9032_v12  ;;  %12525 = vst [vmem:[#allocation228_spill] sm:$0xff] %v9035_v4  ;;  %v12589_v4 = vld [vmem:[#allocation88_spill] sm:$0xff] }
 0x2dc   : > { %3350 = vrot.lane.b32.xlu1 %v2150_v30, %s7035_s23  ;;  %3348 = vrot.lane.b32.xlu0 %v2052_v23, %s7035_s23  ;;  %v1055_v30 = vcombine.high %v8809_v22, %v12370_v54 }
 0x2de   : > { %v9040_v57 = vpop.permute.xlu1 %3142  ;;  %v9043_v11 = vpop.permute.xlu0 %3140  ;;  %v1069_v22 = vrot.slane %v1055_v30, %v7463_v5  ;;  %v1741_v30 = vcombine.high %v8875_v55, %v12370_v54 }
 0x2df   : > { %12526 = vst [vmem:[#allocation229_spill] sm:$0xff] %v9040_v57  ;;  %12527 = vst [vmem:[#allocation230_spill] sm:$0xff] %v9043_v11 }
 0x2e0   : > { %3354 = vrot.lane.b32.xlu1 %v2346_v34, %s7035_s23  ;;  %3352 = vrot.lane.b32.xlu0 %v2248_v7, %s7035_s23  ;;  %v1755_v55 = vrot.slane %v1741_v30, %v7463_v5  ;;  %v2035_v30 = vcombine.high %v8931_v37, %v12370_v54 }
 0x2e2   : > { %v9050_v48 = vpop.permute.xlu1 %3146  ;;  %v9055_v23 = vpop.permute.xlu0 %3144  ;;  %v2049_v37 = vrot.slane %v2035_v30, %v7463_v5 }
 0x2e3   : > { %12528 = vst [vmem:[#allocation231_spill] sm:$0xff] %v9050_v48  ;;  %12529 = vst [vmem:[#allocation232_spill] sm:$0xff] %v9055_v23 }
 0x2e4   : > { %3358 = vrot.lane.b32.xlu1 %v2542_v17, %s7035_s23  ;;  %3356 = vrot.lane.b32.xlu0 %v2444_v19, %s7035_s23  ;;  %v1363_v17 = vrot.slane %v1349_v53, %v7463_v5  ;;  %v1265_v19 = vrot.slane %v1251_v25, %v7463_v5  ;;  %v1643_v53 = vcombine.high %v8886_v41, %v12370_v54 }
 0x2e5   : > { %v1937_v25 = vcombine.high %v8901_v32, %v12370_v54 }
 0x2e6   : > { %v9062_v34 = vpop.permute.xlu1 %3150  ;;  %v9067_v7 = vpop.permute.xlu0 %3148  ;;  %v1657_v41 = vrot.slane %v1643_v53, %v7463_v5  ;;  %v2329_v53 = vcombine.high %v8942_v35, %v12370_v54 }
 0x2e7   : > { %12530 = vst [vmem:[#allocation233_spill] sm:$0xff] %v9062_v34  ;;  %12531 = vst [vmem:[#allocation234_spill] sm:$0xff] %v9067_v7  ;;  %v1951_v32 = vrot.slane %v1937_v25, %v7463_v5  ;;  %v2231_v25 = vcombine.high %v8951_v20, %v12370_v54 }
 0x2e8   : > { %3394 = vrot.lane.b32.xlu1 %v1167_v58, %s7036_s24  ;;  %3392 = vrot.lane.b32.xlu0 %v1069_v22, %s7036_s24  ;;  %v2343_v35 = vrot.slane %v2329_v53, %v7463_v5  ;;  %v1171_v53 = vcombine.high %v1167_v58, %v12370_v54 }
 0x2e9   : > { %v2245_v20 = vrot.slane %v2231_v25, %v7463_v5 }
 0x2ea   : > { %v9074_v33 = vpop.permute.xlu1 %3154  ;;  %v9079_v24 = vpop.permute.xlu0 %3152 }
 0x2eb   : > { %12532 = vst [vmem:[#allocation235_spill] sm:$0xff] %v9074_v33  ;;  %12533 = vst [vmem:[#allocation236_spill] sm:$0xff] %v9079_v24 }
 0x2ec   : > { %3398 = vrot.lane.b32.xlu1 %v1363_v17, %s7036_s24  ;;  %3396 = vrot.lane.b32.xlu0 %v1265_v19, %s7036_s24 }
 0x2ee   : > { %v9086_v7 = vpop.permute.xlu1 %3158  ;;  %v9091_v33 = vpop.permute.xlu0 %3156 }
 0x2ef   : > { %12534 = vst [vmem:[#allocation237_spill] sm:$0xff] %v9086_v7  ;;  %12535 = vst [vmem:[#allocation238_spill] sm:$0xff] %v9091_v33 }
 0x2f0   : > { %3402 = vrot.lane.b32.xlu1 %v1559_v1, %s7036_s24  ;;  %3400 = vrot.lane.b32.xlu0 %v1461_v45, %s7036_s24 }
 0x2f2   : > { %v9098_v24 = vpop.permute.xlu1 %3162  ;;  %v9103_v7 = vpop.permute.xlu0 %3160 }
 0x2f3   : > { %12536 = vst [vmem:[#allocation239_spill] sm:$0xff] %v9098_v24  ;;  %12537 = vst [vmem:[#allocation240_spill] sm:$0xff] %v9103_v7 }
 0x2f4   : > { %3406 = vrot.lane.b32.xlu1 %v1755_v55, %s7036_s24  ;;  %3404 = vrot.lane.b32.xlu0 %v1657_v41, %s7036_s24 }
 0x2f6   : > { %v9110_v33 = vpop.permute.xlu1 %3166  ;;  %v9115_v24 = vpop.permute.xlu0 %3164 }
 0x2f7   : > { %12538 = vst [vmem:[#allocation241_spill] sm:$0xff] %v9110_v33  ;;  %12539 = vst [vmem:[#allocation242_spill] sm:$0xff] %v9115_v24 }
 0x2f8   : > { %3410 = vrot.lane.b32.xlu1 %v1951_v32, %s7036_s24  ;;  %3408 = vrot.lane.b32.xlu0 %v1853_v18, %s7036_s24 }
 0x2fa   : > { %v9122_v7 = vpop.permute.xlu1 %3202  ;;  %v9127_v33 = vpop.permute.xlu0 %3200 }
 0x2fb   : > { %12540 = vst [vmem:[#allocation243_spill] sm:$0xff] %v9122_v7  ;;  %12541 = vst [vmem:[#allocation244_spill] sm:$0xff] %v9127_v33  ;;  %v2539_v33 = vrot.slane %v2525_v16, %v7463_v5 }
 0x2fc   : > { %3414 = vrot.lane.b32.xlu1 %v2147_v63, %s7036_s24  ;;  %3412 = vrot.lane.b32.xlu0 %v2049_v37, %s7036_s24 }
 0x2fe   : > { %v9134_v24 = vpop.permute.xlu1 %3206  ;;  %v9139_v7 = vpop.permute.xlu0 %3204 }
 0x2ff   : > { %12542 = vst [vmem:[#allocation245_spill] sm:$0xff] %v9134_v24  ;;  %12543 = vst [vmem:[#allocation246_spill] sm:$0xff] %v9139_v7  ;;  %v2441_v24 = vrot.slane %v2427_v15, %v7463_v5  ;;  %v1073_v7 = vcombine.high %v1069_v22, %v12370_v54  ;;  %v1367_v15 = vcombine.high %v1363_v17, %v12370_v54 }
 0x300   : > { %3418 = vrot.lane.b32.xlu1 %v2343_v35, %s7036_s24  ;;  %3416 = vrot.lane.b32.xlu0 %v2245_v20, %s7036_s24  ;;  %v1563_v22 = vcombine.high %v1559_v1, %v12370_v54 }
 0x302   : > { %v9144_v30 = vpop.permute.xlu1 %3210  ;;  %v9147_v43 = vpop.permute.xlu0 %3208 }
 0x303   : > { %12544 = vst [vmem:[#allocation247_spill] sm:$0xff] %v9144_v30  ;;  %12545 = vst [vmem:[#allocation248_spill] sm:$0xff] %v9147_v43  ;;  %v1269_v30 = vcombine.high %v1265_v19, %v12370_v54  ;;  %v1759_v19 = vcombine.high %v1755_v55, %v12370_v54 }
 0x304   : > { %3422 = vrot.lane.b32.xlu1 %v2539_v33, %s7036_s24  ;;  %3420 = vrot.lane.b32.xlu0 %v2441_v24, %s7036_s24 }
 0x306   : > { %v9152_v27 = vpop.permute.xlu1 %3214  ;;  %v9155_v25 = vpop.permute.xlu0 %3212 }
 0x307   : > { %12546 = vst [vmem:[#allocation249_spill] sm:$0xff] %v9152_v27  ;;  %12547 = vst [vmem:[#allocation250_spill] sm:$0xff] %v9155_v25  ;;  %v12581_v27 = vld [vmem:[#allocation84_spill] sm:$0xff] }
 0x308   : > { %3458 = vrot.lane.b32.xlu1 %v1171_v53, %s7037_s25  ;;  %3456 = vrot.lane.b32.xlu0 %v1073_v7, %s7037_s25  ;;  %v1465_v7 = vcombine.high %v1461_v45, %v12370_v54  ;;  %v1955_v45 = vcombine.high %v1951_v32, %v12370_v54  ;;  %v2053_v32 = vcombine.high %v2049_v37, %v12370_v54 }
 0x309   : > { %v2249_v37 = vcombine.high %v2245_v20, %v12370_v54  ;;  %v2543_v20 = vcombine.high %v2539_v33, %v12370_v54 }
 0x30a   : > { %v9160_v16 = vpop.permute.xlu1 %3218  ;;  %v9163_v43 = vpop.permute.xlu0 %3216 }
 0x30b   : > { %12548 = vst [vmem:[#allocation251_spill] sm:$0xff] %v9160_v16  ;;  %12549 = vst [vmem:[#allocation252_spill] sm:$0xff] %v9163_v43 }
 0x30c   : > { %3462 = vrot.lane.b32.xlu1 %v1367_v15, %s7037_s25  ;;  %3460 = vrot.lane.b32.xlu0 %v1269_v30, %s7037_s25  ;;  %v1661_v30 = vcombine.high %v1657_v41, %v12370_v54  ;;  %v2151_v41 = vcombine.high %v2147_v63, %v12370_v54 }
 0x30e   : > { %v9168_v58 = vpop.permute.xlu1 %3222  ;;  %v9171_v25 = vpop.permute.xlu0 %3220 }
 0x30f   : > { %12550 = vst [vmem:[#allocation253_spill] sm:$0xff] %v9168_v58  ;;  %12551 = vst [vmem:[#allocation254_spill] sm:$0xff] %v9171_v25 }
 0x310   : > { %3466 = vrot.lane.b32.xlu1 %v1563_v22, %s7037_s25  ;;  %3464 = vrot.lane.b32.xlu0 %v1465_v7, %s7037_s25  ;;  %v1857_v22 = vcombine.high %v1853_v18, %v12370_v54  ;;  %v9198_v7 = vsel %vm559_vm0, %v7460_v40, %v7831_v60  ;;  %v9206_v18 = vsel %vm559_vm0, %v7438_v46, %v7819_v42 }
 0x311   : > { %v9212_v63 = vrot.slane %v9198_v7, %v7441_v50  ;;  %v2347_v40 = vcombine.high %v2343_v35, %v12370_v54  ;;  %v9219_v60 = vrot.slane %v9206_v18, %v7441_v50  ;;  %v9224_v46 = vsel %vm559_vm0, %v7522_v3, %v7847_v2 }
 0x312   : > { %v9176_v17 = vpop.permute.xlu1 %3226  ;;  %v9179_v53 = vpop.permute.xlu0 %3224  ;;  %v9242_v3 = vrot.slane %v9224_v46, %v7441_v50 }
 0x313   : > { %12552 = vst [vmem:[#allocation255_spill] sm:$0xff] %v9176_v17  ;;  %12553 = vst [vmem:[#allocation256_spill] sm:$0xff] %v9179_v53  ;;  %v9238_v35 = vrot.slane %v9212_v63, %v7463_v5  ;;  %v12573_v53 = vld [vmem:[#allocation80_spill] sm:$0xff]  ;;  %v3774_v26 = vcombine.high %v9219_v60, %v12370_v54 }
 0x314   : > { %3470 = vrot.lane.b32.xlu1 %v1759_v19, %s7037_s25  ;;  %3468 = vrot.lane.b32.xlu0 %v1661_v30, %s7037_s25 }
 0x316   : > { %v9184_v1 = vpop.permute.xlu1 %3230  ;;  %v9187_v15 = vpop.permute.xlu0 %3228 }
 0x317   : > { %12554 = vst [vmem:[#allocation257_spill] sm:$0xff] %v9184_v1  ;;  %12555 = vst [vmem:[#allocation258_spill] sm:$0xff] %v9187_v15 }
 0x318   : > { %3474 = vrot.lane.b32.xlu1 %v1955_v45, %s7037_s25  ;;  %3472 = vrot.lane.b32.xlu0 %v1857_v22, %s7037_s25  ;;  %v12560_v45 = vld [vmem:[#allocation73_spill] sm:$0xff] }
 0x319   : > { %v12561_v22 = vld [vmem:[#allocation29_spill] sm:$0xff] }
 0x31a   : > { %v9192_v55 = vpop.permute.xlu1 %3266  ;;  %v9200_v19 = vpop.permute.xlu0 %3264 }
 0x31b   : > { %12556 = vst [vmem:[#allocation259_spill] sm:$0xff] %v9192_v55  ;;  %12557 = vst [vmem:[#allocation260_spill] sm:$0xff] %v9200_v19  ;;  %v12567_v19 = vld [vmem:[#allocation36_spill] sm:$0xff]  ;;  %v3902_v55 = vcombine.high %v9238_v35, %v12370_v54 }
 0x31c   : > { %3478 = vrot.lane.b32.xlu1 %v2151_v41, %s7037_s25  ;;  %3476 = vrot.lane.b32.xlu0 %v2053_v32, %s7037_s25  ;;  %v9232_v41 = vsel %vm559_vm0, %v12561_v22, %v12560_v45  ;;  %v9249_v32 = vrot.slane %v9219_v60, %v7463_v5  ;;  %v12564_v45 = vld [vmem:[#allocation40_spill] sm:$0xff] }
 0x31e   : > { %v9214_v30 = vpop.permute.xlu1 %3270  ;;  %v9226_v42 = vpop.permute.xlu0 %3268 }
 0x31f   : > { %12558 = vst [vmem:[#allocation261_spill] sm:$0xff] %v9214_v30  ;;  %12559 = vst [vmem:[#allocation262_spill] sm:$0xff] %v9226_v42  ;;  %v2445_v30 = vcombine.high %v2441_v24, %v12370_v54 }
 0x320   : > { %3482 = vrot.lane.b32.xlu1 %v2347_v40, %s7037_s25  ;;  %3480 = vrot.lane.b32.xlu0 %v2249_v37, %s7037_s25  ;;  %v9253_v40 = vrot.slane %v9232_v41, %v7441_v50  ;;  %v12563_v37 = vld [vmem:[#allocation78_spill] sm:$0xff] }
 0x321   : > { %v9258_v22 = vsel %vm559_vm0, %v12564_v45, %v12563_v37  ;;  %v9274_v37 = vrot.slane %v9242_v3, %v7463_v5 }
 0x322   : > { %v9244_v2 = vpop.permute.xlu1 %3274  ;;  %v9260_v42 = vpop.permute.xlu0 %3272  ;;  %v9278_v45 = vrot.slane %v9258_v22, %v7441_v50  ;;  %v3970_v60 = vcombine.high %v9253_v40, %v12370_v54 }
 0x323   : > { %12562 = vst [vmem:[#allocation73_spill] sm:$0xff] %v9244_v2  ;;  %12565 = vst [vmem:[#allocation29_spill] sm:$0xff] %v9260_v42  ;;  %v12566_v2 = vld [vmem:[#allocation76_spill] sm:$0xff]  ;;  %v4098_v25 = vcombine.high %v9274_v37, %v12370_v54 }
 0x324   : > { %v9266_v33 = vsel %vm559_vm0, %v12567_v19, %v12566_v2  ;;  %3486 = vrot.lane.b32.xlu1 %v2543_v20, %s7037_s25  ;;  %3484 = vrot.lane.b32.xlu0 %v2445_v30, %s7037_s25  ;;  %v3804_v19 = vcombine.high %v9249_v32, %v12370_v54  ;;  %v9286_v2 = vrot.slane %v9253_v40, %v7463_v5  ;;  %v12570_v20 = vld [vmem:[#allocation82_spill] sm:$0xff]  ;;  %v12571_v42 = vld [vmem:[#allocation48_spill] sm:$0xff] }
 0x325   : > { %v9290_v30 = vrot.slane %v9266_v33, %v7441_v50  ;;  %v9295_v15 = vsel %vm559_vm0, %v12571_v42, %v12570_v20  ;;  %v9310_v58 = vrot.slane %v9278_v45, %v7463_v5 }
 0x326   : > { %v9280_v24 = vpop.permute.xlu1 %3278  ;;  %12569 = vst [vmem:[#allocation40_spill] sm:$0xff] %v9286_v2  ;;  %v9297_v1 = vpop.permute.xlu0 %3276  ;;  %v9314_v42 = vrot.slane %v9295_v15, %v7441_v50 }
 0x327   : > { %12568 = vst [vmem:[#allocation78_spill] sm:$0xff] %v9280_v24  ;;  %12572 = vst [vmem:[#allocation76_spill] sm:$0xff] %v9297_v1  ;;  %v12574_v24 = vld [vmem:[#allocation44_spill] sm:$0xff]  ;;  %v4294_v23 = vcombine.high %v9310_v58, %v12370_v54 }
 0x328   : > { %v9302_v17 = vsel %vm559_vm0, %v12574_v24, %v12573_v53  ;;  %5345 = vrot.lane.b32.xlu1 %v3902_v55, %s7023_s18  ;;  %5343 = vrot.lane.b32.xlu0 %v3804_v19, %s7023_s18  ;;  %12575 = vst [vmem:[#allocation36_spill] sm:$0xff] %v9310_v58  ;;  %v4000_v53 = vcombine.high %v9286_v2, %v12370_v54  ;;  %v12578_v19 = vld [vmem:[#allocation86_spill] sm:$0xff]  ;;  %v12579_v1 = vld [vmem:[#allocation56_spill] sm:$0xff] }
 0x329   : > { %v9322_v55 = vrot.slane %v9290_v30, %v7463_v5  ;;  %v9326_v24 = vrot.slane %v9302_v17, %v7441_v50  ;;  %v9331_v43 = vsel %vm559_vm0, %v12579_v1, %v12578_v19  ;;  %v9346_v48 = vrot.slane %v9314_v42, %v7463_v5 }
 0x32a   : > { %v9316_v20 = vpop.permute.xlu1 %3282  ;;  %v9333_v16 = vpop.permute.xlu0 %3280  ;;  %v9350_v1 = vrot.slane %v9331_v43, %v7441_v50 }
 0x32b   : > { %12576 = vst [vmem:[#allocation82_spill] sm:$0xff] %v9316_v20  ;;  %12577 = vst [vmem:[#allocation48_spill] sm:$0xff] %v9322_v55  ;;  %v12582_v20 = vld [vmem:[#allocation52_spill] sm:$0xff]  ;;  %v4490_v59 = vcombine.high %v9346_v48, %v12370_v54 }
 0x32c   : > { %12580 = vst [vmem:[#allocation80_spill] sm:$0xff] %v9333_v16  ;;  %v9338_v34 = vsel %vm559_vm0, %v12582_v20, %v12581_v27  ;;  %5349 = vrot.lane.b32.xlu1 %v4098_v25, %s7023_s18  ;;  %5347 = vrot.lane.b32.xlu0 %v4000_v53, %s7023_s18  ;;  %12583 = vst [vmem:[#allocation44_spill] sm:$0xff] %v9346_v48  ;;  %v4196_v27 = vcombine.high %v9322_v55, %v12370_v54  ;;  %v12586_v53 = vld [vmem:[#allocation90_spill] sm:$0xff]  ;;  %v12587_v16 = vld [vmem:[#allocation61_spill] sm:$0xff] }
 0x32d   : > { %v9358_v25 = vrot.slane %v9326_v24, %v7463_v5  ;;  %v9362_v20 = vrot.slane %v9338_v34, %v7441_v50  ;;  %v9367_v11 = vsel %vm559_vm0, %v12587_v16, %v12586_v53  ;;  %v9382_v10 = vrot.slane %v9350_v1, %v7463_v5 }
 0x32e   : > { %v9352_v19 = vpop.permute.xlu1 %3286  ;;  %v9369_v57 = vpop.permute.xlu0 %3284  ;;  %v9386_v16 = vrot.slane %v9367_v11, %v7441_v50 }
 0x32f   : > { %12584 = vst [vmem:[#allocation86_spill] sm:$0xff] %v9352_v19  ;;  %12585 = vst [vmem:[#allocation56_spill] sm:$0xff] %v9358_v25  ;;  %v12590_v19 = vld [vmem:[#allocation59_spill] sm:$0xff]  ;;  %v4686_v62 = vcombine.high %v9382_v10, %v12370_v54 }
 0x330   : > { %12588 = vst [vmem:[#allocation84_spill] sm:$0xff] %v9369_v57  ;;  %v9374_v12 = vsel %vm559_vm0, %v12590_v19, %v12589_v4  ;;  %5353 = vrot.lane.b32.xlu1 %v4294_v23, %s7023_s18  ;;  %5351 = vrot.lane.b32.xlu0 %v4196_v27, %s7023_s18  ;;  %12591 = vst [vmem:[#allocation52_spill] sm:$0xff] %v9382_v10  ;;  %v4392_v4 = vcombine.high %v9358_v25, %v12370_v54  ;;  %v12594_v27 = vld [vmem:[#allocation94_spill] sm:$0xff]  ;;  %v12595_v57 = vld [vmem:[#allocation65_spill] sm:$0xff] }
 0x331   : > { %v9394_v23 = vrot.slane %v9362_v20, %v7463_v5  ;;  %v9398_v19 = vrot.slane %v9374_v12, %v7441_v50  ;;  %v9403_v49 = vsel %vm559_vm0, %v12595_v57, %v12594_v27  ;;  %v9418_v56 = vrot.slane %v9386_v16, %v7463_v5  ;;  %v12752_v25 = vld [vmem:[#allocation95_spill] sm:$0xff] }
 0x332   : > { %v9388_v53 = vpop.permute.xlu1 %3290  ;;  %v9405_v47 = vpop.permute.xlu0 %3288  ;;  %v9422_v57 = vrot.slane %v9403_v49, %v7441_v50 }
 0x333   : > { %12592 = vst [vmem:[#allocation90_spill] sm:$0xff] %v9388_v53  ;;  %12593 = vst [vmem:[#allocation61_spill] sm:$0xff] %v9394_v23  ;;  %v12598_v53 = vld [vmem:[#allocation63_spill] sm:$0xff]  ;;  %v4882_v0 = vcombine.high %v9418_v56, %v12370_v54 }
 0x334   : > { %12596 = vst [vmem:[#allocation88_spill] sm:$0xff] %v9405_v47  ;;  %v9410_v39 = vsel %vm559_vm0, %v12598_v53, %v12597_v51  ;;  %5357 = vrot.lane.b32.xlu1 %v4490_v59, %s7023_s18  ;;  %5355 = vrot.lane.b32.xlu0 %v4392_v4, %s7023_s18  ;;  %12599 = vst [vmem:[#allocation59_spill] sm:$0xff] %v9418_v56  ;;  %v4588_v51 = vcombine.high %v9394_v23, %v12370_v54  ;;  %v12602_v4 = vld [vmem:[#allocation98_spill] sm:$0xff]  ;;  %v12603_v47 = vld [vmem:[#allocation69_spill] sm:$0xff] }
 0x335   : > { %v9430_v59 = vrot.slane %v9398_v19, %v7463_v5  ;;  %v9434_v53 = vrot.slane %v9410_v39, %v7441_v50  ;;  %v9439_v14 = vsel %vm559_vm0, %v12603_v47, %v12602_v4  ;;  %v9454_v44 = vrot.slane %v9422_v57, %v7463_v5  ;;  %v12746_v56 = vld [vmem:[#allocation91_spill] sm:$0xff] }
 0x336   : > { %v9424_v27 = vpop.permute.xlu1 %3294  ;;  %v9441_v31 = vpop.permute.xlu0 %3292  ;;  %v9458_v47 = vrot.slane %v9439_v14, %v7441_v50 }
 0x337   : > { %12600 = vst [vmem:[#allocation94_spill] sm:$0xff] %v9424_v27  ;;  %12601 = vst [vmem:[#allocation65_spill] sm:$0xff] %v9430_v59  ;;  %v12606_v27 = vld [vmem:[#allocation67_spill] sm:$0xff] }
 0x338   : > { %12604 = vst [vmem:[#allocation92_spill] sm:$0xff] %v9441_v31  ;;  %v9446_v61 = vsel %vm559_vm0, %v12606_v27, %v12605_v28  ;;  %5361 = vrot.lane.b32.xlu1 %v4686_v62, %s7023_s18  ;;  %5359 = vrot.lane.b32.xlu0 %v4588_v51, %s7023_s18  ;;  %12607 = vst [vmem:[#allocation63_spill] sm:$0xff] %v9454_v44  ;;  %v4784_v28 = vcombine.high %v9430_v59, %v12370_v54 }
 0x339   : > { %v9466_v62 = vrot.slane %v9434_v53, %v7463_v5  ;;  %v9470_v27 = vrot.slane %v9446_v61, %v7441_v50  ;;  %v9480_v31 = vrot.slane %v9458_v47, %v7463_v5 }
 0x33a   : > { %v9460_v4 = vpop.permute.xlu1 %3330  ;;  %v9472_v51 = vpop.permute.xlu0 %3328 }
 0x33b   : > { %12608 = vst [vmem:[#allocation98_spill] sm:$0xff] %v9460_v4  ;;  %12609 = vst [vmem:[#allocation69_spill] sm:$0xff] %v9466_v62  ;;  %v5078_v4 = vcombine.high %v9454_v44, %v12370_v54  ;;  %v4980_v36 = vcombine.high %v9466_v62, %v12370_v54  ;;  %v9488_v9 = vrot.slane %v9470_v27, %v7463_v5  ;;  %v12740_v62 = vld [vmem:[#allocation87_spill] sm:$0xff] }
 0x33c   : > { %12610 = vst [vmem:[#allocation96_spill] sm:$0xff] %v9472_v51  ;;  %5365 = vrot.lane.b32.xlu1 %v4882_v0, %s7023_s18  ;;  %5363 = vrot.lane.b32.xlu0 %v4784_v28, %s7023_s18  ;;  %12611 = vst [vmem:[#allocation67_spill] sm:$0xff] %v9480_v31  ;;  %v3872_v0 = vcombine.high %v9212_v63, %v12370_v54  ;;  %v5274_v28 = vcombine.high %v9480_v31, %v12370_v54 }
 0x33d   : > { %12613 = vst [vmem:[#allocation264_spill] sm:$0xff] %v9488_v9  ;;  %v5176_v38 = vcombine.high %v9488_v9, %v12370_v54  ;;  %v4068_v63 = vcombine.high %v9242_v3, %v12370_v54 }
 0x33e   : > { %v9482_v13 = vpop.permute.xlu1 %3334  ;;  %v9490_v51 = vpop.permute.xlu0 %3332 }
 0x33f   : > { %12612 = vst [vmem:[#allocation263_spill] sm:$0xff] %v9482_v13  ;;  %12614 = vst [vmem:[#allocation265_spill] sm:$0xff] %v9490_v51 }
 0x340   : > { %5369 = vrot.lane.b32.xlu1 %v5078_v4, %s7023_s18  ;;  %5367 = vrot.lane.b32.xlu0 %v4980_v36, %s7023_s18  ;;  %v9509_v36 = vrot.slane %v3872_v0, %v7463_v5  ;;  %v4264_v0 = vcombine.high %v9278_v45, %v12370_v54 }
 0x342   : > { %v9498_v13 = vpop.permute.xlu1 %3338  ;;  %v9504_v21 = vpop.permute.xlu0 %3336 }
 0x343   : > { %12615 = vst [vmem:[#allocation266_spill] sm:$0xff] %v9498_v13  ;;  %12616 = vst [vmem:[#allocation267_spill] sm:$0xff] %v9504_v21  ;;  %v3788_v13 = vrot.slane %v3774_v26, %v7463_v5  ;;  %v4166_v26 = vcombine.high %v9290_v30, %v12370_v54 }
 0x344   : > { %5373 = vrot.lane.b32.xlu1 %v5274_v28, %s7023_s18  ;;  %5371 = vrot.lane.b32.xlu0 %v5176_v38, %s7023_s18  ;;  %v4082_v38 = vrot.slane %v4068_v63, %v7463_v5  ;;  %v3984_v28 = vrot.slane %v3970_v60, %v7463_v5  ;;  %v4460_v63 = vcombine.high %v9314_v42, %v12370_v54  ;;  %s6703_s18 = sshll.u32 %s12067_s3, 4  ;;  %s12174_s18 = int_to_ptr.vmem [resolvable:$true] %s6703_s18 }
 0x345   : > { %v4180_v45 = vrot.slane %v4166_v26, %v7463_v5  ;;  %v4362_v60 = vcombine.high %v9326_v24, %v12370_v54  ;;  %v4558_v26 = vcombine.high %v9362_v20, %v12370_v54  ;;  %s6933_s9 = scalar_lea.vmem %s12174_s18, 512 }
 0x346   : > { %v9513_v4 = vpop.permute.xlu1 %3342  ;;  %v9518_v51 = vpop.permute.xlu0 %3340  ;;  %v4474_v30 = vrot.slane %v4460_v63, %v7463_v5  ;;  %v4852_v63 = vcombine.high %v9386_v16, %v12370_v54  ;;  %p6934_p8 = scmp.ne.s32.totalorder %s12174_s18, %s6933_s9 }
 0x347   : > { %12617 = vst [vmem:[#allocation268_spill] sm:$0xff] %v9513_v4  ;;  %12618 = vst [vmem:[#allocation269_spill] sm:$0xff] %v9518_v51  ;;  %v4278_v51 = vrot.slane %v4264_v0, %v7463_v5  ;;  %v4656_v0 = vcombine.high %v9350_v1, %v12370_v54  ;;  %v4376_v42 = vrot.slane %v4362_v60, %v7463_v5 }
 0x348   : > { %5409 = vrot.lane.b32.xlu1 %v9509_v36, %s7024_s27  ;;  %5407 = vrot.lane.b32.xlu0 %v3788_v13, %s7024_s27  ;;  %v4572_v1 = vrot.slane %v4558_v26, %v7463_v5  ;;  %v4754_v60 = vcombine.high %v9398_v19, %v12370_v54  ;;  %v4866_v20 = vrot.slane %v4852_v63, %v7463_v5  ;;  %p6935_p11 = pnand %p6934_p8, %p13248_p9 }
 0x349   : > { %v4670_v24 = vrot.slane %v4656_v0, %v7463_v5  ;;  %v5048_v0 = vcombine.high %v9422_v57, %v12370_v54  ;;  %v4950_v26 = vcombine.high %v9434_v53, %v12370_v54  ;;  %v5244_v63 = vcombine.high %v9458_v47, %v12370_v54 }
 0x34a   : > { %v9526_v3 = vpop.permute.xlu1 %3346  ;;  %v9531_v40 = vpop.permute.xlu0 %3344  ;;  %v4768_v16 = vrot.slane %v4754_v60, %v7463_v5  ;;  %v5146_v60 = vcombine.high %v9470_v27, %v12370_v54  ;;  %v3903_v27 = vcombine.high %v9509_v36, %v12370_v54  ;;  %p6936_p0 = pneg %p6935_p11 }
 0x34b   : > { %12619 = vst [vmem:[#allocation270_spill] sm:$0xff] %v9526_v3  ;;  %12620 = vst [vmem:[#allocation271_spill] sm:$0xff] %v9531_v40  ;;  %v5062_v19 = vrot.slane %v5048_v0, %v7463_v5  ;;  %v4964_v57 = vrot.slane %v4950_v26, %v7463_v5  ;;  %v5258_v53 = vrot.slane %v5244_v63, %v7463_v5 }
 0x34c   : > { %5413 = vrot.lane.b32.xlu1 %v4082_v38, %s7024_s27  ;;  %5411 = vrot.lane.b32.xlu0 %v3984_v28, %s7024_s27  ;;  %v5160_v0 = vrot.slane %v5146_v60, %v7463_v5  ;;  %v4099_v60 = vcombine.high %v4082_v38, %v12370_v54 }
 0x34e   : > { %v9538_v4 = vpop.permute.xlu1 %3350  ;;  %v9543_v3 = vpop.permute.xlu0 %3348 }
 0x34f   : > { %12621 = vst [vmem:[#allocation272_spill] sm:$0xff] %v9538_v4  ;;  %12622 = vst [vmem:[#allocation273_spill] sm:$0xff] %v9543_v3 }
 0x350   : > { %5417 = vrot.lane.b32.xlu1 %v4278_v51, %s7024_s27  ;;  %5415 = vrot.lane.b32.xlu0 %v4180_v45, %s7024_s27 }
 0x352   : > { %v9550_v40 = vpop.permute.xlu1 %3354  ;;  %v9555_v4 = vpop.permute.xlu0 %3352 }
 0x353   : > { %12623 = vst [vmem:[#allocation274_spill] sm:$0xff] %v9550_v40  ;;  %12624 = vst [vmem:[#allocation275_spill] sm:$0xff] %v9555_v4 }
 0x354   : > { %5421 = vrot.lane.b32.xlu1 %v4474_v30, %s7024_s27  ;;  %5419 = vrot.lane.b32.xlu0 %v4376_v42, %s7024_s27 }
 0x356   : > { %v9562_v3 = vpop.permute.xlu1 %3358  ;;  %v9567_v40 = vpop.permute.xlu0 %3356 }
 0x357   : > { %12625 = vst [vmem:[#allocation276_spill] sm:$0xff] %v9562_v3  ;;  %12626 = vst [vmem:[#allocation277_spill] sm:$0xff] %v9567_v40 }
 0x358   : > { %5425 = vrot.lane.b32.xlu1 %v4670_v24, %s7024_s27  ;;  %5423 = vrot.lane.b32.xlu0 %v4572_v1, %s7024_s27 }
 0x35a   : > { %v9574_v4 = vpop.permute.xlu1 %3394  ;;  %v9579_v3 = vpop.permute.xlu0 %3392 }
 0x35b   : > { %12627 = vst [vmem:[#allocation278_spill] sm:$0xff] %v9574_v4  ;;  %12628 = vst [vmem:[#allocation279_spill] sm:$0xff] %v9579_v3 }
 0x35c   : > { %5429 = vrot.lane.b32.xlu1 %v4866_v20, %s7024_s27  ;;  %5427 = vrot.lane.b32.xlu0 %v4768_v16, %s7024_s27 }
 0x35e   : > { %v9586_v40 = vpop.permute.xlu1 %3398  ;;  %v9591_v4 = vpop.permute.xlu0 %3396 }
 0x35f   : > { %12629 = vst [vmem:[#allocation280_spill] sm:$0xff] %v9586_v40  ;;  %12630 = vst [vmem:[#allocation281_spill] sm:$0xff] %v9591_v4  ;;  %v3805_v40 = vcombine.high %v3788_v13, %v12370_v54  ;;  %v4295_v13 = vcombine.high %v4278_v51, %v12370_v54 }
 0x360   : > { %5433 = vrot.lane.b32.xlu1 %v5062_v19, %s7024_s27  ;;  %5431 = vrot.lane.b32.xlu0 %v4964_v57, %s7024_s27 }
 0x362   : > { %v9596_v3 = vpop.permute.xlu1 %3402  ;;  %v9599_v47 = vpop.permute.xlu0 %3400 }
 0x363   : > { %12631 = vst [vmem:[#allocation282_spill] sm:$0xff] %v9596_v3  ;;  %12632 = vst [vmem:[#allocation283_spill] sm:$0xff] %v9599_v47  ;;  %v4001_v3 = vcombine.high %v3984_v28, %v12370_v54  ;;  %v4491_v28 = vcombine.high %v4474_v30, %v12370_v54 }
 0x364   : > { %5437 = vrot.lane.b32.xlu1 %v5258_v53, %s7024_s27  ;;  %5435 = vrot.lane.b32.xlu0 %v5160_v0, %s7024_s27 }
 0x366   : > { %v9603_v26 = vpop.permute.xlu1 %3406  ;;  %v9607_v4 = vpop.permute.xlu0 %3404 }
 0x367   : > { %12633 = vst [vmem:[#allocation284_spill] sm:$0xff] %v9603_v26  ;;  %12634 = vst [vmem:[#allocation285_spill] sm:$0xff] %v9607_v4 }
 0x368   : > { %5473 = vrot.lane.b32.xlu1 %v3903_v27, %s7025_s29  ;;  %5471 = vrot.lane.b32.xlu0 %v3805_v40, %s7025_s29  ;;  %v4197_v40 = vcombine.high %v4180_v45, %v12370_v54  ;;  %v4687_v45 = vcombine.high %v4670_v24, %v12370_v54  ;;  %v3857_v24 = vcombine.high %v9198_v7, %v12370_v54 }
 0x369   : > { %v4053_v7 = vcombine.high %v9224_v46, %v12370_v54 }
 0x36a   : > { %v9612_v63 = vpop.permute.xlu1 %3410  ;;  %v9615_v47 = vpop.permute.xlu0 %3408 }
 0x36b   : > { %12635 = vst [vmem:[#allocation286_spill] sm:$0xff] %v9612_v63  ;;  %12636 = vst [vmem:[#allocation287_spill] sm:$0xff] %v9615_v47 }
 0x36c   : > { %5477 = vrot.lane.b32.xlu1 %v4099_v60, %s7025_s29  ;;  %5475 = vrot.lane.b32.xlu0 %v4001_v3, %s7025_s29  ;;  %v4393_v3 = vcombine.high %v4376_v42, %v12370_v54  ;;  %v4883_v42 = vcombine.high %v4866_v20, %v12370_v54  ;;  %v4981_v20 = vcombine.high %v4964_v57, %v12370_v54 }
 0x36d   : > { %v3955_v57 = vcombine.high %v9232_v41, %v12370_v54 }
 0x36e   : > { %v9620_v36 = vpop.permute.xlu1 %3414  ;;  %v9623_v4 = vpop.permute.xlu0 %3412 }
 0x36f   : > { %12637 = vst [vmem:[#allocation288_spill] sm:$0xff] %v9620_v36  ;;  %12638 = vst [vmem:[#allocation289_spill] sm:$0xff] %v9623_v4  ;;  %v4543_v36 = vcombine.high %v9338_v34, %v12370_v54 }
 0x370   : > { %5481 = vrot.lane.b32.xlu1 %v4295_v13, %s7025_s29  ;;  %5479 = vrot.lane.b32.xlu0 %v4197_v40, %s7025_s29  ;;  %v4589_v13 = vcombine.high %v4572_v1, %v12370_v54 }
 0x372   : > { %v9628_v38 = vpop.permute.xlu1 %3418  ;;  %v9631_v27 = vpop.permute.xlu0 %3416 }
 0x373   : > { %12639 = vst [vmem:[#allocation290_spill] sm:$0xff] %v9628_v38  ;;  %12640 = vst [vmem:[#allocation291_spill] sm:$0xff] %v9631_v27 }
 0x374   : > { %5485 = vrot.lane.b32.xlu1 %v4491_v28, %s7025_s29  ;;  %5483 = vrot.lane.b32.xlu0 %v4393_v3, %s7025_s29  ;;  %v4785_v28 = vcombine.high %v4768_v16, %v12370_v54  ;;  %v5079_v3 = vcombine.high %v5062_v19, %v12370_v54  ;;  %v9665_v16 = vrot.slane %v3857_v24, %v7441_v50 }
 0x375   : > { %v5275_v19 = vcombine.high %v5258_v53, %v12370_v54  ;;  %v9687_v53 = vrot.slane %v4053_v7, %v7441_v50  ;;  %v4249_v24 = vcombine.high %v9258_v22, %v12370_v54 }
 0x376   : > { %v9636_v51 = vpop.permute.xlu1 %3422  ;;  %v9639_v60 = vpop.permute.xlu0 %3420  ;;  %v9684_v46 = vrot.slane %v9665_v16, %v7463_v5 }
 0x377   : > { %12641 = vst [vmem:[#allocation292_spill] sm:$0xff] %v9636_v51  ;;  %12642 = vst [vmem:[#allocation293_spill] sm:$0xff] %v9639_v60  ;;  %v9710_v22 = vrot.slane %v9687_v53, %v7463_v5  ;;  %v9713_v7 = vrot.slane %v4249_v24, %v7441_v50  ;;  %v4347_v51 = vcombine.high %v9302_v17, %v12370_v54 }
 0x378   : > { %5489 = vrot.lane.b32.xlu1 %v4687_v45, %s7025_s29  ;;  %5487 = vrot.lane.b32.xlu0 %v4589_v13, %s7025_s29  ;;  %v3759_v45 = vcombine.high %v9206_v18, %v12370_v54 }
 0x379   : > { %v9750_v4 = vrot.slane %v4347_v51, %v7441_v50  ;;  %v4837_v51 = vcombine.high %v9367_v11, %v12370_v54  ;;  %v4100_v8 = vcombine.high %v9710_v22, %v12370_v54 }
 0x37a   : > { %v9644_v30 = vpop.permute.xlu1 %3458  ;;  %v9647_v40 = vpop.permute.xlu0 %3456  ;;  %v9673_v18 = vrot.slane %v3759_v45, %v7441_v50 }
 0x37b   : > { %12643 = vst [vmem:[#allocation294_spill] sm:$0xff] %v9644_v30  ;;  %12644 = vst [vmem:[#allocation295_spill] sm:$0xff] %v9647_v40  ;;  %v4384_v34 = vrot.slane %v9750_v4, %v7463_v5  ;;  %v3904_v30 = vcombine.high %v9684_v46, %v12370_v54 }
 0x37c   : > { %5493 = vrot.lane.b32.xlu1 %v4883_v42, %s7025_s29  ;;  %5491 = vrot.lane.b32.xlu0 %v4785_v28, %s7025_s29  ;;  %v9695_v41 = vrot.slane %v9673_v18, %v7463_v5 }
 0x37e   : > { %v9654_v1 = vpop.permute.xlu1 %3462  ;;  %v9659_v13 = vpop.permute.xlu0 %3460  ;;  %v3806_v29 = vcombine.high %v9695_v41, %v12370_v54 }
 0x37f   : > { %12645 = vst [vmem:[#allocation296_spill] sm:$0xff] %v9654_v1  ;;  %12646 = vst [vmem:[#allocation297_spill] sm:$0xff] %v9659_v13 }
 0x380   : > { %5497 = vrot.lane.b32.xlu1 %v5079_v3, %s7025_s29  ;;  %5495 = vrot.lane.b32.xlu0 %v4981_v20, %s7025_s29  ;;  %v5177_v3 = vcombine.high %v5160_v0, %v12370_v54  ;;  %v9698_v0 = vrot.slane %v3955_v57, %v7441_v50  ;;  %v4151_v20 = vcombine.high %v9266_v33, %v12370_v54 }
 0x381   : > { %v4445_v57 = vcombine.high %v9295_v15, %v12370_v54  ;;  %v9736_v15 = vrot.slane %v9713_v7, %v7463_v5 }
 0x382   : > { %v9669_v42 = vpop.permute.xlu1 %3466  ;;  %v9677_v28 = vpop.permute.xlu0 %3464  ;;  %v9721_v33 = vrot.slane %v9698_v0, %v7463_v5  ;;  %v9724_v60 = vrot.slane %v4151_v20, %v7441_v50  ;;  %v4641_v20 = vcombine.high %v9331_v43, %v12370_v54 }
 0x383   : > { %12647 = vst [vmem:[#allocation298_spill] sm:$0xff] %v9669_v42  ;;  %12648 = vst [vmem:[#allocation299_spill] sm:$0xff] %v9677_v28  ;;  %v9739_v24 = vrot.slane %v4445_v57, %v7441_v50 }
 0x384   : > { %5501 = vrot.lane.b32.xlu1 %v5275_v19, %s7025_s29  ;;  %5499 = vrot.lane.b32.xlu0 %v5177_v3, %s7025_s29  ;;  %v9747_v17 = vrot.slane %v9724_v60, %v7463_v5  ;;  %v9765_v57 = vrot.slane %v4641_v20, %v7441_v50  ;;  %v9786_v20 = vrot.slane %v4837_v51, %v7441_v50 }
 0x385   : > { %v9762_v43 = vrot.slane %v9739_v24, %v7463_v5  ;;  %v4002_v9 = vcombine.high %v9721_v33, %v12370_v54 }
 0x386   : > { %v9691_v45 = vpop.permute.xlu1 %3470  ;;  %v9702_v19 = vpop.permute.xlu0 %3468  ;;  %v4678_v11 = vrot.slane %v9765_v57, %v7463_v5 }
 0x387   : > { %12649 = vst [vmem:[#allocation300_spill] sm:$0xff] %v9691_v45  ;;  %12650 = vst [vmem:[#allocation301_spill] sm:$0xff] %v9702_v19  ;;  %v4935_v19 = vcombine.high %v9410_v39, %v12370_v54  ;;  %v5131_v45 = vcombine.high %v9446_v61, %v12370_v54 }
 0x388   : > { %5537 = vrot.lane.b32.xlu1 %v9684_v46, %s7026_s30  ;;  %5535 = vrot.lane.b32.xlu0 %v9695_v41, %s7026_s30  ;;  %v4198_v41 = vcombine.high %v9747_v17, %v12370_v54 }
 0x389   : > { %v9833_v26 = vrot.slane %v5131_v45, %v7441_v50 }
 0x38a   : > { %v9717_v3 = vpop.permute.xlu1 %3474  ;;  %v9728_v27 = vpop.permute.xlu0 %3472 }
 0x38b   : > { %12651 = vst [vmem:[#allocation302_spill] sm:$0xff] %v9717_v3  ;;  %12652 = vst [vmem:[#allocation303_spill] sm:$0xff] %v9728_v27  ;;  %v4739_v3 = vcombine.high %v9374_v12, %v12370_v54 }
 0x38c   : > { %5541 = vrot.lane.b32.xlu1 %v9710_v22, %s7026_s30  ;;  %5539 = vrot.lane.b32.xlu0 %v9721_v33, %s7026_s30  ;;  %v4394_v33 = vcombine.high %v4384_v34, %v12370_v54 }
 0x38e   : > { %v9743_v38 = vpop.permute.xlu1 %3478  ;;  %v9754_v27 = vpop.permute.xlu0 %3476 }
 0x38f   : > { %12653 = vst [vmem:[#allocation304_spill] sm:$0xff] %v9743_v38  ;;  %12654 = vst [vmem:[#allocation305_spill] sm:$0xff] %v9754_v27  ;;  %v9774_v27 = vrot.slane %v4543_v36, %v7441_v50  ;;  %v5033_v36 = vcombine.high %v9403_v49, %v12370_v54  ;;  %v4874_v49 = vrot.slane %v9786_v20, %v7463_v5 }
 0x390   : > { %5545 = vrot.lane.b32.xlu1 %v9736_v15, %s7026_s30  ;;  %5543 = vrot.lane.b32.xlu0 %v9747_v17, %s7026_s30  ;;  %v4688_v17 = vcombine.high %v4678_v11, %v12370_v54 }
 0x391   : > { %v4580_v12 = vrot.slane %v9774_v27, %v7463_v5  ;;  %v9806_v51 = vrot.slane %v5033_v36, %v7441_v50 }
 0x392   : > { %v9769_v38 = vpop.permute.xlu1 %3482  ;;  %v9778_v47 = vpop.permute.xlu0 %3480 }
 0x393   : > { %12655 = vst [vmem:[#allocation306_spill] sm:$0xff] %v9769_v38  ;;  %12656 = vst [vmem:[#allocation307_spill] sm:$0xff] %v9778_v47  ;;  %v9795_v47 = vrot.slane %v4739_v3, %v7441_v50 }
 0x394   : > { %5549 = vrot.lane.b32.xlu1 %v9762_v43, %s7026_s30  ;;  %5547 = vrot.lane.b32.xlu0 %v4384_v34, %s7026_s30  ;;  %v4884_v34 = vcombine.high %v4874_v49, %v12370_v54 }
 0x395   : > { %v4776_v39 = vrot.slane %v9795_v47, %v7463_v5 }
 0x396   : > { %v9790_v38 = vpop.permute.xlu1 %3486  ;;  %v9799_v63 = vpop.permute.xlu0 %3484 }
 0x397   : > { %12657 = vst [vmem:[#allocation308_spill] sm:$0xff] %v9790_v38  ;;  %12658 = vst [vmem:[#allocation309_spill] sm:$0xff] %v9799_v63  ;;  %v5229_v38 = vcombine.high %v9439_v14, %v12370_v54  ;;  %v9815_v63 = vrot.slane %v4935_v19, %v7441_v50  ;;  %v5070_v14 = vrot.slane %v9806_v51, %v7463_v5 }
 0x398   : > { %5553 = vrot.lane.b32.xlu1 %v4678_v11, %s7026_s30  ;;  %5551 = vrot.lane.b32.xlu0 %v4580_v12, %s7026_s30 }
 0x399   : > { %v9826_v36 = vrot.slane %v5229_v38, %v7441_v50  ;;  %v4972_v19 = vrot.slane %v9815_v63, %v7463_v5  ;;  %v5168_v38 = vrot.slane %v9833_v26, %v7463_v5 }
 0x39a   : > { %v9810_v3 = vpop.permute.xlu1 %5345  ;;  %v9819_v28 = vpop.permute.xlu0 %5343 }
 0x39b   : > { %v5266_v13 = vrot.slane %v9826_v36, %v7463_v5 }
 0x39c   : > { %5557 = vrot.lane.b32.xlu1 %v4874_v49, %s7026_s30  ;;  %5555 = vrot.lane.b32.xlu0 %v4776_v39, %s7026_s30  ;;  %v3887_v49 = vcombine.high %v9665_v16, %v12370_v54 }
 0x39e   : > { %v9828_v42 = vpop.permute.xlu1 %5349  ;;  %v9835_v61 = vpop.permute.xlu0 %5347  ;;  %v3901_v16 = vrot.slane %v3887_v49, %v7463_v5  ;;  %v4181_v49 = vcombine.high %v9724_v60, %v12370_v54 }
 0x39f   : > { %12659 = vst [vmem:[#allocation310_spill] sm:$0xff] %v9835_v61 }
 0x3a0   : > { %5561 = vrot.lane.b32.xlu1 %v5070_v14, %s7026_s30  ;;  %5559 = vrot.lane.b32.xlu0 %v4972_v19, %s7026_s30  ;;  %v4195_v60 = vrot.slane %v4181_v49, %v7463_v5  ;;  %v4867_v49 = vcombine.high %v9786_v20, %v12370_v54 }
 0x3a2   : > { %v9841_v1 = vpop.permute.xlu1 %5353  ;;  %v9845_v40 = vpop.permute.xlu0 %5351  ;;  %v4881_v20 = vrot.slane %v4867_v49, %v7463_v5  ;;  %v5161_v49 = vcombine.high %v9833_v26, %v12370_v54 }
 0x3a3   : > { %12660 = vst [vmem:[#allocation311_spill] sm:$0xff] %v9841_v1  ;;  %12661 = vst [vmem:[#allocation312_spill] sm:$0xff] %v9845_v40 }
 0x3a4   : > { %5565 = vrot.lane.b32.xlu1 %v5266_v13, %s7026_s30  ;;  %5563 = vrot.lane.b32.xlu0 %v5168_v38, %s7026_s30 }
 0x3a6   : > { %v9849_v45 = vpop.permute.xlu1 %5357  ;;  %v9853_v21 = vpop.permute.xlu0 %5355 }
 0x3a7   : > { %12662 = vst [vmem:[#allocation313_spill] sm:$0xff] %v9849_v45  ;;  %12663 = vst [vmem:[#allocation314_spill] sm:$0xff] %v9853_v21  ;;  %v12753_v21 = vld [vmem:[#allocation66_spill] sm:$0xff] }
 0x3a8   : > { %5601 = vrot.lane.b32.xlu1 %v3904_v30, %s7027_s2  ;;  %5599 = vrot.lane.b32.xlu0 %v3806_v29, %s7027_s2  ;;  %v4296_v30 = vcombine.high %v9736_v15, %v12370_v54  ;;  %v10290_v48 = vsel %vm559_vm0, %v12753_v21, %v12752_v25 }
 0x3a9   : > { %v10306_v21 = vrot.slane %v10290_v48, %v7441_v50 }
 0x3aa   : > { %v9859_v52 = vpop.permute.xlu1 %5361  ;;  %v9863_v6 = vpop.permute.xlu0 %5359 }
 0x3ab   : > { %12664 = vst [vmem:[#allocation315_spill] sm:$0xff] %v9859_v52  ;;  %12665 = vst [vmem:[#allocation316_spill] sm:$0xff] %v9863_v6 }
 0x3ac   : > { %5605 = vrot.lane.b32.xlu1 %v4100_v8, %s7027_s2  ;;  %5603 = vrot.lane.b32.xlu0 %v4002_v9, %s7027_s2  ;;  %v4492_v8 = vcombine.high %v9762_v43, %v12370_v54 }
 0x3ae   : > { %v9869_v46 = vpop.permute.xlu1 %5365  ;;  %v9873_v29 = vpop.permute.xlu0 %5363 }
 0x3af   : > { %12666 = vst [vmem:[#allocation317_spill] sm:$0xff] %v9869_v46  ;;  %12667 = vst [vmem:[#allocation318_spill] sm:$0xff] %v9873_v29  ;;  %v12747_v46 = vld [vmem:[#allocation62_spill] sm:$0xff] }
 0x3b0   : > { %5609 = vrot.lane.b32.xlu1 %v4296_v30, %s7027_s2  ;;  %5607 = vrot.lane.b32.xlu0 %v4198_v41, %s7027_s2  ;;  %v4590_v41 = vcombine.high %v4580_v12, %v12370_v54  ;;  %v5080_v12 = vcombine.high %v5070_v14, %v12370_v54  ;;  %v5178_v14 = vcombine.high %v5168_v38, %v12370_v54 }
 0x3b1   : > { %v4279_v38 = vcombine.high %v9713_v7, %v12370_v54  ;;  %v10262_v23 = vsel %vm559_vm0, %v12747_v46, %v12746_v56  ;;  %v12749_v46 = vld [vmem:[#allocation97_spill] sm:$0xff] }
 0x3b2   : > { %v9879_v22 = vpop.permute.xlu1 %5369  ;;  %v9883_v9 = vpop.permute.xlu0 %5367  ;;  %v10278_v56 = vrot.slane %v10262_v23, %v7441_v50 }
 0x3b3   : > { %12668 = vst [vmem:[#allocation319_spill] sm:$0xff] %v9879_v22  ;;  %12669 = vst [vmem:[#allocation320_spill] sm:$0xff] %v9883_v9  ;;  %v4293_v7 = vrot.slane %v4279_v38, %v7463_v5  ;;  %v4573_v38 = vcombine.high %v9774_v27, %v12370_v54  ;;  %v12741_v9 = vld [vmem:[#allocation58_spill] sm:$0xff] }
 0x3b4   : > { %5613 = vrot.lane.b32.xlu1 %v4492_v8, %s7027_s2  ;;  %5611 = vrot.lane.b32.xlu0 %v4394_v33, %s7027_s2  ;;  %v4786_v8 = vcombine.high %v4776_v39, %v12370_v54  ;;  %v10234_v44 = vsel %vm559_vm0, %v12741_v9, %v12740_v62  ;;  %v12743_v9 = vld [vmem:[#allocation93_spill] sm:$0xff] }
 0x3b5   : > { %v4587_v27 = vrot.slane %v4573_v38, %v7463_v5  ;;  %v5259_v38 = vcombine.high %v9826_v36, %v12370_v54  ;;  %v10250_v62 = vrot.slane %v10234_v44, %v7441_v50 }
 0x3b6   : > { %v9888_v15 = vpop.permute.xlu1 %5373  ;;  %v9891_v30 = vpop.permute.xlu0 %5371 }
 0x3b7   : > { %12670 = vst [vmem:[#allocation321_spill] sm:$0xff] %v9888_v15  ;;  %12671 = vst [vmem:[#allocation322_spill] sm:$0xff] %v9891_v30 }
 0x3b8   : > { %5617 = vrot.lane.b32.xlu1 %v4688_v17, %s7027_s2  ;;  %5615 = vrot.lane.b32.xlu0 %v4590_v41, %s7027_s2  ;;  %v4982_v17 = vcombine.high %v4972_v19, %v12370_v54  ;;  %v5276_v41 = vcombine.high %v5266_v13, %v12370_v54  ;;  %v4083_v19 = vcombine.high %v9687_v53, %v12370_v54 }
 0x3b9   : > { %v3985_v13 = vcombine.high %v9698_v0, %v12370_v54 }
 0x3ba   : > { %v9896_v43 = vpop.permute.xlu1 %5409  ;;  %v9899_v31 = vpop.permute.xlu0 %5407  ;;  %v4097_v53 = vrot.slane %v4083_v19, %v7463_v5  ;;  %v4377_v19 = vcombine.high %v9750_v4, %v12370_v54 }
 0x3bb   : > { %12672 = vst [vmem:[#allocation323_spill] sm:$0xff] %v9896_v43  ;;  %12673 = vst [vmem:[#allocation324_spill] sm:$0xff] %v9899_v31  ;;  %v3999_v0 = vrot.slane %v3985_v13, %v7463_v5  ;;  %v4671_v13 = vcombine.high %v9765_v57, %v12370_v54  ;;  %v12738_v43 = vld [vmem:[#allocation60_spill] sm:$0xff] }
 0x3bc   : > { %5621 = vrot.lane.b32.xlu1 %v4884_v34, %s7027_s2  ;;  %5619 = vrot.lane.b32.xlu0 %v4786_v8, %s7027_s2  ;;  %v3789_v34 = vcombine.high %v9673_v18, %v12370_v54  ;;  %v4391_v4 = vrot.slane %v4377_v19, %v7463_v5  ;;  %v5063_v19 = vcombine.high %v9806_v51, %v12370_v54 }
 0x3bd   : > { %v4685_v57 = vrot.slane %v4671_v13, %v7463_v5  ;;  %v4965_v13 = vcombine.high %v9815_v63, %v12370_v54 }
 0x3be   : > { %v9904_v11 = vpop.permute.xlu1 %5413  ;;  %v9907_v33 = vpop.permute.xlu0 %5411  ;;  %v3803_v18 = vrot.slane %v3789_v34, %v7463_v5  ;;  %v4475_v34 = vcombine.high %v9739_v24, %v12370_v54  ;;  %v5077_v51 = vrot.slane %v5063_v19, %v7463_v5  ;;  %v3905_v19 = vcombine.high %v3901_v16, %v12370_v54 }
 0x3bf   : > { %12674 = vst [vmem:[#allocation325_spill] sm:$0xff] %v9904_v11  ;;  %12675 = vst [vmem:[#allocation326_spill] sm:$0xff] %v9907_v33  ;;  %v4979_v63 = vrot.slane %v4965_v13, %v7463_v5  ;;  %v12734_v33 = vld [vmem:[#allocation83_spill] sm:$0xff] }
 0x3c0   : > { %5625 = vrot.lane.b32.xlu1 %v5080_v12, %s7027_s2  ;;  %5623 = vrot.lane.b32.xlu0 %v4982_v17, %s7027_s2  ;;  %v4489_v24 = vrot.slane %v4475_v34, %v7463_v5  ;;  %v4769_v34 = vcombine.high %v9795_v47, %v12370_v54  ;;  %v12735_v11 = vld [vmem:[#allocation51_spill] sm:$0xff] }
 0x3c1   : > { %v10204_v31 = vsel %vm559_vm0, %v12735_v11, %v12734_v33  ;;  %v12737_v33 = vld [vmem:[#allocation89_spill] sm:$0xff] }
 0x3c2   : > { %v9914_v39 = vpop.permute.xlu1 %5417  ;;  %v9919_v8 = vpop.permute.xlu0 %5415  ;;  %v4783_v47 = vrot.slane %v4769_v34, %v7463_v5  ;;  %v10222_v11 = vrot.slane %v10204_v31, %v7441_v50  ;;  %v10227_v30 = vsel %vm559_vm0, %v12738_v43, %v12737_v33 }
 0x3c3   : > { %12676 = vst [vmem:[#allocation327_spill] sm:$0xff] %v9914_v39  ;;  %12677 = vst [vmem:[#allocation328_spill] sm:$0xff] %v9919_v8  ;;  %v10242_v22 = vrot.slane %v10227_v30, %v7441_v50 }
 0x3c4   : > { %5629 = vrot.lane.b32.xlu1 %v5276_v41, %s7027_s2  ;;  %5627 = vrot.lane.b32.xlu0 %v5178_v14, %s7027_s2  ;;  %v4614_v33 = vrot.slane %v10222_v11, %v7463_v5  ;;  %s12172_s2 = scalar_lea.hbm %s12227_s1, %s6819_s4 }
 0x3c6   : > { %v9926_v12 = vpop.permute.xlu1 %5421  ;;  %v9931_v17 = vpop.permute.xlu0 %5419 }
 0x3c7   : > { %12678 = vst [vmem:[#allocation329_spill] sm:$0xff] %v9926_v12  ;;  %12679 = vst [vmem:[#allocation330_spill] sm:$0xff] %v9931_v17  ;;  %v12732_v12 = vld [vmem:[#allocation55_spill] sm:$0xff] }
 0x3c8   : > { %5665 = vrot.lane.b32.xlu1 %v3901_v16, %s7028_s5  ;;  %5663 = vrot.lane.b32.xlu0 %v3803_v18, %s7028_s5 }
 0x3ca   : > { %v9938_v41 = vpop.permute.xlu1 %5425  ;;  %v9943_v14 = vpop.permute.xlu0 %5423 }
 0x3cb   : > { %12680 = vst [vmem:[#allocation331_spill] sm:$0xff] %v9938_v41  ;;  %12681 = vst [vmem:[#allocation332_spill] sm:$0xff] %v9943_v14 }
 0x3cc   : > { %5669 = vrot.lane.b32.xlu1 %v4097_v53, %s7028_s5  ;;  %5667 = vrot.lane.b32.xlu0 %v3999_v0, %s7028_s5 }
 0x3ce   : > { %v9950_v17 = vpop.permute.xlu1 %5429  ;;  %v9955_v41 = vpop.permute.xlu0 %5427 }
 0x3cf   : > { %12682 = vst [vmem:[#allocation333_spill] sm:$0xff] %v9950_v17  ;;  %12683 = vst [vmem:[#allocation334_spill] sm:$0xff] %v9955_v41 }
 0x3d0   : > { %5673 = vrot.lane.b32.xlu1 %v4293_v7, %s7028_s5  ;;  %5671 = vrot.lane.b32.xlu0 %v4195_v60, %s7028_s5 }
 0x3d2   : > { %v9962_v14 = vpop.permute.xlu1 %5433  ;;  %v9967_v17 = vpop.permute.xlu0 %5431 }
 0x3d3   : > { %12684 = vst [vmem:[#allocation335_spill] sm:$0xff] %v9962_v14  ;;  %12685 = vst [vmem:[#allocation336_spill] sm:$0xff] %v9967_v17 }
 0x3d4   : > { %5677 = vrot.lane.b32.xlu1 %v4489_v24, %s7028_s5  ;;  %5675 = vrot.lane.b32.xlu0 %v4391_v4, %s7028_s5 }
 0x3d6   : > { %v9974_v41 = vpop.permute.xlu1 %5437  ;;  %v9979_v14 = vpop.permute.xlu0 %5435 }
 0x3d7   : > { %12686 = vst [vmem:[#allocation337_spill] sm:$0xff] %v9974_v41  ;;  %12687 = vst [vmem:[#allocation338_spill] sm:$0xff] %v9979_v14 }
 0x3d8   : > { %5681 = vrot.lane.b32.xlu1 %v4685_v57, %s7028_s5  ;;  %5679 = vrot.lane.b32.xlu0 %v4587_v27, %s7028_s5 }
 0x3da   : > { %v9986_v17 = vpop.permute.xlu1 %5473  ;;  %v9991_v41 = vpop.permute.xlu0 %5471 }
 0x3db   : > { %12688 = vst [vmem:[#allocation339_spill] sm:$0xff] %v9986_v17  ;;  %12689 = vst [vmem:[#allocation340_spill] sm:$0xff] %v9991_v41  ;;  %v5273_v41 = vrot.slane %v5259_v38, %v7463_v5 }
 0x3dc   : > { %5685 = vrot.lane.b32.xlu1 %v4881_v20, %s7028_s5  ;;  %5683 = vrot.lane.b32.xlu0 %v4783_v47, %s7028_s5 }
 0x3de   : > { %v9998_v14 = vpop.permute.xlu1 %5477  ;;  %v10003_v17 = vpop.permute.xlu0 %5475 }
 0x3df   : > { %12690 = vst [vmem:[#allocation341_spill] sm:$0xff] %v9998_v14  ;;  %12691 = vst [vmem:[#allocation342_spill] sm:$0xff] %v10003_v17  ;;  %v5175_v14 = vrot.slane %v5161_v49, %v7463_v5  ;;  %v3807_v17 = vcombine.high %v3803_v18, %v12370_v54  ;;  %v4101_v49 = vcombine.high %v4097_v53, %v12370_v54 }
 0x3e0   : > { %5689 = vrot.lane.b32.xlu1 %v5077_v51, %s7028_s5  ;;  %5687 = vrot.lane.b32.xlu0 %v4979_v63, %s7028_s5  ;;  %v4297_v18 = vcombine.high %v4293_v7, %v12370_v54 }
 0x3e2   : > { %v10008_v34 = vpop.permute.xlu1 %5481  ;;  %v10011_v36 = vpop.permute.xlu0 %5479 }
 0x3e3   : > { %12692 = vst [vmem:[#allocation343_spill] sm:$0xff] %v10008_v34  ;;  %12693 = vst [vmem:[#allocation344_spill] sm:$0xff] %v10011_v36  ;;  %v4003_v34 = vcombine.high %v3999_v0, %v12370_v54  ;;  %v4493_v0 = vcombine.high %v4489_v24, %v12370_v54 }
 0x3e4   : > { %5693 = vrot.lane.b32.xlu1 %v5273_v41, %s7028_s5  ;;  %5691 = vrot.lane.b32.xlu0 %v5175_v14, %s7028_s5  ;;  %s6686_s5 = scalar_lea.sflag [#allocation4], %s7162_s26 }
 0x3e6   : > { %v10016_v26 = vpop.permute.xlu1 %5485  ;;  %v10019_v13 = vpop.permute.xlu0 %5483 }
 0x3e7   : > { %12694 = vst [vmem:[#allocation345_spill] sm:$0xff] %v10016_v26  ;;  %12695 = vst [vmem:[#allocation346_spill] sm:$0xff] %v10019_v13 }
 0x3e8   : > { %5729 = vrot.lane.b32.xlu1 %v3905_v19, %s7029_s12  ;;  %5727 = vrot.lane.b32.xlu0 %v3807_v17, %s7029_s12  ;;  %v4199_v17 = vcombine.high %v4195_v60, %v12370_v54  ;;  %v4689_v60 = vcombine.high %v4685_v57, %v12370_v54 }
 0x3ea   : > { %v10024_v38 = vpop.permute.xlu1 %5489  ;;  %v10027_v36 = vpop.permute.xlu0 %5487 }
 0x3eb   : > { %12696 = vst [vmem:[#allocation347_spill] sm:$0xff] %v10024_v38  ;;  %12697 = vst [vmem:[#allocation348_spill] sm:$0xff] %v10027_v36  ;;  %v12728_v38 = vld [vmem:[#allocation79_spill] sm:$0xff] }
 0x3ec   : > { %5733 = vrot.lane.b32.xlu1 %v4101_v49, %s7029_s12  ;;  %5731 = vrot.lane.b32.xlu0 %v4003_v34, %s7029_s12  ;;  %v4395_v34 = vcombine.high %v4391_v4, %v12370_v54  ;;  %v4885_v4 = vcombine.high %v4881_v20, %v12370_v54  ;;  %v4983_v20 = vcombine.high %v4979_v63, %v12370_v54 }
 0x3ee   : > { %v10032_v16 = vpop.permute.xlu1 %5493  ;;  %v10035_v13 = vpop.permute.xlu0 %5491 }
 0x3ef   : > { %12698 = vst [vmem:[#allocation349_spill] sm:$0xff] %v10032_v16  ;;  %12699 = vst [vmem:[#allocation350_spill] sm:$0xff] %v10035_v13  ;;  %v12726_v16 = vld [vmem:[#allocation47_spill] sm:$0xff] }
 0x3f0   : > { %5737 = vrot.lane.b32.xlu1 %v4297_v18, %s7029_s12  ;;  %5735 = vrot.lane.b32.xlu0 %v4199_v17, %s7029_s12  ;;  %v4591_v18 = vcombine.high %v4587_v27, %v12370_v54  ;;  %v5081_v27 = vcombine.high %v5077_v51, %v12370_v54 }
 0x3f2   : > { %v10040_v53 = vpop.permute.xlu1 %5497  ;;  %v10043_v19 = vpop.permute.xlu0 %5495 }
 0x3f3   : > { %12700 = vst [vmem:[#allocation351_spill] sm:$0xff] %v10040_v53  ;;  %12701 = vst [vmem:[#allocation352_spill] sm:$0xff] %v10043_v19  ;;  %v12711_v19 = vld [vmem:[#allocation24_spill] sm:$0xff]  ;;  %v12723_v53 = vld [vmem:[#allocation35_spill] sm:$0xff] }
 0x3f4   : > { %5741 = vrot.lane.b32.xlu1 %v4493_v0, %s7029_s12  ;;  %5739 = vrot.lane.b32.xlu0 %v4395_v34, %s7029_s12  ;;  %v4787_v0 = vcombine.high %v4783_v47, %v12370_v54  ;;  %v12707_v34 = vld [vmem:[#allocation71_spill] sm:$0xff] }
 0x3f6   : > { %v10048_v7 = vpop.permute.xlu1 %5501  ;;  %v10051_v49 = vpop.permute.xlu0 %5499 }
 0x3f7   : > { %12702 = vst [vmem:[#allocation353_spill] sm:$0xff] %v10048_v7  ;;  %12703 = vst [vmem:[#allocation354_spill] sm:$0xff] %v10051_v49  ;;  %v12729_v7 = vld [vmem:[#allocation43_spill] sm:$0xff] }
 0x3f8   : > { %5745 = vrot.lane.b32.xlu1 %v4689_v60, %s7029_s12  ;;  %5743 = vrot.lane.b32.xlu0 %v4591_v18, %s7029_s12  ;;  %v12708_v60 = vld [vmem:[#allocation26_spill] sm:$0xff]  ;;  %v10170_v26 = vsel %vm559_vm0, %v12729_v7, %v12728_v38 }
 0x3f9   : > { %v10070_v18 = vsel %vm559_vm0, %v12708_v60, %v12707_v34  ;;  %v12713_v34 = vld [vmem:[#allocation74_spill] sm:$0xff]  ;;  %v12714_v60 = vld [vmem:[#allocation32_spill] sm:$0xff]  ;;  %v10192_v7 = vrot.slane %v10170_v26, %v7441_v50 }
 0x3fa   : > { %v10056_v24 = vpop.permute.xlu1 %5537  ;;  %v10059_v17 = vpop.permute.xlu0 %5535  ;;  %v10084_v51 = vrot.slane %v10070_v18, %v7441_v50 }
 0x3fb   : > { %12704 = vst [vmem:[#allocation355_spill] sm:$0xff] %v10056_v24  ;;  %12705 = vst [vmem:[#allocation356_spill] sm:$0xff] %v10059_v17  ;;  %v12710_v17 = vld [vmem:[#allocation70_spill] sm:$0xff] }
 0x3fc   : > { %5749 = vrot.lane.b32.xlu1 %v4885_v4, %s7029_s12  ;;  %5747 = vrot.lane.b32.xlu0 %v4787_v0, %s7029_s12  ;;  %v10078_v47 = vsel %vm559_vm0, %v12711_v19, %v12710_v17  ;;  %v5277_v0 = vcombine.high %v5273_v41, %v12370_v54  ;;  %v10096_v19 = vsel %vm559_vm0, %v12714_v60, %v12713_v34 }
 0x3fd   : > { %v10091_v63 = vrot.slane %v10078_v47, %v7441_v50  ;;  %v10110_v41 = vrot.slane %v10084_v51, %v7463_v5  ;;  %v10114_v34 = vrot.slane %v10096_v19, %v7441_v50 }
 0x3fe   : > { %v10064_v57 = vpop.permute.xlu1 %5541  ;;  %v10072_v24 = vpop.permute.xlu0 %5539 }
 0x3ff   : > { %12706 = vst [vmem:[#allocation357_spill] sm:$0xff] %v10064_v57  ;;  %12709 = vst [vmem:[#allocation71_spill] sm:$0xff] %v10072_v24  ;;  %v12717_v24 = vld [vmem:[#allocation28_spill] sm:$0xff] }
 0x400   : > { %5753 = vrot.lane.b32.xlu1 %v5081_v27, %s7029_s12  ;;  %5751 = vrot.lane.b32.xlu0 %v4983_v20, %s7029_s12  ;;  %v5179_v27 = vcombine.high %v5175_v14, %v12370_v54  ;;  %v12716_v20 = vld [vmem:[#allocation72_spill] sm:$0xff]  ;;  %v10120_v14 = vrot.slane %v10091_v63, %v7463_v5 }
 0x401   : > { %v10104_v57 = vsel %vm559_vm0, %v12717_v24, %v12716_v20 }
 0x402   : > { %v10086_v4 = vpop.permute.xlu1 %5545  ;;  %v10098_v17 = vpop.permute.xlu0 %5543  ;;  %v10124_v24 = vrot.slane %v10104_v57, %v7441_v50  ;;  %v3853_v1 = vcombine.high %v10120_v14, %v12370_v54 }
 0x403   : > { %12712 = vst [vmem:[#allocation26_spill] sm:$0xff] %v10086_v4  ;;  %12715 = vst [vmem:[#allocation70_spill] sm:$0xff] %v10098_v17  ;;  %v12722_v4 = vld [vmem:[#allocation75_spill] sm:$0xff] }
 0x404   : > { %5757 = vrot.lane.b32.xlu1 %v5277_v0, %s7029_s12  ;;  %5755 = vrot.lane.b32.xlu0 %v5179_v27, %s7029_s12  ;;  %v12719_v0 = vld [vmem:[#allocation77_spill] sm:$0xff]  ;;  %v12720_v27 = vld [vmem:[#allocation39_spill] sm:$0xff]  ;;  %v10136_v13 = vsel %vm559_vm0, %v12723_v53, %v12722_v4  ;;  %v10154_v53 = vrot.slane %v10124_v24, %v7463_v5  ;;  %s7038_s12 = smov [#allocation5]  }
 0x405   : > { %v10129_v20 = vsel %vm559_vm0, %v12720_v27, %v12719_v0  ;;  %v10158_v4 = vrot.slane %v10136_v13, %v7441_v50 }
 0x406   : > { %v10116_v60 = vpop.permute.xlu1 %5549  ;;  %v10131_v17 = vpop.permute.xlu0 %5547  ;;  %v10148_v0 = vrot.slane %v10129_v20, %v7441_v50  ;;  %v4049_v61 = vcombine.high %v10154_v53, %v12370_v54 }
 0x407   : > { %12718 = vst [vmem:[#allocation24_spill] sm:$0xff] %v10116_v60  ;;  %12721 = vst [vmem:[#allocation74_spill] sm:$0xff] %v10131_v17  ;;  %v10144_v60 = vrot.slane %v10114_v34, %v7463_v5  ;;  %v12725_v17 = vld [vmem:[#allocation81_spill] sm:$0xff]  ;;  %v10188_v38 = vrot.slane %v10158_v4, %v7463_v5 }
 0x408   : > { %5793 = vrot.lane.b32.xlu1 %v10110_v41, %s7030_s13  ;;  %5791 = vrot.lane.b32.xlu0 %v10120_v14, %s7030_s13  ;;  %v10163_v36 = vsel %vm559_vm0, %v12726_v16, %v12725_v17 }
 0x409   : > { %v10182_v16 = vrot.slane %v10163_v36, %v7441_v50 }
 0x40a   : > { %v10150_v27 = vpop.permute.xlu1 %5553  ;;  %v10165_v49 = vpop.permute.xlu0 %5551 }
 0x40b   : > { %12724 = vst [vmem:[#allocation32_spill] sm:$0xff] %v10150_v27  ;;  %12727 = vst [vmem:[#allocation72_spill] sm:$0xff] %v10165_v49  ;;  %v10178_v27 = vrot.slane %v10148_v0, %v7463_v5  ;;  %v12731_v49 = vld [vmem:[#allocation85_spill] sm:$0xff] }
 0x40c   : > { %5797 = vrot.lane.b32.xlu1 %v10144_v60, %s7030_s13  ;;  %5795 = vrot.lane.b32.xlu0 %v10154_v53, %s7030_s13  ;;  %v10197_v8 = vsel %vm559_vm0, %v12732_v12, %v12731_v49 }
 0x40d   : > { %v10214_v12 = vrot.slane %v10197_v8, %v7441_v50  ;;  %v4343_v14 = vcombine.high %v10178_v27, %v12370_v54 }
 0x40e   : > { %v10184_v17 = vpop.permute.xlu1 %5557  ;;  %v10199_v39 = vpop.permute.xlu0 %5555 }
 0x40f   : > { %12730 = vst [vmem:[#allocation28_spill] sm:$0xff] %v10184_v17  ;;  %12733 = vst [vmem:[#allocation77_spill] sm:$0xff] %v10199_v39  ;;  %v4516_v17 = vrot.slane %v10182_v16, %v7463_v5  ;;  %v4418_v39 = vrot.slane %v10192_v7, %v7463_v5 }
 0x410   : > { %5801 = vrot.lane.b32.xlu1 %v10178_v27, %s7030_s13  ;;  %5799 = vrot.lane.b32.xlu0 %v10188_v38, %s7030_s13 }
 0x411   : > { %v4539_v53 = vcombine.high %v4516_v17, %v12370_v54 }
 0x412   : > { %v10216_v49 = vpop.permute.xlu1 %5561  ;;  %v10229_v15 = vpop.permute.xlu0 %5559 }
 0x413   : > { %12736 = vst [vmem:[#allocation39_spill] sm:$0xff] %v10216_v49  ;;  %12739 = vst [vmem:[#allocation75_spill] sm:$0xff] %v10229_v15  ;;  %v4712_v49 = vrot.slane %v10214_v12, %v7463_v5  ;;  %v12744_v15 = vld [vmem:[#allocation64_spill] sm:$0xff] }
 0x414   : > { %5805 = vrot.lane.b32.xlu1 %v4516_v17, %s7030_s13  ;;  %5803 = vrot.lane.b32.xlu0 %v4418_v39, %s7030_s13  ;;  %v10255_v59 = vsel %vm559_vm0, %v12744_v15, %v12743_v9  ;;  %v4810_v9 = vrot.slane %v10250_v62, %v7463_v5 }
 0x415   : > { %v10270_v6 = vrot.slane %v10255_v59, %v7441_v50  ;;  %v4735_v27 = vcombine.high %v4712_v49, %v12370_v54 }
 0x416   : > { %v10244_v43 = vpop.permute.xlu1 %5565  ;;  %v10257_v29 = vpop.permute.xlu0 %5563 }
 0x417   : > { %12742 = vst [vmem:[#allocation35_spill] sm:$0xff] %v10244_v43  ;;  %12745 = vst [vmem:[#allocation81_spill] sm:$0xff] %v10257_v29  ;;  %v4908_v43 = vrot.slane %v10242_v22, %v7463_v5  ;;  %v12750_v29 = vld [vmem:[#allocation68_spill] sm:$0xff] }
 0x418   : > { %5809 = vrot.lane.b32.xlu1 %v4712_v49, %s7030_s13  ;;  %5807 = vrot.lane.b32.xlu0 %v4614_v33, %s7030_s13  ;;  %v10283_v10 = vsel %vm559_vm0, %v12750_v29, %v12749_v46  ;;  %v5006_v46 = vrot.slane %v10278_v56, %v7463_v5  ;;  %vm6575_vm0 = vcmask 1040384  }
 0x419   : > { %v10298_v45 = vrot.slane %v10283_v10, %v7441_v50 }
 0x41a   : > { %v10272_v15 = vpop.permute.xlu1 %5601  ;;  %v10285_v52 = vpop.permute.xlu0 %5599 }
 0x41b   : > { %12748 = vst [vmem:[#allocation47_spill] sm:$0xff] %v10272_v15  ;;  %12751 = vst [vmem:[#allocation79_spill] sm:$0xff] %v10285_v52  ;;  %v5104_v15 = vrot.slane %v10270_v6, %v7463_v5  ;;  %v5300_v52 = vrot.slane %v10298_v45, %v7463_v5 }
 0x41c   : > { %5813 = vrot.lane.b32.xlu1 %v4908_v43, %s7030_s13  ;;  %5811 = vrot.lane.b32.xlu0 %v4810_v9, %s7030_s13 }
 0x41d   : > { %v5127_v49 = vcombine.high %v5104_v15, %v12370_v54 }
 0x41e   : > { %v10300_v29 = vpop.permute.xlu1 %5605  ;;  %v10308_v25 = vpop.permute.xlu0 %5603 }
 0x41f   : > { %12754 = vst [vmem:[#allocation43_spill] sm:$0xff] %v10300_v29  ;;  %12755 = vst [vmem:[#allocation85_spill] sm:$0xff] %v10308_v25  ;;  %v5202_v29 = vrot.slane %v10306_v21, %v7463_v5  ;;  %v3951_v25 = vcombine.high %v10110_v41, %v12370_v54 }
 0x420   : > { %5817 = vrot.lane.b32.xlu1 %v5104_v15, %s7030_s13  ;;  %5815 = vrot.lane.b32.xlu0 %v5006_v46, %s7030_s13  ;;  %v3823_v15 = vcombine.high %v10091_v63, %v12370_v54  ;;  %v4019_v63 = vcombine.high %v10124_v24, %v12370_v54 }
 0x422   : > { %v10314_v55 = vpop.permute.xlu1 %5609  ;;  %v10318_v40 = vpop.permute.xlu0 %5607 }
 0x423   : > { %12756 = vst [vmem:[#allocation55_spill] sm:$0xff] %v10314_v55  ;;  %12757 = vst [vmem:[#allocation83_spill] sm:$0xff] %v10318_v40  ;;  %v4147_v40 = vcombine.high %v10144_v60, %v12370_v54 }
 0x424   : > { %5821 = vrot.lane.b32.xlu1 %v5300_v52, %s7030_s13  ;;  %5819 = vrot.lane.b32.xlu0 %v5202_v29, %s7030_s13  ;;  %s6937_s13 = sshll.u32 %s7038_s12, 4  ;;  %s6938_s13 = int_to_ptr.vmem [resolvable:$false] %s6937_s13 }
 0x425   : > { %p6940_p6 = scmp.lt.s32.totalorder %s12174_s18, %s6938_s13 }
 0x426   : > { %v10324_v58 = vpop.permute.xlu1 %5613  ;;  %v10328_v2 = vpop.permute.xlu0 %5611 }
 0x427   : > { %12758 = vst [vmem:[#allocation51_spill] sm:$0xff] %v10324_v58  ;;  %12759 = vst [vmem:[#allocation89_spill] sm:$0xff] %v10328_v2 }
 0x428   : > { %5857 = vrot.lane.b32.xlu1 %v3951_v25, %s7031_s15  ;;  %5855 = vrot.lane.b32.xlu0 %v3853_v1, %s7031_s15  ;;  %v4245_v1 = vcombine.high %v10188_v38, %v12370_v54 }
 0x42a   : > { %v10334_v55 = vpop.permute.xlu1 %5617  ;;  %v10338_v41 = vpop.permute.xlu0 %5615 }
 0x42b   : > { %12760 = vst [vmem:[#allocation60_spill] sm:$0xff] %v10334_v55  ;;  %12761 = vst [vmem:[#allocation87_spill] sm:$0xff] %v10338_v41 }
 0x42c   : > { %5861 = vrot.lane.b32.xlu1 %v4147_v40, %s7031_s15  ;;  %5859 = vrot.lane.b32.xlu0 %v4049_v61, %s7031_s15  ;;  %v4441_v40 = vcombine.high %v4418_v39, %v12370_v54  ;;  %v4931_v39 = vcombine.high %v4908_v43, %v12370_v54  ;;  %v3921_v43 = vcombine.high %v10084_v51, %v12370_v54 }
 0x42d   : > { %v4117_v51 = vcombine.high %v10114_v34, %v12370_v54 }
 0x42e   : > { %v10344_v25 = vpop.permute.xlu1 %5621  ;;  %v10348_v60 = vpop.permute.xlu0 %5619 }
 0x42f   : > { %12762 = vst [vmem:[#allocation58_spill] sm:$0xff] %v10344_v25  ;;  %12763 = vst [vmem:[#allocation93_spill] sm:$0xff] %v10348_v60 }
 0x430   : > { %5865 = vrot.lane.b32.xlu1 %v4343_v14, %s7031_s15  ;;  %5863 = vrot.lane.b32.xlu0 %v4245_v1, %s7031_s15  ;;  %v4637_v14 = vcombine.high %v4614_v33, %v12370_v54  ;;  %v4833_v1 = vcombine.high %v4810_v9, %v12370_v54  ;;  %v5323_v9 = vcombine.high %v5300_v52, %v12370_v54 }
 0x432   : > { %v10353_v41 = vpop.permute.xlu1 %5625  ;;  %v10356_v61 = vpop.permute.xlu0 %5623 }
 0x433   : > { %12764 = vst [vmem:[#allocation64_spill] sm:$0xff] %v10353_v41  ;;  %12765 = vst [vmem:[#allocation91_spill] sm:$0xff] %v10356_v61 }
 0x434   : > { %5869 = vrot.lane.b32.xlu1 %v4539_v53, %s7031_s15  ;;  %5867 = vrot.lane.b32.xlu0 %v4441_v40, %s7031_s15  ;;  %v5029_v40 = vcombine.high %v5006_v46, %v12370_v54  ;;  %v10397_v46 = vrot.slane %v3921_v43, %v7463_v5  ;;  %v4313_v43 = vcombine.high %v10148_v0, %v12370_v54 }
 0x436   : > { %v10361_v38 = vpop.permute.xlu1 %5629  ;;  %v10364_v60 = vpop.permute.xlu0 %5627 }
 0x438   : > { %5873 = vrot.lane.b32.xlu1 %v4735_v27, %s7031_s15  ;;  %5871 = vrot.lane.b32.xlu0 %v4637_v14, %s7031_s15 }
 0x43a   : > { %v10369_v17 = vpop.permute.xlu1 %5665  ;;  %v10372_v53 = vpop.permute.xlu0 %5663 }
 0x43c   : > { %5877 = vrot.lane.b32.xlu1 %v4931_v39, %s7031_s15  ;;  %5875 = vrot.lane.b32.xlu0 %v4833_v1, %s7031_s15  ;;  %v5225_v39 = vcombine.high %v5202_v29, %v12370_v54 }
 0x43e   : > { %v10377_v33 = vpop.permute.xlu1 %5669  ;;  %v10380_v27 = vpop.permute.xlu0 %5667 }
 0x43f   : > { %12766 = vst [vmem:[#allocation62_spill] sm:$0xff] %v10380_v27 }
 0x440   : > { %5881 = vrot.lane.b32.xlu1 %v5127_v49, %s7031_s15  ;;  %5879 = vrot.lane.b32.xlu0 %v5029_v40, %s7031_s15  ;;  %v3837_v49 = vrot.slane %v3823_v15, %v7463_v5  ;;  %v4131_v40 = vrot.slane %v4117_v51, %v7463_v5  ;;  %v4215_v15 = vcombine.high %v10158_v4, %v12370_v54 }
 0x441   : > { %v4509_v51 = vcombine.high %v10182_v16, %v12370_v54 }
 0x442   : > { %v10387_v14 = vpop.permute.xlu1 %5673  ;;  %v10392_v1 = vpop.permute.xlu0 %5671  ;;  %v4229_v0 = vrot.slane %v4215_v15, %v7463_v5  ;;  %v4607_v15 = vcombine.high %v10222_v11, %v12370_v54  ;;  %v3854_v2 = vcombine.high %v3837_v49, %v12370_v54 }
 0x443   : > { %12767 = vst [vmem:[#allocation97_spill] sm:$0xff] %v10387_v14  ;;  %12768 = vst [vmem:[#allocation68_spill] sm:$0xff] %v10392_v1  ;;  %v4523_v4 = vrot.slane %v4509_v51, %v7463_v5  ;;  %v4901_v51 = vcombine.high %v10242_v22, %v12370_v54 }
 0x444   : > { %5885 = vrot.lane.b32.xlu1 %v5323_v9, %s7031_s15  ;;  %5883 = vrot.lane.b32.xlu0 %v5225_v39, %s7031_s15  ;;  %v4033_v9 = vrot.slane %v4019_v63, %v7463_v5  ;;  %v4327_v39 = vrot.slane %v4313_v43, %v7463_v5  ;;  %v4411_v63 = vcombine.high %v10192_v7, %v12370_v54  ;;  %s6939_s15 = scalar_lea.vmem %s6938_s13, 1024 }
 0x445   : > { %v4705_v43 = vcombine.high %v10214_v12, %v12370_v54  ;;  %v4621_v12 = vrot.slane %v4607_v15, %v7463_v5  ;;  %v4915_v11 = vrot.slane %v4901_v51, %v7463_v5  ;;  %v4999_v15 = vcombine.high %v10278_v56, %v12370_v54  ;;  %p6941_p13 = scmp.lt.s32.totalorder %s6939_s15, %s6933_s9 }
 0x446   : > { %v10401_v52 = vpop.permute.xlu1 %5677  ;;  %v10406_v29 = vpop.permute.xlu0 %5675  ;;  %v4425_v16 = vrot.slane %v4411_v63, %v7463_v5  ;;  %v4803_v63 = vcombine.high %v10250_v62, %v12370_v54  ;;  %v5293_v51 = vcombine.high %v10298_v45, %v12370_v54 }
 0x447   : > { %12769 = vst [vmem:[#allocation95_spill] sm:$0xff] %v10401_v52  ;;  %12770 = vst [vmem:[#allocation66_spill] sm:$0xff] %v10406_v29  ;;  %v4719_v7 = vrot.slane %v4705_v43, %v7463_v5  ;;  %v5097_v43 = vcombine.high %v10270_v6, %v12370_v54  ;;  %v5013_v6 = vrot.slane %v4999_v15, %v7463_v5  ;;  %p6942_p2 = por %p6941_p13, %p6940_p6 }
 0x448   : > { %5921 = vrot.lane.b32.xlu1 %v10397_v46, %s7032_s16  ;;  %5919 = vrot.lane.b32.xlu0 %v3837_v49, %s7032_s16  ;;  %v4817_v22 = vrot.slane %v4803_v63, %v7463_v5  ;;  %v5195_v63 = vcombine.high %v10306_v21, %v12370_v54  ;;  %v5307_v56 = vrot.slane %v5293_v51, %v7463_v5 }
 0x449   : > { %v5111_v62 = vrot.slane %v5097_v43, %v7463_v5  ;;  %v3952_v21 = vcombine.high %v10397_v46, %v12370_v54  ;;  %v4344_v49 = vcombine.high %v4327_v39, %v12370_v54  ;;  %p6943_p5 = pnand %p6942_p2, %p6936_p0 }
 0x44a   : > { %v10414_v34 = vpop.permute.xlu1 %5681  ;;  %v10419_v24 = vpop.permute.xlu0 %5679  ;;  %v5209_v43 = vrot.slane %v5195_v63, %v7463_v5  ;;  %v4148_v63 = vcombine.high %v4131_v40, %v12370_v54 }
 0x44b   : > { %12771 = vst [vmem:[#allocation358_spill] sm:$0xff] %v10414_v34  ;;  %12772 = vst [vmem:[#allocation359_spill] sm:$0xff] %v10419_v24 }
 0x44c   : > { %5925 = vrot.lane.b32.xlu1 %v4131_v40, %s7032_s16  ;;  %5923 = vrot.lane.b32.xlu0 %v4033_v9, %s7032_s16 }
 0x44e   : > { %v10426_v61 = vpop.permute.xlu1 %5685  ;;  %v10431_v41 = vpop.permute.xlu0 %5683 }
 0x44f   : > { %12773 = vst [vmem:[#allocation360_spill] sm:$0xff] %v10426_v61  ;;  %12774 = vst [vmem:[#allocation361_spill] sm:$0xff] %v10431_v41 }
 0x450   : > { %5929 = vrot.lane.b32.xlu1 %v4327_v39, %s7032_s16  ;;  %5927 = vrot.lane.b32.xlu0 %v4229_v0, %s7032_s16 }
 0x452   : > { %v10438_v25 = vpop.permute.xlu1 %5689  ;;  %v10443_v61 = vpop.permute.xlu0 %5687 }
 0x453   : > { %12775 = vst [vmem:[#allocation362_spill] sm:$0xff] %v10438_v25  ;;  %12776 = vst [vmem:[#allocation363_spill] sm:$0xff] %v10443_v61 }
 0x454   : > { %5933 = vrot.lane.b32.xlu1 %v4523_v4, %s7032_s16  ;;  %5931 = vrot.lane.b32.xlu0 %v4425_v16, %s7032_s16 }
 0x456   : > { %v10450_v41 = vpop.permute.xlu1 %5693  ;;  %v10455_v25 = vpop.permute.xlu0 %5691 }
 0x458   : > { %5937 = vrot.lane.b32.xlu1 %v4719_v7, %s7032_s16  ;;  %5935 = vrot.lane.b32.xlu0 %v4621_v12, %s7032_s16 }
 0x45a   : > { %v10462_v61 = vpop.permute.xlu1 %5729  ;;  %v10467_v24 = vpop.permute.xlu0 %5727 }
 0x45c   : > { %5941 = vrot.lane.b32.xlu1 %v4915_v11, %s7032_s16  ;;  %5939 = vrot.lane.b32.xlu0 %v4817_v22, %s7032_s16 }
 0x45e   : > { %v10474_v34 = vpop.permute.xlu1 %5733  ;;  %v10479_v55 = vpop.permute.xlu0 %5731 }
 0x45f   : > { %12777 = vst [vmem:[#allocation364_spill] sm:$0xff] %v10474_v34  ;;  %12778 = vst [vmem:[#allocation365_spill] sm:$0xff] %v10479_v55 }
 0x460   : > { %5945 = vrot.lane.b32.xlu1 %v5111_v62, %s7032_s16  ;;  %5943 = vrot.lane.b32.xlu0 %v5013_v6, %s7032_s16 }
 0x462   : > { %v10484_v29 = vpop.permute.xlu1 %5737  ;;  %v10487_v45 = vpop.permute.xlu0 %5735 }
 0x463   : > { %12779 = vst [vmem:[#allocation366_spill] sm:$0xff] %v10484_v29  ;;  %12780 = vst [vmem:[#allocation367_spill] sm:$0xff] %v10487_v45  ;;  %v4050_v45 = vcombine.high %v4033_v9, %v12370_v54  ;;  %v4540_v9 = vcombine.high %v4523_v4, %v12370_v54  ;;  %v5180_v29 = vcombine.high %v10290_v48, %v12370_v54 }
 0x464   : > { %5949 = vrot.lane.b32.xlu1 %v5307_v56, %s7032_s16  ;;  %5947 = vrot.lane.b32.xlu0 %v5209_v43, %s7032_s16 }
 0x465   : > { %v10723_v48 = vrot.slane %v5180_v29, %v7441_v50 }
 0x466   : > { %v10491_v15 = vpop.permute.xlu1 %5741  ;;  %v10495_v52 = vpop.permute.xlu0 %5739 }
 0x467   : > { %12781 = vst [vmem:[#allocation368_spill] sm:$0xff] %v10491_v15  ;;  %12782 = vst [vmem:[#allocation369_spill] sm:$0xff] %v10495_v52 }
 0x468   : > { %5985 = vrot.lane.b32.xlu1 %v3952_v21, %s7033_s17  ;;  %5983 = vrot.lane.b32.xlu0 %v3854_v2, %s7033_s17  ;;  %v4246_v2 = vcombine.high %v4229_v0, %v12370_v54  ;;  %v4736_v0 = vcombine.high %v4719_v7, %v12370_v54  ;;  %v3906_v7 = vcombine.high %v10070_v18, %v12370_v54 }
 0x469   : > { %v4102_v18 = vcombine.high %v10096_v19, %v12370_v54 }
 0x46a   : > { %v10500_v51 = vpop.permute.xlu1 %5745  ;;  %v10503_v58 = vpop.permute.xlu0 %5743 }
 0x46b   : > { %12783 = vst [vmem:[#allocation370_spill] sm:$0xff] %v10500_v51  ;;  %12784 = vst [vmem:[#allocation371_spill] sm:$0xff] %v10503_v58  ;;  %v4788_v51 = vcombine.high %v10234_v44, %v12370_v54 }
 0x46c   : > { %5989 = vrot.lane.b32.xlu1 %v4148_v63, %s7033_s17  ;;  %5987 = vrot.lane.b32.xlu0 %v4050_v45, %s7033_s17  ;;  %v4442_v45 = vcombine.high %v4425_v16, %v12370_v54  ;;  %v4932_v16 = vcombine.high %v4915_v11, %v12370_v54  ;;  %v5030_v11 = vcombine.high %v5013_v6, %v12370_v54 }
 0x46d   : > { %v4004_v6 = vcombine.high %v10104_v57, %v12370_v54 }
 0x46e   : > { %v10508_v46 = vpop.permute.xlu1 %5749  ;;  %v10511_v52 = vpop.permute.xlu0 %5747 }
 0x46f   : > { %12785 = vst [vmem:[#allocation372_spill] sm:$0xff] %v10508_v46  ;;  %12786 = vst [vmem:[#allocation373_spill] sm:$0xff] %v10511_v52 }
 0x470   : > { %5993 = vrot.lane.b32.xlu1 %v4344_v49, %s7033_s17  ;;  %5991 = vrot.lane.b32.xlu0 %v4246_v2, %s7033_s17  ;;  %v4638_v49 = vcombine.high %v4621_v12, %v12370_v54 }
 0x472   : > { %v10516_v40 = vpop.permute.xlu1 %5753  ;;  %v10519_v21 = vpop.permute.xlu0 %5751 }
 0x473   : > { %12787 = vst [vmem:[#allocation374_spill] sm:$0xff] %v10516_v40  ;;  %12788 = vst [vmem:[#allocation375_spill] sm:$0xff] %v10519_v21  ;;  %v4396_v40 = vcombine.high %v10170_v26, %v12370_v54 }
 0x474   : > { %5997 = vrot.lane.b32.xlu1 %v4540_v9, %s7033_s17  ;;  %5995 = vrot.lane.b32.xlu0 %v4442_v45, %s7033_s17  ;;  %v4834_v9 = vcombine.high %v4817_v22, %v12370_v54  ;;  %v5128_v45 = vcombine.high %v5111_v62, %v12370_v54  ;;  %v10553_v22 = vrot.slane %v3906_v7, %v7441_v50 }
 0x475   : > { %v5324_v62 = vcombine.high %v5307_v56, %v12370_v54  ;;  %v10575_v56 = vrot.slane %v4102_v18, %v7441_v50  ;;  %v4298_v7 = vcombine.high %v10129_v20, %v12370_v54 }
 0x476   : > { %v10524_v39 = vpop.permute.xlu1 %5757  ;;  %v10527_v63 = vpop.permute.xlu0 %5755  ;;  %v10572_v19 = vrot.slane %v10553_v22, %v7463_v5 }
 0x477   : > { %v10598_v20 = vrot.slane %v10575_v56, %v7463_v5  ;;  %v10601_v18 = vrot.slane %v4298_v7, %v7441_v50 }
 0x478   : > { %6001 = vrot.lane.b32.xlu1 %v4736_v0, %s7033_s17  ;;  %5999 = vrot.lane.b32.xlu0 %v4638_v49, %s7033_s17  ;;  %v3808_v0 = vcombine.high %v10078_v47, %v12370_v54 }
 0x479   : > { %v4149_v34 = vcombine.high %v10598_v20, %v12370_v54 }
 0x47a   : > { %v10532_v4 = vpop.permute.xlu1 %5793  ;;  %v10535_v2 = vpop.permute.xlu0 %5791  ;;  %v10561_v47 = vrot.slane %v3808_v0, %v7441_v50 }
 0x47c   : > { %6005 = vrot.lane.b32.xlu1 %v4932_v16, %s7033_s17  ;;  %6003 = vrot.lane.b32.xlu0 %v4834_v9, %s7033_s17  ;;  %v10583_v57 = vrot.slane %v10561_v47, %v7463_v5 }
 0x47e   : > { %v10542_v12 = vpop.permute.xlu1 %5797  ;;  %v10547_v49 = vpop.permute.xlu0 %5795 }
 0x47f   : > { %12789 = vst [vmem:[#allocation376_spill] sm:$0xff] %v10542_v12  ;;  %12790 = vst [vmem:[#allocation377_spill] sm:$0xff] %v10547_v49 }
 0x480   : > { %6009 = vrot.lane.b32.xlu1 %v5128_v45, %s7033_s17  ;;  %6007 = vrot.lane.b32.xlu0 %v5030_v11, %s7033_s17  ;;  %v5226_v45 = vcombine.high %v5209_v43, %v12370_v54  ;;  %v10586_v43 = vrot.slane %v4004_v6, %v7441_v50  ;;  %v4200_v11 = vcombine.high %v10136_v13, %v12370_v54 }
 0x481   : > { %v4494_v6 = vcombine.high %v10163_v36, %v12370_v54  ;;  %v10624_v36 = vrot.slane %v10601_v18, %v7463_v5 }
 0x482   : > { %v10557_v16 = vpop.permute.xlu1 %5801  ;;  %v10565_v9 = vpop.permute.xlu0 %5799  ;;  %v10609_v13 = vrot.slane %v10586_v43, %v7463_v5  ;;  %v10612_v21 = vrot.slane %v4200_v11, %v7441_v50  ;;  %v4690_v11 = vcombine.high %v10197_v8, %v12370_v54 }
 0x483   : > { %12791 = vst [vmem:[#allocation378_spill] sm:$0xff] %v10557_v16  ;;  %12792 = vst [vmem:[#allocation379_spill] sm:$0xff] %v10565_v9  ;;  %v10627_v7 = vrot.slane %v4494_v6, %v7441_v50  ;;  %v5278_v9 = vcombine.high %v10283_v10, %v12370_v54 }
 0x484   : > { %6013 = vrot.lane.b32.xlu1 %v5324_v62, %s7033_s17  ;;  %6011 = vrot.lane.b32.xlu0 %v5226_v45, %s7033_s17  ;;  %v10635_v26 = vrot.slane %v10612_v21, %v7463_v5  ;;  %v10653_v6 = vrot.slane %v4690_v11, %v7441_v50 }
 0x485   : > { %v10650_v8 = vrot.slane %v10627_v7, %v7463_v5 }
 0x486   : > { %v10579_v0 = vpop.permute.xlu1 %5805  ;;  %v10590_v62 = vpop.permute.xlu0 %5803 }
 0x487   : > { %12793 = vst [vmem:[#allocation380_spill] sm:$0xff] %v10579_v0  ;;  %12794 = vst [vmem:[#allocation381_spill] sm:$0xff] %v10590_v62  ;;  %v4984_v0 = vcombine.high %v10262_v23, %v12370_v54 }
 0x488   : > { %6049 = vrot.lane.b32.xlu1 %v10572_v19, %s7034_s22  ;;  %6047 = vrot.lane.b32.xlu0 %v10583_v57, %s7034_s22 }
 0x489   : > { %v10703_v16 = vrot.slane %v4984_v0, %v7441_v50 }
 0x48a   : > { %v10605_v45 = vpop.permute.xlu1 %5809  ;;  %v10616_v52 = vpop.permute.xlu0 %5807 }
 0x48b   : > { %12795 = vst [vmem:[#allocation382_spill] sm:$0xff] %v10605_v45  ;;  %12796 = vst [vmem:[#allocation383_spill] sm:$0xff] %v10616_v52  ;;  %v10638_v52 = vrot.slane %v4396_v40, %v7441_v50  ;;  %v4592_v45 = vcombine.high %v10204_v31, %v12370_v54  ;;  %v4886_v40 = vcombine.high %v10227_v30, %v12370_v54 }
 0x48c   : > { %6053 = vrot.lane.b32.xlu1 %v10598_v20, %s7034_s22  ;;  %6051 = vrot.lane.b32.xlu0 %v10609_v13, %s7034_s22  ;;  %v4727_v30 = vrot.slane %v10653_v6, %v7463_v5  ;;  %v10720_v0 = vrot.slane %v10703_v16, %v7463_v5 }
 0x48d   : > { %v4433_v31 = vrot.slane %v10638_v52, %v7463_v5  ;;  %v10674_v11 = vrot.slane %v4886_v40, %v7441_v50 }
 0x48e   : > { %v10631_v46 = vpop.permute.xlu1 %5813  ;;  %v10642_v58 = vpop.permute.xlu0 %5811 }
 0x48f   : > { %12797 = vst [vmem:[#allocation384_spill] sm:$0xff] %v10631_v46  ;;  %12798 = vst [vmem:[#allocation385_spill] sm:$0xff] %v10642_v58  ;;  %v10662_v58 = vrot.slane %v4592_v45, %v7441_v50  ;;  %v5082_v45 = vcombine.high %v10255_v59, %v12370_v54  ;;  %v4923_v59 = vrot.slane %v10674_v11, %v7463_v5 }
 0x490   : > { %6057 = vrot.lane.b32.xlu1 %v10624_v36, %s7034_s22  ;;  %6055 = vrot.lane.b32.xlu0 %v10635_v26, %s7034_s22 }
 0x491   : > { %v4629_v44 = vrot.slane %v10662_v58, %v7463_v5  ;;  %v10694_v40 = vrot.slane %v5082_v45, %v7441_v50  ;;  %v10714_v45 = vrot.slane %v5278_v9, %v7441_v50 }
 0x492   : > { %v10657_v46 = vpop.permute.xlu1 %5817  ;;  %v10666_v62 = vpop.permute.xlu0 %5815 }
 0x493   : > { %12799 = vst [vmem:[#allocation386_spill] sm:$0xff] %v10657_v46  ;;  %12800 = vst [vmem:[#allocation387_spill] sm:$0xff] %v10666_v62  ;;  %v10683_v62 = vrot.slane %v4788_v51, %v7441_v50  ;;  %v5119_v10 = vrot.slane %v10694_v40, %v7463_v5  ;;  %v10732_v9 = vrot.slane %v10714_v45, %v7463_v5 }
 0x494   : > { %6061 = vrot.lane.b32.xlu1 %v10650_v8, %s7034_s22  ;;  %6059 = vrot.lane.b32.xlu0 %v4433_v31, %s7034_s22  ;;  %v3953_v50 = vcombine.high %v10572_v19, %v12370_v54 }
 0x495   : > { %v4825_v23 = vrot.slane %v10683_v62, %v7463_v5 }
 0x496   : > { %v10678_v46 = vpop.permute.xlu1 %5821  ;;  %v10687_v15 = vpop.permute.xlu0 %5819 }
 0x498   : > { %6065 = vrot.lane.b32.xlu1 %v4727_v30, %s7034_s22  ;;  %6063 = vrot.lane.b32.xlu0 %v4629_v44, %s7034_s22 }
 0x49a   : > { %v10698_v51 = vpop.permute.xlu1 %5857  ;;  %v10707_v1 = vpop.permute.xlu0 %5855 }
 0x49c   : > { %6069 = vrot.lane.b32.xlu1 %v4923_v59, %s7034_s22  ;;  %6067 = vrot.lane.b32.xlu0 %v4825_v23, %s7034_s22 }
 0x49e   : > { %v10716_v14 = vpop.permute.xlu1 %5861  ;;  %v10725_v49 = vpop.permute.xlu0 %5859 }
 0x49f   : > { %12801 = vst [vmem:[#allocation388_spill] sm:$0xff] %v10716_v14  ;;  %12802 = vst [vmem:[#allocation389_spill] sm:$0xff] %v10725_v49  ;;  %v10738_v14 = vrot.slane %v10723_v48, %v7463_v5 }
 0x4a0   : > { %6073 = vrot.lane.b32.xlu1 %v5119_v10, %s7034_s22  ;;  %6071 = vrot.lane.b32.xlu0 %v10720_v0, %s7034_s22 }
 0x4a2   : > { %v10734_v12 = vpop.permute.xlu1 %5865  ;;  %v10740_v55 = vpop.permute.xlu0 %5863 }
 0x4a3   : > { %12803 = vst [vmem:[#allocation390_spill] sm:$0xff] %v10734_v12  ;;  %12804 = vst [vmem:[#allocation391_spill] sm:$0xff] %v10740_v55  ;;  %v3855_v12 = vcombine.high %v10583_v57, %v12370_v54  ;;  %v4247_v57 = vcombine.high %v10635_v26, %v12370_v54  ;;  %v4737_v26 = vcombine.high %v4727_v30, %v12370_v54 }
 0x4a4   : > { %6077 = vrot.lane.b32.xlu1 %v10732_v9, %s7034_s22  ;;  %6075 = vrot.lane.b32.xlu0 %v10738_v14, %s7034_s22  ;;  %v3936_v30 = vcombine.high %v10553_v22, %v12370_v54  ;;  %v4524_v22 = vcombine.high %v10627_v7, %v12370_v54  ;;  %v5031_v7 = vcombine.high %v10720_v0, %v12370_v54 }
 0x4a5   : > { %v5227_v0 = vcombine.high %v10738_v14, %v12370_v54 }
 0x4a6   : > { %v10746_v29 = vpop.permute.xlu1 %5869  ;;  %v10750_v49 = vpop.permute.xlu0 %5867  ;;  %v10863_v14 = vrot.slane %v4524_v22, %v7463_v5 }
 0x4a7   : > { %12805 = vst [vmem:[#allocation392_spill] sm:$0xff] %v10746_v29  ;;  %12806 = vst [vmem:[#allocation393_spill] sm:$0xff] %v10750_v49  ;;  %v4051_v29 = vcombine.high %v10609_v13, %v12370_v54 }
 0x4a8   : > { %6113 = vrot.lane.b32.xlu1 %v3953_v50, %s7035_s23  ;;  %6111 = vrot.lane.b32.xlu0 %v3855_v12, %s7035_s23  ;;  %v4345_v50 = vcombine.high %v10624_v36, %v12370_v54 }
 0x4aa   : > { %v10756_v55 = vpop.permute.xlu1 %5873  ;;  %v10760_v27 = vpop.permute.xlu0 %5871 }
 0x4ab   : > { %12807 = vst [vmem:[#allocation394_spill] sm:$0xff] %v10756_v55  ;;  %12808 = vst [vmem:[#allocation395_spill] sm:$0xff] %v10760_v27 }
 0x4ac   : > { %6117 = vrot.lane.b32.xlu1 %v4149_v34, %s7035_s23  ;;  %6115 = vrot.lane.b32.xlu0 %v4051_v29, %s7035_s23  ;;  %v4541_v34 = vcombine.high %v10650_v8, %v12370_v54  ;;  %v4443_v29 = vcombine.high %v4433_v31, %v12370_v54  ;;  %v4933_v31 = vcombine.high %v4923_v59, %v12370_v54 }
 0x4ad   : > { %v4230_v59 = vcombine.high %v10612_v21, %v12370_v54  ;;  %v4720_v21 = vcombine.high %v10653_v6, %v12370_v54  ;;  %v5210_v6 = vcombine.high %v10723_v48, %v12370_v54 }
 0x4ae   : > { %v10766_v19 = vpop.permute.xlu1 %5877  ;;  %v10770_v12 = vpop.permute.xlu0 %5875 }
 0x4af   : > { %12809 = vst [vmem:[#allocation396_spill] sm:$0xff] %v10766_v19  ;;  %12810 = vst [vmem:[#allocation397_spill] sm:$0xff] %v10770_v12  ;;  %v12826_v12 = vld [vmem:[#allocation40_spill] sm:$0xff] }
 0x4b0   : > { %6121 = vrot.lane.b32.xlu1 %v4345_v50, %s7035_s23  ;;  %6119 = vrot.lane.b32.xlu0 %v4247_v57, %s7035_s23  ;;  %v4639_v57 = vcombine.high %v4629_v44, %v12370_v54  ;;  %v4034_v44 = vcombine.high %v10586_v43, %v12370_v54  ;;  %v4622_v43 = vcombine.high %v10662_v58, %v12370_v54 }
 0x4b1   : > { %v5014_v58 = vcombine.high %v10703_v16, %v12370_v54  ;;  %v3950_v16 = vrot.slane %v3936_v30, %v7463_v5  ;;  %v10869_v30 = vrot.slane %v4720_v21, %v7463_v5 }
 0x4b2   : > { %v10776_v20 = vpop.permute.xlu1 %5881  ;;  %v10780_v13 = vpop.permute.xlu0 %5879 }
 0x4b3   : > { %12811 = vst [vmem:[#allocation398_spill] sm:$0xff] %v10776_v20  ;;  %12812 = vst [vmem:[#allocation399_spill] sm:$0xff] %v10780_v13  ;;  %v10895_v21 = vcombine.high %v3950_v16, %v12370_v54  ;;  %v12825_v20 = vld [vmem:[#allocation310_spill] sm:$0xff] }
 0x4b4   : > { %6125 = vrot.lane.b32.xlu1 %v4541_v34, %s7035_s23  ;;  %6123 = vrot.lane.b32.xlu0 %v4443_v29, %s7035_s23  ;;  %v4835_v34 = vcombine.high %v4825_v23, %v12370_v54  ;;  %v3838_v29 = vcombine.high %v10561_v47, %v12370_v54  ;;  %v4328_v23 = vcombine.high %v10601_v18, %v12370_v54 }
 0x4b5   : > { %v4426_v47 = vcombine.high %v10638_v52, %v12370_v54  ;;  %v4818_v18 = vcombine.high %v10683_v62, %v12370_v54  ;;  %v4916_v52 = vcombine.high %v10674_v11, %v12370_v54  ;;  %v5308_v62 = vcombine.high %v10714_v45, %v12370_v54  ;;  %12818 = vst [vmem:[#allocation405_spill] sm:$0xff] %v10895_v21 }
 0x4b6   : > { %v10785_v36 = vpop.permute.xlu1 %5885  ;;  %v10788_v50 = vpop.permute.xlu0 %5883  ;;  %v5325_v11 = vcombine.high %v10732_v9, %v12370_v54  ;;  %v10852_v45 = vrot.slane %v4034_v44, %v7463_v5  ;;  %v10858_v9 = vrot.slane %v4230_v59, %v7463_v5  ;;  %v10872_v44 = vrot.slane %v4622_v43, %v7463_v5 }
 0x4b7   : > { %v10879_v59 = vrot.slane %v4818_v18, %v7463_v5  ;;  %v10889_v22 = vrot.slane %v5308_v62, %v7463_v5  ;;  %v10892_v43 = vrot.slane %v5210_v6, %v7463_v5  ;;  %v6288_v62 = vsel %vm3504_vm1, %v9238_v35, %v9810_v3  ;;  %v12830_v35 = vld [vmem:[#allocation312_spill] sm:$0xff] }
 0x4b8   : > { %6129 = vrot.lane.b32.xlu1 %v4737_v26, %s7035_s23  ;;  %6127 = vrot.lane.b32.xlu0 %v4639_v57, %s7035_s23  ;;  %v4132_v26 = vcombine.high %v10575_v56, %v12370_v54  ;;  %v5129_v56 = vcombine.high %v5119_v10, %v12370_v54  ;;  %v5112_v10 = vcombine.high %v10694_v40, %v12370_v54  ;;  %v12831_v3 = vld [vmem:[#allocation48_spill] sm:$0xff] }
 0x4b9   : > { %v3852_v40 = vrot.slane %v3838_v29, %v7463_v5  ;;  %v10866_v29 = vrot.slane %v4426_v47, %v7463_v5  ;;  %v10885_v47 = vrot.slane %v5014_v58, %v7463_v5  ;;  %12816 = vst [vmem:[#allocation403_spill] sm:$0xff] %v10889_v22  ;;  %12817 = vst [vmem:[#allocation404_spill] sm:$0xff] %v10892_v43 }
 0x4ba   : > { %v10793_v8 = vpop.permute.xlu1 %5921  ;;  %v10796_v13 = vpop.permute.xlu0 %5919  ;;  %v4146_v48 = vrot.slane %v4132_v26, %v7463_v5  ;;  %v10876_v26 = vrot.slane %v4916_v52, %v7463_v5  ;;  %v10915_v6 = vcombine.high %v10858_v9, %v12370_v54 }
 0x4bb   : > { %12815 = vst [vmem:[#allocation402_spill] sm:$0xff] %v10885_v47  ;;  %v10898_v18 = vcombine.high %v3852_v40, %v12370_v54  ;;  %v12859_v47 = vld [vmem:[#allocation329_spill] sm:$0xff] }
 0x4bc   : > { %6133 = vrot.lane.b32.xlu1 %v4933_v31, %s7035_s23  ;;  %6131 = vrot.lane.b32.xlu0 %v4835_v34, %s7035_s23  ;;  %v10903_v58 = vcombine.high %v4146_v48, %v12370_v54  ;;  %12824 = vst [vmem:[#allocation411_spill] sm:$0xff] %v10915_v6  ;;  %v12829_v6 = vld [vmem:[#allocation36_spill] sm:$0xff] }
 0x4bd   : > { %12819 = vst [vmem:[#allocation406_spill] sm:$0xff] %v10898_v18 }
 0x4be   : > { %v10819_v57 = vpop.permute.xlu1 %5925  ;;  %v10828_v31 = vpop.permute.xlu0 %5923  ;;  %12821 = vst [vmem:[#allocation408_spill] sm:$0xff] %v10903_v58  ;;  %v6291_v58 = vsel %vm3504_vm1, %v12831_v3, %v12830_v35  ;;  %v12840_v35 = vld [vmem:[#allocation317_spill] sm:$0xff]  ;;  %v12841_v3 = vld [vmem:[#allocation59_spill] sm:$0xff] }
 0x4c0   : > { %6137 = vrot.lane.b32.xlu1 %v5129_v56, %s7035_s23  ;;  %6135 = vrot.lane.b32.xlu0 %v5031_v7, %s7035_s23  ;;  %v10855_v56 = vrot.slane %v4328_v23, %v7463_v5  ;;  %v10882_v23 = vrot.slane %v5112_v10, %v7463_v5  ;;  %v10907_v10 = vcombine.high %v10852_v45, %v12370_v54 }
 0x4c2   : > { %v10848_v34 = vpop.permute.xlu1 %5929  ;;  %v10860_v7 = vpop.permute.xlu0 %5927  ;;  %12822 = vst [vmem:[#allocation409_spill] sm:$0xff] %v10907_v10  ;;  %v10911_v5 = vcombine.high %v10855_v56, %v12370_v54  ;;  %v12828_v54 = vld [vmem:[#allocation311_spill] sm:$0xff] }
 0x4c3   : > { %12813 = vst [vmem:[#allocation400_spill] sm:$0xff] %v10848_v34  ;;  %12814 = vst [vmem:[#allocation401_spill] sm:$0xff] %v10860_v7  ;;  %v6292_v19 = vsel %vm3504_vm1, %v12829_v6, %v12828_v54  ;;  %v12838_v54 = vld [vmem:[#allocation316_spill] sm:$0xff]  ;;  %v12839_v6 = vld [vmem:[#allocation61_spill] sm:$0xff] }
 0x4c4   : > { %6141 = vrot.lane.b32.xlu1 %v5325_v11, %s7035_s23  ;;  %6139 = vrot.lane.b32.xlu0 %v5227_v0, %s7035_s23  ;;  %12823 = vst [vmem:[#allocation410_spill] sm:$0xff] %v10911_v5  ;;  %v6287_v11 = vsel %vm3504_vm1, %v9249_v32, %v9819_v28  ;;  %v6290_v0 = vsel %vm3504_vm1, %v9274_v37, %v9828_v42  ;;  %v12832_v32 = vld [vmem:[#allocation313_spill] sm:$0xff]  ;;  %v12833_v28 = vld [vmem:[#allocation44_spill] sm:$0xff]  ;;  %v12834_v37 = vld [vmem:[#allocation314_spill] sm:$0xff] }
 0x4c5   : > { %v6289_v5 = vsel %vm3504_vm1, %v12826_v12, %v12825_v20  ;;  %v6294_v27 = vsel %vm3504_vm1, %v12833_v28, %v12832_v32  ;;  %v12835_v42 = vld [vmem:[#allocation56_spill] sm:$0xff]  ;;  %v12836_v12 = vld [vmem:[#allocation315_spill] sm:$0xff]  ;;  %v6295_v21 = vsel %vm3504_vm1, %v12839_v6, %v12838_v54  ;;  %v12842_v32 = vld [vmem:[#allocation318_spill] sm:$0xff] }
 0x4c6   : > { %v10900_v52 = vpop.permute.xlu1 %5933  ;;  %v10929_v10 = vpop.permute.xlu0 %5931  ;;  %v6293_v18 = vsel %vm3504_vm1, %v12835_v42, %v12834_v37  ;;  %v12837_v20 = vld [vmem:[#allocation52_spill] sm:$0xff]  ;;  %v12843_v28 = vld [vmem:[#allocation65_spill] sm:$0xff]  ;;  %v12845_v37 = vld [vmem:[#allocation63_spill] sm:$0xff] }
 0x4c7   : > { %12820 = vst [vmem:[#allocation407_spill] sm:$0xff] %v10900_v52  ;;  %12827 = vst [vmem:[#allocation310_spill] sm:$0xff] %v10929_v10  ;;  %v6296_v55 = vsel %vm3504_vm1, %v12837_v20, %v12836_v12  ;;  %v6298_v10 = vsel %vm3504_vm1, %v12841_v3, %v12840_v35  ;;  %v6297_v52 = vsel %vm3504_vm1, %v12843_v28, %v12842_v32  ;;  %v12846_v12 = vld [vmem:[#allocation320_spill] sm:$0xff]  ;;  %v12847_v20 = vld [vmem:[#allocation69_spill] sm:$0xff] }
 0x4c8   : > { %6177 = vrot.lane.b32.xlu1 %v3950_v16, %s7036_s24  ;;  %6175 = vrot.lane.b32.xlu0 %v3852_v40, %s7036_s24  ;;  %v12844_v16 = vld [vmem:[#allocation319_spill] sm:$0xff]  ;;  %v6299_v49 = vsel %vm3504_vm1, %v12847_v20, %v12846_v12  ;;  %v12848_v54 = vld [vmem:[#allocation321_spill] sm:$0xff]  ;;  %v12850_v35 = vld [vmem:[#allocation322_spill] sm:$0xff] }
 0x4c9   : > { %v6300_v42 = vsel %vm3504_vm1, %v12845_v37, %v12844_v16  ;;  %v12849_v6 = vld [vmem:[#allocation67_spill] sm:$0xff]  ;;  %v12851_v3 = vld [vmem:[#allocation264_spill] sm:$0xff]  ;;  %v12855_v37 = vld [vmem:[#allocation325_spill] sm:$0xff] }
 0x4ca   : > { %v6302_v43 = vsel %vm3504_vm1, %v12849_v6, %v12848_v54  ;;  %v6301_v22 = vsel %vm3504_vm1, %v12851_v3, %v12850_v35  ;;  %v10969_v32 = vpop.permute.xlu1 %5937  ;;  %v12853_v40 = vld [vmem:[#allocation323_spill] sm:$0xff]  ;;  %v12854_v7 = vld [vmem:[#allocation324_spill] sm:$0xff]  ;;  %v6306_v12 = vsel %vm3521_vm2, %v6290_v0, %v12855_v37  ;;  %v12856_v20 = vld [vmem:[#allocation326_spill] sm:$0xff]  ;;  %v10979_v54 = vpop.permute.xlu0 %5935 }
 0x4cb   : > { %12852 = vst [vmem:[#allocation40_spill] sm:$0xff] %v10969_v32  ;;  %v6304_v28 = vsel %vm3521_vm2, %v6288_v62, %v12853_v40  ;;  %v6303_v16 = vsel %vm3521_vm2, %v6287_v11, %v12854_v7  ;;  %v6305_v34 = vsel %vm3521_vm2, %v6289_v5, %v12856_v20  ;;  %v12857_v6 = vld [vmem:[#allocation327_spill] sm:$0xff]  ;;  %v12858_v3 = vld [vmem:[#allocation328_spill] sm:$0xff]  ;;  %v6310_v62 = vsel %vm3521_vm2, %v6294_v27, %v12859_v47  ;;  %v12860_v40 = vld [vmem:[#allocation330_spill] sm:$0xff] }
 0x4cc   : > { %v6308_v35 = vsel %vm3521_vm2, %v6292_v19, %v12857_v6  ;;  %v6307_v32 = vsel %vm3521_vm2, %v6291_v58, %v12858_v3  ;;  %v6309_v7 = vsel %vm3521_vm2, %v6293_v18, %v12860_v40  ;;  %6181 = vrot.lane.b32.xlu1 %v4146_v48, %s7036_s24  ;;  %v12861_v11 = vld [vmem:[#allocation331_spill] sm:$0xff]  ;;  %v12862_v0 = vld [vmem:[#allocation332_spill] sm:$0xff]  ;;  %v12863_v20 = vld [vmem:[#allocation333_spill] sm:$0xff]  ;;  %6179 = vrot.lane.b32.xlu0 %v10852_v45, %s7036_s24 }
 0x4cd   : > { %v6312_v5 = vsel %vm3521_vm2, %v6296_v55, %v12861_v11  ;;  %v6311_v37 = vsel %vm3521_vm2, %v6295_v21, %v12862_v0  ;;  %v6314_v19 = vsel %vm3521_vm2, %v6298_v10, %v12863_v20  ;;  %v12864_v6 = vld [vmem:[#allocation334_spill] sm:$0xff]  ;;  %v12865_v27 = vld [vmem:[#allocation335_spill] sm:$0xff]  ;;  %v12866_v47 = vld [vmem:[#allocation336_spill] sm:$0xff] }
 0x4ce   : > { %v6313_v58 = vsel %vm3521_vm2, %v6297_v52, %v12864_v6  ;;  %v6316_v48 = vsel %vm3521_vm2, %v6300_v42, %v12865_v27  ;;  %v6315_v18 = vsel %vm3521_vm2, %v6299_v49, %v12866_v47  ;;  %v12867_v55 = vld [vmem:[#allocation337_spill] sm:$0xff]  ;;  %v12868_v21 = vld [vmem:[#allocation338_spill] sm:$0xff]  ;;  %v11008_v10 = vpop.permute.xlu1 %5941  ;;  %v12869_v11 = vld [vmem:[#allocation339_spill] sm:$0xff]  ;;  %v11018_v27 = vpop.permute.xlu0 %5939 }
 0x4cf   : > { %v6318_v3 = vsel %vm3521_vm2, %v6302_v43, %v12867_v55  ;;  %v6317_v40 = vsel %vm3521_vm2, %v6301_v22, %v12868_v21  ;;  %v6320_v52 = vsel %vm3538_vm3, %v6304_v28, %v12869_v11  ;;  %v12870_v0 = vld [vmem:[#allocation340_spill] sm:$0xff]  ;;  %v12871_v20 = vld [vmem:[#allocation341_spill] sm:$0xff]  ;;  %v12872_v6 = vld [vmem:[#allocation342_spill] sm:$0xff] }
 0x4d0   : > { %v6319_v45 = vsel %vm3538_vm3, %v6303_v16, %v12870_v0  ;;  %v6322_v42 = vsel %vm3538_vm3, %v6306_v12, %v12871_v20  ;;  %v6321_v49 = vsel %vm3538_vm3, %v6305_v34, %v12872_v6  ;;  %v12873_v43 = vld [vmem:[#allocation343_spill] sm:$0xff]  ;;  %v12874_v22 = vld [vmem:[#allocation344_spill] sm:$0xff]  ;;  %v12875_v21 = vld [vmem:[#allocation345_spill] sm:$0xff]  ;;  %6185 = vrot.lane.b32.xlu1 %v10855_v56, %s7036_s24  ;;  %6183 = vrot.lane.b32.xlu0 %v10858_v9, %s7036_s24 }
 0x4d1   : > { %v6324_v47 = vsel %vm3538_vm3, %v6308_v35, %v12873_v43  ;;  %v11024_v55 = vsel %vm3538_vm3, %v6307_v32, %v12874_v22  ;;  %v11028_v28 = vsel %vm3538_vm3, %v6310_v62, %v12875_v21  ;;  %v12876_v16 = vld [vmem:[#allocation353_spill] sm:$0xff]  ;;  %v12877_v34 = vld [vmem:[#allocation346_spill] sm:$0xff]  ;;  %v12878_v0 = vld [vmem:[#allocation347_spill] sm:$0xff] }
 0x4d2   : > { %v6334_v11 = vsel %vm3538_vm3, %v6318_v3, %v12876_v16  ;;  %v11036_v12 = vsel %vm3538_vm3, %v6309_v7, %v12877_v34  ;;  %v11040_v35 = vsel %vm3538_vm3, %v6312_v5, %v12878_v0  ;;  %v12879_v32 = vld [vmem:[#allocation354_spill] sm:$0xff]  ;;  %v12880_v6 = vld [vmem:[#allocation35_spill] sm:$0xff]  ;;  %v12881_v3 = vld [vmem:[#allocation348_spill] sm:$0xff]  ;;  %v11060_v21 = vpop.permute.xlu1 %5945  ;;  %v11074_v0 = vpop.permute.xlu0 %5943 }
 0x4d3   : > { %v6333_v20 = vsel %vm3538_vm3, %v6317_v40, %v12879_v32  ;;  %v6350_v62 = vsel %vm3555_vm4, %v6334_v11, %v12880_v6  ;;  %v11050_v56 = vsel %vm3538_vm3, %v6311_v37, %v12881_v3  ;;  %v12882_v7 = vld [vmem:[#allocation349_spill] sm:$0xff]  ;;  %v12884_v16 = vld [vmem:[#allocation350_spill] sm:$0xff]  ;;  %v12885_v11 = vld [vmem:[#allocation351_spill] sm:$0xff] }
 0x4d4   : > { %v11054_v43 = vsel %vm3538_vm3, %v6314_v19, %v12882_v7  ;;  %v12883_v5 = vld [vmem:[#allocation81_spill] sm:$0xff]  ;;  %v6366_v40 = vsel %vm3572_vm5, %v6350_v62, %v10361_v38  ;;  %v11064_v9 = vsel %vm3538_vm3, %v6313_v58, %v12884_v16  ;;  %v11068_v37 = vsel %vm3538_vm3, %v6316_v48, %v12885_v11  ;;  %v12886_v32 = vld [vmem:[#allocation352_spill] sm:$0xff]  ;;  %6189 = vrot.lane.b32.xlu1 %v10863_v14, %s7036_s24  ;;  %v12889_v62 = vld [vmem:[#allocation47_spill] sm:$0xff] }
 0x4d5   : > { %v6349_v22 = vsel %vm3555_vm4, %v6333_v20, %v12883_v5  ;;  %v6382_v34 = vsel %vm3589_vm6, %v6366_v40, %v10450_v41  ;;  %v11078_v38 = vsel %vm3538_vm3, %v6315_v18, %v12886_v32  ;;  %v12887_v20 = vld [vmem:[#allocation355_spill] sm:$0xff]  ;;  %6187 = vrot.lane.b32.xlu0 %v10866_v29, %s7036_s24  ;;  %v12891_v11 = vld [vmem:[#allocation357_spill] sm:$0xff] }
 0x4d6   : > { %v6365_v19 = vsel %vm3572_vm5, %v6349_v22, %v10364_v60  ;;  %v6336_v58 = vsel %vm3555_vm4, %v6320_v52, %v12887_v20  ;;  %v6398_v48 = vsel %vm3606_vm7, %v6382_v34, %v10524_v39  ;;  %v12888_v60 = vld [vmem:[#allocation356_spill] sm:$0xff]  ;;  %v5950_v22 = vpop.permute.xlu1 %5949  ;;  %v12893_v34 = vld [vmem:[#allocation43_spill] sm:$0xff] }
 0x4d7   : > { %v6381_v6 = vsel %vm3589_vm6, %v6365_v19, %v10455_v25  ;;  %v6335_v41 = vsel %vm3555_vm4, %v6319_v45, %v12888_v60  ;;  %v6352_v3 = vsel %vm3572_vm5, %v6336_v58, %v12889_v62  ;;  %v6414_v52 = vsel %vm3623_vm8, %v6398_v48, %v10678_v46  ;;  %v12890_v25 = vld [vmem:[#allocation79_spill] sm:$0xff] }
 0x4d8   : > { %v6397_v18 = vsel %vm3606_vm7, %v6381_v6, %v10527_v63  ;;  %v6351_v39 = vsel %vm3572_vm5, %v6335_v41, %v12890_v25  ;;  %v6368_v7 = vsel %vm3589_vm6, %v6352_v3, %v10369_v17  ;;  %v6430_v5 = vsel %vm3640_vm9, %v6414_v52, %v10785_v36  ;;  %v5948_v17 = vpop.permute.xlu0 %5947  ;;  %6193 = vrot.lane.b32.xlu1 %v10869_v30, %s7036_s24  ;;  %v12898_v52 = vld [vmem:[#allocation365_spill] sm:$0xff]  ;;  %v12899_v25 = vld [vmem:[#allocation376_spill] sm:$0xff] }
 0x4d9   : > { %v6413_v45 = vsel %vm3623_vm8, %v6397_v18, %v10687_v15  ;;  %v6367_v63 = vsel %vm3589_vm6, %v6351_v39, %v10372_v53  ;;  %v6384_v46 = vsel %vm3606_vm7, %v6368_v7, %v10462_v61  ;;  %v11113_v16 = vsel %vm3657_vm10, %v6430_v5, %v5950_v22  ;;  %v12892_v61 = vld [vmem:[#allocation71_spill] sm:$0xff]  ;;  %6191 = vrot.lane.b32.xlu0 %v10872_v44, %s7036_s24  ;;  %v12897_v18 = vld [vmem:[#allocation26_spill] sm:$0xff] }
 0x4da   : > { %v6429_v40 = vsel %vm3640_vm9, %v6413_v45, %v10788_v50  ;;  %v6338_v15 = vsel %vm3555_vm4, %v6322_v42, %v12891_v11  ;;  %v6383_v36 = vsel %vm3606_vm7, %v6367_v63, %v10467_v24  ;;  %v6400_v19 = vsel %vm3623_vm8, %v6384_v46, %v10532_v4  ;;  %v12894_v4 = vld [vmem:[#allocation85_spill] sm:$0xff]  ;;  %v5986_v48 = vpop.permute.xlu1 %5985  ;;  %v12901_v5 = vld [vmem:[#allocation55_spill] sm:$0xff]  ;;  %v12903_v46 = vld [vmem:[#allocation388_spill] sm:$0xff] }
 0x4db   : > { %v11122_v53 = vsel %vm3657_vm10, %v6429_v40, %v5948_v17  ;;  %v6337_v50 = vsel %vm3555_vm4, %v6321_v49, %v12892_v61  ;;  %v6354_v32 = vsel %vm3572_vm5, %v6338_v15, %v12893_v34  ;;  %v6399_v42 = vsel %vm3623_vm8, %v6383_v36, %v10535_v2  ;;  %v12895_v2 = vld [vmem:[#allocation62_spill] sm:$0xff]  ;;  %v12904_v17 = vld [vmem:[#allocation83_spill] sm:$0xff]  ;;  %v12905_v15 = vld [vmem:[#allocation97_spill] sm:$0xff] }
 0x4dc   : > { %v6416_v24 = vsel %vm3640_vm9, %v6400_v19, %v10698_v51  ;;  %v6353_v20 = vsel %vm3572_vm5, %v6337_v50, %v12894_v4  ;;  %v6370_v58 = vsel %vm3589_vm6, %v6354_v32, %v10377_v33  ;;  %v6415_v49 = vsel %vm3640_vm9, %v6399_v42, %v10707_v1  ;;  %v12896_v51 = vld [vmem:[#allocation364_spill] sm:$0xff]  ;;  %v5984_v33 = vpop.permute.xlu0 %5983  ;;  %6197 = vrot.lane.b32.xlu1 %v10876_v26, %s7036_s24  ;;  %v12906_v19 = vld [vmem:[#allocation389_spill] sm:$0xff]  ;;  %v12908_v42 = vld [vmem:[#allocation366_spill] sm:$0xff] }
 0x4dd   : > { %v6432_v6 = vsel %vm3657_vm10, %v6416_v24, %v10793_v8  ;;  %v6369_v60 = vsel %vm3589_vm6, %v6353_v20, %v12895_v2  ;;  %v6386_v41 = vsel %vm3606_vm7, %v6370_v58, %v12896_v51  ;;  %v6431_v62 = vsel %vm3657_vm10, %v6415_v49, %v10796_v13  ;;  %v12900_v13 = vld [vmem:[#allocation70_spill] sm:$0xff]  ;;  %6195 = vrot.lane.b32.xlu0 %v10879_v59, %s7036_s24  ;;  %v12907_v34 = vld [vmem:[#allocation68_spill] sm:$0xff] }
 0x4de   : > { %v11151_v3 = vsel %vm3674_vm11, %v6432_v6, %v5986_v48  ;;  %v6340_v1 = vsel %vm3555_vm4, %v6324_v47, %v12897_v18  ;;  %v6385_v8 = vsel %vm3606_vm7, %v6369_v60, %v12898_v52  ;;  %v6402_v39 = vsel %vm3623_vm8, %v6386_v41, %v12899_v25  ;;  %v12902_v47 = vld [vmem:[#allocation377_spill] sm:$0xff]  ;;  %v5990_v50 = vpop.permute.xlu1 %5989  ;;  %v12909_v49 = vld [vmem:[#allocation24_spill] sm:$0xff]  ;;  %v12910_v48 = vld [vmem:[#allocation367_spill] sm:$0xff] }
 0x4df   : > { %v11160_v7 = vsel %vm3674_vm11, %v6431_v62, %v5984_v33  ;;  %v6339_v45 = vsel %vm3555_vm4, %v11024_v55, %v12900_v13  ;;  %v6356_v22 = vsel %vm3572_vm5, %v6340_v1, %v12901_v5  ;;  %v6401_v63 = vsel %vm3623_vm8, %v6385_v8, %v12902_v47  ;;  %v12911_v2 = vld [vmem:[#allocation378_spill] sm:$0xff]  ;;  %v12913_v62 = vld [vmem:[#allocation51_spill] sm:$0xff]  ;;  %v12917_v25 = vld [vmem:[#allocation89_spill] sm:$0xff] }
 0x4e0   : > { %v6418_v40 = vsel %vm3640_vm9, %v6402_v39, %v12903_v46  ;;  %v6355_v11 = vsel %vm3572_vm5, %v6339_v45, %v12904_v17  ;;  %v6372_v36 = vsel %vm3589_vm6, %v6356_v22, %v12905_v15  ;;  %v6417_v55 = vsel %vm3640_vm9, %v6401_v63, %v12906_v19  ;;  %v5988_v58 = vpop.permute.xlu0 %5987  ;;  %6201 = vrot.lane.b32.xlu1 %v10882_v23, %s7036_s24  ;;  %v12915_v1 = vld [vmem:[#allocation390_spill] sm:$0xff]  ;;  %v12918_v13 = vld [vmem:[#allocation95_spill] sm:$0xff]  ;;  %v12920_v22 = vld [vmem:[#allocation400_spill] sm:$0xff] }
 0x4e1   : > { %v6434_v61 = vsel %vm3657_vm10, %v6418_v40, %v10819_v57  ;;  %v6371_v32 = vsel %vm3589_vm6, %v6355_v11, %v12907_v34  ;;  %v6388_v24 = vsel %vm3606_vm7, %v6372_v36, %v12908_v42  ;;  %v6433_v4 = vsel %vm3657_vm10, %v6417_v55, %v10828_v31  ;;  %v12912_v31 = vld [vmem:[#allocation74_spill] sm:$0xff]  ;;  %v12919_v5 = vld [vmem:[#allocation391_spill] sm:$0xff]  ;;  %v12922_v17 = vld [vmem:[#allocation368_spill] sm:$0xff] }
 0x4e2   : > { %v11190_v20 = vsel %vm3674_vm11, %v6434_v61, %v5990_v50  ;;  %v6342_v6 = vsel %vm3555_vm4, %v11028_v28, %v12909_v49  ;;  %v6387_v57 = vsel %vm3606_vm7, %v6371_v32, %v12910_v48  ;;  %v6404_v60 = vsel %vm3623_vm8, %v6388_v24, %v12911_v2  ;;  %v12914_v28 = vld [vmem:[#allocation379_spill] sm:$0xff]  ;;  %v12916_v8 = vld [vmem:[#allocation402_spill] sm:$0xff]  ;;  %v5994_v63 = vpop.permute.xlu1 %5993  ;;  %v12923_v15 = vld [vmem:[#allocation401_spill] sm:$0xff] }
 0x4e3   : > { %v11200_v51 = vsel %vm3674_vm11, %v6433_v4, %v5988_v58  ;;  %v6341_v41 = vsel %vm3555_vm4, %v11036_v12, %v12912_v31  ;;  %v6358_v33 = vsel %vm3572_vm5, %v6342_v6, %v12913_v62  ;;  %v6403_v18 = vsel %vm3623_vm8, %v6387_v57, %v12914_v28  ;;  %6199 = vrot.lane.b32.xlu0 %v12916_v8, %s7036_s24  ;;  %v12921_v46 = vld [vmem:[#allocation66_spill] sm:$0xff]  ;;  %v12924_v61 = vld [vmem:[#allocation32_spill] sm:$0xff]  ;;  %v12925_v34 = vld [vmem:[#allocation369_spill] sm:$0xff] }
 0x4e4   : > { %v6420_v52 = vsel %vm3640_vm9, %v6404_v60, %v12915_v1  ;;  %v6357_v39 = vsel %vm3572_vm5, %v6341_v41, %v12917_v25  ;;  %v6374_v45 = vsel %vm3589_vm6, %v6358_v33, %v12918_v13  ;;  %v6419_v12 = vsel %vm3640_vm9, %v6403_v18, %v12919_v5  ;;  %v5992_v55 = vpop.permute.xlu0 %5991  ;;  %v12926_v42 = vld [vmem:[#allocation380_spill] sm:$0xff]  ;;  %v12927_v58 = vld [vmem:[#allocation403_spill] sm:$0xff]  ;;  %v12934_v28 = vld [vmem:[#allocation358_spill] sm:$0xff] }
 0x4e5   : > { %v6436_v47 = vsel %vm3657_vm10, %v6420_v52, %v12920_v22  ;;  %v6373_v40 = vsel %vm3589_vm6, %v6357_v39, %v12921_v46  ;;  %v6390_v11 = vsel %vm3606_vm7, %v6374_v45, %v12922_v17  ;;  %v6435_v36 = vsel %vm3657_vm10, %v6419_v12, %v12923_v15  ;;  %6205 = vrot.lane.b32.xlu1 %v12927_v58, %s7036_s24  ;;  %v12928_v49 = vld [vmem:[#allocation72_spill] sm:$0xff]  ;;  %v12933_v62 = vld [vmem:[#allocation87_spill] sm:$0xff]  ;;  %v12935_v1 = vld [vmem:[#allocation393_spill] sm:$0xff] }
 0x4e6   : > { %v11230_v19 = vsel %vm3674_vm11, %v6436_v47, %v5994_v63  ;;  %v6344_v50 = vsel %vm3555_vm4, %v11040_v35, %v12924_v61  ;;  %v6389_v32 = vsel %vm3606_vm7, %v6373_v40, %v12925_v34  ;;  %v6406_v24 = vsel %vm3623_vm8, %v6390_v11, %v12926_v42  ;;  %v12929_v48 = vld [vmem:[#allocation60_spill] sm:$0xff]  ;;  %v12930_v35 = vld [vmem:[#allocation381_spill] sm:$0xff]  ;;  %v12936_v52 = vld [vmem:[#allocation407_spill] sm:$0xff]  ;;  %v5998_v39 = vpop.permute.xlu1 %5997 }
 0x4e7   : > { %v11240_v4 = vsel %vm3674_vm11, %v6435_v36, %v5992_v55  ;;  %v6343_v6 = vsel %vm3555_vm4, %v11050_v56, %v12928_v49  ;;  %v6360_v57 = vsel %vm3572_vm5, %v6344_v50, %v12929_v48  ;;  %v6405_v2 = vsel %vm3623_vm8, %v6389_v32, %v12930_v35  ;;  %v12931_v60 = vld [vmem:[#allocation392_spill] sm:$0xff]  ;;  %v12937_v13 = vld [vmem:[#allocation359_spill] sm:$0xff]  ;;  %v12938_v5 = vld [vmem:[#allocation370_spill] sm:$0xff] }
 0x4e8   : > { %v6422_v31 = vsel %vm3640_vm9, %v6406_v24, %v12931_v60  ;;  %v12932_v41 = vld [vmem:[#allocation404_spill] sm:$0xff]  ;;  %v6359_v33 = vsel %vm3572_vm5, %v6343_v6, %v12933_v62  ;;  %v6376_v18 = vsel %vm3589_vm6, %v6360_v57, %v12934_v28  ;;  %v6421_v56 = vsel %vm3640_vm9, %v6405_v2, %v12935_v1  ;;  %v12939_v22 = vld [vmem:[#allocation310_spill] sm:$0xff]  ;;  %v5996_v46 = vpop.permute.xlu0 %5995  ;;  %v12941_v11 = vld [vmem:[#allocation371_spill] sm:$0xff] }
 0x4e9   : > { %6203 = vrot.lane.b32.xlu0 %v12932_v41, %s7036_s24  ;;  %v6438_v25 = vsel %vm3657_vm10, %v6422_v31, %v12936_v52  ;;  %v6375_v45 = vsel %vm3589_vm6, %v6359_v33, %v12937_v13  ;;  %v6392_v12 = vsel %vm3606_vm7, %v6376_v18, %v12938_v5  ;;  %v6437_v47 = vsel %vm3657_vm10, %v6421_v56, %v12939_v22  ;;  %v12940_v40 = vld [vmem:[#allocation28_spill] sm:$0xff]  ;;  %v12942_v36 = vld [vmem:[#allocation382_spill] sm:$0xff]  ;;  %v12943_v50 = vld [vmem:[#allocation405_spill] sm:$0xff] }
 0x4ea   : > { %v11270_v63 = vsel %vm3674_vm11, %v6438_v25, %v5998_v39  ;;  %v6346_v17 = vsel %vm3555_vm4, %v11054_v43, %v12940_v40  ;;  %v6391_v15 = vsel %vm3606_vm7, %v6375_v45, %v12941_v11  ;;  %v6408_v55 = vsel %vm3623_vm8, %v6392_v12, %v12942_v36  ;;  %6241 = vrot.lane.b32.xlu1 %v12943_v50, %s7037_s25  ;;  %v12944_v34 = vld [vmem:[#allocation77_spill] sm:$0xff]  ;;  %v12945_v42 = vld [vmem:[#allocation58_spill] sm:$0xff]  ;;  %v12946_v43 = vld [vmem:[#allocation383_spill] sm:$0xff]  ;;  %v6002_v18 = vpop.permute.xlu1 %6001 }
 0x4eb   : > { %v11280_v61 = vsel %vm3674_vm11, %v6437_v47, %v5996_v46  ;;  %v6345_v32 = vsel %vm3555_vm4, %v11064_v9, %v12944_v34  ;;  %v6362_v24 = vsel %vm3572_vm5, %v6346_v17, %v12945_v42  ;;  %v6407_v49 = vsel %vm3623_vm8, %v6391_v15, %v12946_v43  ;;  %v12947_v6 = vld [vmem:[#allocation394_spill] sm:$0xff]  ;;  %v12949_v35 = vld [vmem:[#allocation93_spill] sm:$0xff]  ;;  %v12950_v60 = vld [vmem:[#allocation360_spill] sm:$0xff] }
 0x4ec   : > { %v6424_v48 = vsel %vm3640_vm9, %v6408_v55, %v12947_v6  ;;  %v12948_v57 = vld [vmem:[#allocation406_spill] sm:$0xff]  ;;  %v6361_v2 = vsel %vm3572_vm5, %v6345_v32, %v12949_v35  ;;  %v6378_v31 = vsel %vm3589_vm6, %v6362_v24, %v12950_v60  ;;  %v12951_v62 = vld [vmem:[#allocation395_spill] sm:$0xff]  ;;  %v12952_v33 = vld [vmem:[#allocation40_spill] sm:$0xff]  ;;  %v6000_v45 = vpop.permute.xlu0 %5999 }
 0x4ed   : > { %6239 = vrot.lane.b32.xlu0 %v12948_v57, %s7037_s25  ;;  %v6423_v9 = vsel %vm3640_vm9, %v6407_v49, %v12951_v62  ;;  %v6440_v28 = vsel %vm3657_vm10, %v6424_v48, %v12952_v33  ;;  %v12953_v1 = vld [vmem:[#allocation361_spill] sm:$0xff]  ;;  %v12954_v52 = vld [vmem:[#allocation372_spill] sm:$0xff]  ;;  %v12955_v5 = vld [vmem:[#allocation39_spill] sm:$0xff] }
 0x4ee   : > { %v6377_v56 = vsel %vm3589_vm6, %v6361_v2, %v12953_v1  ;;  %v6394_v25 = vsel %vm3606_vm7, %v6378_v31, %v12954_v52  ;;  %v6439_v39 = vsel %vm3657_vm10, %v6423_v9, %v10979_v54  ;;  %v11310_v13 = vsel %vm3674_vm11, %v6440_v28, %v6002_v18  ;;  %v12956_v22 = vld [vmem:[#allocation373_spill] sm:$0xff]  ;;  %v12957_v46 = vld [vmem:[#allocation384_spill] sm:$0xff]  ;;  %v12959_v54 = vld [vmem:[#allocation75_spill] sm:$0xff]  ;;  %v6006_v35 = vpop.permute.xlu1 %6005 }
 0x4ef   : > { %v6348_v12 = vsel %vm3555_vm4, %v11068_v37, %v12955_v5  ;;  %v6393_v47 = vsel %vm3606_vm7, %v6377_v56, %v12956_v22  ;;  %v6410_v40 = vsel %vm3623_vm8, %v6394_v25, %v12957_v46  ;;  %v11320_v17 = vsel %vm3674_vm11, %v6439_v39, %v6000_v45  ;;  %v12958_v11 = vld [vmem:[#allocation408_spill] sm:$0xff]  ;;  %v12961_v37 = vld [vmem:[#allocation385_spill] sm:$0xff]  ;;  %v12964_v24 = vld [vmem:[#allocation91_spill] sm:$0xff] }
 0x4f0   : > { %6245 = vrot.lane.b32.xlu1 %v12958_v11, %s7037_s25  ;;  %v6347_v15 = vsel %vm3555_vm4, %v11078_v38, %v12959_v54  ;;  %v12960_v36 = vld [vmem:[#allocation64_spill] sm:$0xff]  ;;  %v6409_v50 = vsel %vm3623_vm8, %v6393_v47, %v12961_v37  ;;  %v12963_v42 = vld [vmem:[#allocation409_spill] sm:$0xff]  ;;  %v12965_v49 = vld [vmem:[#allocation362_spill] sm:$0xff]  ;;  %v6004_v28 = vpop.permute.xlu0 %6003  ;;  %v12976_v11 = vmov 0.0  }
 0x4f1   : > { %v6364_v55 = vsel %vm3572_vm5, %v6348_v12, %v12960_v36  ;;  %v12962_v34 = vld [vmem:[#allocation396_spill] sm:$0xff]  ;;  %6243 = vrot.lane.b32.xlu0 %v12963_v42, %s7037_s25  ;;  %v6363_v43 = vsel %vm3572_vm5, %v6347_v15, %v12964_v24  ;;  %v12966_v48 = vld [vmem:[#allocation397_spill] sm:$0xff]  ;;  %v12967_v2 = vld [vmem:[#allocation363_spill] sm:$0xff]  ;;  %v4542_v54 = vcombine.high %v10863_v14, %v12976_v11  ;;  %v4444_v37 = vcombine.high %v10866_v29, %v12976_v11 }
 0x4f2   : > { %v6426_v32 = vsel %vm3640_vm9, %v6410_v40, %v12962_v34  ;;  %v6380_v6 = vsel %vm3589_vm6, %v6364_v55, %v12965_v49  ;;  %v6425_v38 = vsel %vm3640_vm9, %v6409_v50, %v12966_v48  ;;  %v6379_v60 = vsel %vm3589_vm6, %v6363_v43, %v12967_v2  ;;  %v12968_v31 = vld [vmem:[#allocation374_spill] sm:$0xff]  ;;  %v12969_v18 = vld [vmem:[#allocation375_spill] sm:$0xff]  ;;  %v6010_v40 = vpop.permute.xlu1 %6009 }
 0x4f3   : > { %v6442_v57 = vsel %vm3657_vm10, %v6426_v32, %v11008_v10  ;;  %v6396_v62 = vsel %vm3606_vm7, %v6380_v6, %v12968_v31  ;;  %v6441_v9 = vsel %vm3657_vm10, %v6425_v38, %v11018_v27  ;;  %v6395_v1 = vsel %vm3606_vm7, %v6379_v60, %v12969_v18  ;;  %v12970_v56 = vld [vmem:[#allocation386_spill] sm:$0xff]  ;;  %v12972_v39 = vld [vmem:[#allocation387_spill] sm:$0xff] }
 0x4f4   : > { %v11350_v33 = vsel %vm3674_vm11, %v6442_v57, %v6006_v35  ;;  %v6412_v10 = vsel %vm3623_vm8, %v6396_v62, %v12970_v56  ;;  %v6457_v52 = vsel %vm3674_vm11, %v6441_v9, %v6004_v28  ;;  %v12971_v25 = vld [vmem:[#allocation410_spill] sm:$0xff]  ;;  %v6411_v45 = vsel %vm3623_vm8, %v6395_v1, %v12972_v39  ;;  %v12974_v12 = vld [vmem:[#allocation411_spill] sm:$0xff]  ;;  %v6008_v55 = vpop.permute.xlu0 %6007 }
 0x4f5   : > { %6249 = vrot.lane.b32.xlu1 %v12971_v25, %s7037_s25  ;;  %v12973_v5 = vld [vmem:[#allocation398_spill] sm:$0xff]  ;;  %6247 = vrot.lane.b32.xlu0 %v12974_v12, %s7037_s25  ;;  %v12975_v22 = vld [vmem:[#allocation399_spill] sm:$0xff]  ;;  %v4738_v34 = vcombine.high %v10869_v30, %v12976_v11  ;;  %v4640_v32 = vcombine.high %v10872_v44, %v12976_v11  ;;  %v4934_v24 = vcombine.high %v10876_v26, %v12976_v11 }
 0x4f6   : > { %v6428_v27 = vsel %vm3640_vm9, %v6412_v10, %v12973_v5  ;;  %v6427_v47 = vsel %vm3640_vm9, %v6411_v45, %v12975_v22  ;;  %v4836_v43 = vcombine.high %v10879_v59, %v12976_v11  ;;  %v5130_v49 = vcombine.high %v10882_v23, %v12976_v11 }
 0x4f7   : > { %v6444_v46 = vsel %vm3657_vm10, %v6428_v27, %v11060_v21  ;;  %v6443_v15 = vsel %vm3657_vm10, %v6427_v47, %v11074_v0  ;;  %v6014_v21 = vpop.permute.xlu1 %6013  ;;  %v5032_v6 = vcombine.high %v12916_v8, %v12976_v11  ;;  %v5326_v23 = vcombine.high %v12927_v58, %v12976_v11 }
 0x4f8   : > { %v6460_v36 = vsel %vm3674_vm11, %v6444_v46, %v6010_v40  ;;  %v6459_v50 = vsel %vm3674_vm11, %v6443_v15, %v6008_v55  ;;  %v6462_v14 = vsel %vm3674_vm11, %v11113_v16, %v6014_v21  ;;  %v6012_v0 = vpop.permute.xlu0 %6011  ;;  %v5228_v38 = vcombine.high %v12932_v41, %v12976_v11  ;;  %v12979_v46 = vld [vmem:[#allocation99_spill] sm:$0xff]  ;;  %v12982_v15 = vld [vmem:[#allocation30_spill] sm:$0xff]  ;;  %v12983_v55 = vld [vmem:[#allocation101_spill] sm:$0xff] }
 0x4f9   : > { %6253 = vrot.lane.b32.xlu1 %v4542_v54, %s7037_s25  ;;  %6251 = vrot.lane.b32.xlu0 %v4444_v37, %s7037_s25  ;;  %v6461_v29 = vsel %vm3674_vm11, %v11122_v53, %v6012_v0  ;;  %v12980_v40 = vld [vmem:[#allocation27_spill] sm:$0xff]  ;;  %v12981_v54 = vld [vmem:[#allocation100_spill] sm:$0xff]  ;;  %v12985_v21 = vld [vmem:[#allocation102_spill] sm:$0xff] }
 0x4fa   : > { %v3506_v11 = vsel %vm3504_vm1, %v12980_v40, %v12979_v46  ;;  %v12984_v37 = vld [vmem:[#allocation31_spill] sm:$0xff]  ;;  %v13009_v40 = vld [vmem:[#allocation114_spill] sm:$0xff] }
 0x4fb   : > { %v6050_v42 = vpop.permute.xlu1 %6049 }
 0x4fc   : > { %v6464_v30 = vsel %vm3691_vm12, %v11151_v3, %v6050_v42  ;;  %v6048_v16 = vpop.permute.xlu0 %6047 }
 0x4fd   : > { %6257 = vrot.lane.b32.xlu1 %v4738_v34, %s7037_s25  ;;  %6255 = vrot.lane.b32.xlu0 %v4640_v32, %s7037_s25  ;;  %v6463_v44 = vsel %vm3691_vm12, %v11160_v7, %v6048_v16  ;;  %v12986_v34 = vld [vmem:[#allocation33_spill] sm:$0xff]  ;;  %v12987_v32 = vld [vmem:[#allocation103_spill] sm:$0xff] }
 0x4ff   : > { %v6054_v53 = vpop.permute.xlu1 %6053 }
 0x500   : > { %v11403_v26 = vsel %vm3691_vm12, %v11190_v20, %v6054_v53  ;;  %v6052_v3 = vpop.permute.xlu0 %6051 }
 0x501   : > { %6261 = vrot.lane.b32.xlu1 %v4934_v24, %s7037_s25  ;;  %6259 = vrot.lane.b32.xlu0 %v4836_v43, %s7037_s25  ;;  %v11409_v59 = vsel %vm3691_vm12, %v11200_v51, %v6052_v3  ;;  %v12989_v24 = vld [vmem:[#allocation104_spill] sm:$0xff]  ;;  %v12991_v43 = vld [vmem:[#allocation105_spill] sm:$0xff] }
 0x502   : > { %v12994_v3 = vld [vmem:[#allocation41_spill] sm:$0xff] }
 0x503   : > { %v6058_v7 = vpop.permute.xlu1 %6057 }
 0x504   : > { %v6468_v20 = vsel %vm3691_vm12, %v11230_v19, %v6058_v7  ;;  %v6056_v48 = vpop.permute.xlu0 %6055  ;;  %v12995_v7 = vld [vmem:[#allocation107_spill] sm:$0xff] }
 0x505   : > { %6265 = vrot.lane.b32.xlu1 %v5130_v49, %s7037_s25  ;;  %6263 = vrot.lane.b32.xlu0 %v5032_v6, %s7037_s25  ;;  %v6467_v8 = vsel %vm3691_vm12, %v11240_v4, %v6056_v48  ;;  %v12993_v49 = vld [vmem:[#allocation106_spill] sm:$0xff]  ;;  %v12997_v48 = vld [vmem:[#allocation108_spill] sm:$0xff] }
 0x506   : > { %v3511_v6 = vsel %vm3504_vm1, %v12994_v3, %v12993_v49  ;;  %v13015_v3 = vld [vmem:[#allocation119_spill] sm:$0xff] }
 0x507   : > { %v6062_v51 = vpop.permute.xlu1 %6061 }
 0x508   : > { %v11425_v57 = vsel %vm3691_vm12, %v11270_v63, %v6062_v51  ;;  %v6060_v58 = vpop.permute.xlu0 %6059  ;;  %v12999_v51 = vld [vmem:[#allocation109_spill] sm:$0xff] }
 0x509   : > { %6269 = vrot.lane.b32.xlu1 %v5326_v23, %s7037_s25  ;;  %6267 = vrot.lane.b32.xlu0 %v5228_v38, %s7037_s25  ;;  %v11429_v19 = vsel %vm3691_vm12, %v11280_v61, %v6060_v58  ;;  %v12996_v23 = vld [vmem:[#allocation42_spill] sm:$0xff]  ;;  %v12998_v38 = vld [vmem:[#allocation45_spill] sm:$0xff] }
 0x50a   : > { %v13000_v58 = vld [vmem:[#allocation46_spill] sm:$0xff] }
 0x50b   : > { %v6066_v35 = vpop.permute.xlu1 %6065 }
 0x50c   : > { %v6472_v41 = vsel %vm3691_vm12, %v11310_v13, %v6066_v35  ;;  %v6064_v2 = vpop.permute.xlu0 %6063  ;;  %v3516_v35 = vsel %vm3504_vm1, %v13000_v58, %v12999_v51  ;;  %v13019_v51 = vld [vmem:[#allocation123_spill] sm:$0xff] }
 0x50d   : > { %v6471_v4 = vsel %vm3691_vm12, %v11320_v17, %v6064_v2  ;;  %v13001_v2 = vld [vmem:[#allocation110_spill] sm:$0xff] }
 0x50f   : > { %v6070_v60 = vpop.permute.xlu1 %6069 }
 0x510   : > { %v11437_v31 = vsel %vm3691_vm12, %v11350_v33, %v6070_v60  ;;  %v6068_v63 = vpop.permute.xlu0 %6067  ;;  %v13002_v60 = vld [vmem:[#allocation49_spill] sm:$0xff] }
 0x511   : > { %v11440_v62 = vsel %vm3691_vm12, %v6457_v52, %v6068_v63  ;;  %v3515_v63 = vsel %vm3504_vm1, %v13002_v60, %v13001_v2  ;;  %v13020_v2 = vld [vmem:[#allocation124_spill] sm:$0xff]  ;;  %v13021_v60 = vld [vmem:[#allocation125_spill] sm:$0xff] }
 0x513   : > { %v6074_v9 = vpop.permute.xlu1 %6073 }
 0x514   : > { %v11443_v61 = vsel %vm3691_vm12, %v6460_v36, %v6074_v9  ;;  %v6072_v28 = vpop.permute.xlu0 %6071  ;;  %v3505_v36 = vsel %vm3504_vm1, %v12982_v15, %v12981_v54  ;;  %v13003_v9 = vld [vmem:[#allocation111_spill] sm:$0xff]  ;;  %v13010_v54 = vld [vmem:[#allocation57_spill] sm:$0xff] }
 0x515   : > { %v11446_v13 = vsel %vm3691_vm12, %v6459_v50, %v6072_v28  ;;  %v3508_v50 = vsel %vm3504_vm1, %v12984_v37, %v12983_v55  ;;  %v13004_v28 = vld [vmem:[#allocation50_spill] sm:$0xff]  ;;  %v3519_v15 = vsel %vm3504_vm1, %v13010_v54, %v13009_v40  ;;  %v13011_v37 = vld [vmem:[#allocation115_spill] sm:$0xff]  ;;  %v13028_v40 = vld [vmem:[#allocation132_spill] sm:$0xff] }
 0x517   : > { %v6078_v18 = vpop.permute.xlu1 %6077 }
 0x518   : > { %v11449_v17 = vsel %vm3691_vm12, %v6462_v14, %v6078_v18  ;;  %v6076_v1 = vpop.permute.xlu0 %6075  ;;  %v3507_v14 = vsel %vm3504_vm1, %v12986_v34, %v12985_v21  ;;  %v3518_v18 = vsel %vm3504_vm1, %v13004_v28, %v13003_v9  ;;  %v3523_v21 = vsel %vm3521_vm2, %v3506_v11, %v13011_v37  ;;  %v13012_v34 = vld [vmem:[#allocation116_spill] sm:$0xff]  ;;  %v13022_v9 = vld [vmem:[#allocation126_spill] sm:$0xff] }
 0x519   : > { %12977 = vst [vmem:[#allocation311_spill] sm:$0xff] %v11449_v17  ;;  %v11452_v33 = vsel %vm3691_vm12, %v6461_v29, %v6076_v1  ;;  %v12988_v29 = vld [vmem:[#allocation34_spill] sm:$0xff]  ;;  %v13005_v1 = vld [vmem:[#allocation112_spill] sm:$0xff] }
 0x51a   : > { %12978 = vst [vmem:[#allocation36_spill] sm:$0xff] %v11452_v33  ;;  %v3510_v42 = vsel %vm3504_vm1, %v12988_v29, %v12987_v32  ;;  %v3522_v32 = vsel %vm3521_vm2, %v3505_v36, %v13012_v34  ;;  %v13013_v29 = vld [vmem:[#allocation117_spill] sm:$0xff]  ;;  %v13031_v34 = vld [vmem:[#allocation135_spill] sm:$0xff]  ;;  %v13149_v33 = vld [vmem:[#allocation234_spill] sm:$0xff] }
 0x51b   : > { %v6114_v56 = vpop.permute.xlu1 %6113  ;;  %v13017_v36 = vld [vmem:[#allocation121_spill] sm:$0xff]  ;;  %v13165_v17 = vld [vmem:[#allocation250_spill] sm:$0xff] }
 0x51c   : > { %v11455_v10 = vsel %vm3708_vm13, %v6464_v30, %v6114_v56  ;;  %v6112_v52 = vpop.permute.xlu0 %6111  ;;  %v12990_v30 = vld [vmem:[#allocation37_spill] sm:$0xff] }
 0x51d   : > { %v11458_v25 = vsel %vm3708_vm13, %v6463_v44, %v6112_v52  ;;  %v3509_v16 = vsel %vm3504_vm1, %v12990_v30, %v12989_v24  ;;  %v12992_v44 = vld [vmem:[#allocation38_spill] sm:$0xff]  ;;  %v13006_v56 = vld [vmem:[#allocation53_spill] sm:$0xff]  ;;  %v3525_v24 = vsel %vm3521_vm2, %v3508_v50, %v13013_v29  ;;  %v13032_v29 = vld [vmem:[#allocation136_spill] sm:$0xff] }
 0x51e   : > { %v3512_v53 = vsel %vm3504_vm1, %v12992_v44, %v12991_v43  ;;  %v3517_v52 = vsel %vm3504_vm1, %v13006_v56, %v13005_v1  ;;  %v13014_v44 = vld [vmem:[#allocation118_spill] sm:$0xff]  ;;  %v13024_v1 = vld [vmem:[#allocation128_spill] sm:$0xff] }
 0x51f   : > { %v11460_v39 = vpop.permute.xlu1 %6117  ;;  %v3524_v49 = vsel %vm3521_vm2, %v3507_v14, %v13014_v44  ;;  %v13018_v50 = vld [vmem:[#allocation122_spill] sm:$0xff] }
 0x520   : > { %v11462_v45 = vpop.permute.xlu0 %6115  ;;  %v13034_v44 = vld [vmem:[#allocation138_spill] sm:$0xff] }
 0x523   : > { %v6122_v5 = vpop.permute.xlu1 %6121 }
 0x524   : > { %v11465_v27 = vsel %vm3708_vm13, %v6468_v20, %v6122_v5  ;;  %v6120_v12 = vpop.permute.xlu0 %6119  ;;  %v3514_v20 = vsel %vm3504_vm1, %v12996_v23, %v12995_v7  ;;  %v13007_v5 = vld [vmem:[#allocation113_spill] sm:$0xff]  ;;  %v3527_v7 = vsel %vm3521_vm2, %v3510_v42, %v13015_v3  ;;  %v13016_v23 = vld [vmem:[#allocation120_spill] sm:$0xff]  ;;  %v3533_v42 = vsel %vm3521_vm2, %v3516_v35, %v13021_v60  ;;  %v13035_v3 = vld [vmem:[#allocation139_spill] sm:$0xff] }
 0x525   : > { %v11468_v22 = vsel %vm3708_vm13, %v6467_v8, %v6120_v12  ;;  %v3513_v8 = vsel %vm3504_vm1, %v12998_v38, %v12997_v48  ;;  %v13008_v12 = vld [vmem:[#allocation54_spill] sm:$0xff]  ;;  %v3526_v48 = vsel %vm3521_vm2, %v3509_v16, %v13016_v23  ;;  %v3529_v38 = vsel %vm3521_vm2, %v3512_v53, %v13017_v36  ;;  %v13036_v36 = vld [vmem:[#allocation140_spill] sm:$0xff] }
 0x526   : > { %v3520_v46 = vsel %vm3504_vm1, %v13008_v12, %v13007_v5  ;;  %v3531_v58 = vsel %vm3521_vm2, %v3514_v20, %v13019_v51  ;;  %v3530_v14 = vsel %vm3521_vm2, %v3513_v8, %v13020_v2  ;;  %v3532_v16 = vsel %vm3521_vm2, %v3515_v63, %v13022_v9  ;;  %v13026_v5 = vld [vmem:[#allocation130_spill] sm:$0xff]  ;;  %v13027_v12 = vld [vmem:[#allocation131_spill] sm:$0xff]  ;;  %v13040_v60 = vld [vmem:[#allocation144_spill] sm:$0xff] }
 0x527   : > { %v11470_v47 = vpop.permute.xlu1 %6125  ;;  %v3534_v53 = vsel %vm3521_vm2, %v3517_v52, %v13024_v1  ;;  %v3536_v8 = vsel %vm3521_vm2, %v3519_v15, %v13026_v5  ;;  %v3540_v35 = vsel %vm3538_vm3, %v3523_v21, %v13027_v12  ;;  %v3539_v63 = vsel %vm3538_vm3, %v3522_v32, %v13028_v40  ;;  %v13030_v52 = vld [vmem:[#allocation134_spill] sm:$0xff]  ;;  %v13039_v2 = vld [vmem:[#allocation143_spill] sm:$0xff]  ;;  %v13044_v5 = vld [vmem:[#allocation148_spill] sm:$0xff] }
 0x528   : > { %v11484_v0 = vpop.permute.xlu0 %6123  ;;  %v3541_v37 = vsel %vm3538_vm3, %v3524_v49, %v13030_v52  ;;  %v3543_v15 = vsel %vm3538_vm3, %v3526_v48, %v13032_v29  ;;  %v3548_v23 = vsel %vm3538_vm3, %v3531_v58, %v13035_v3  ;;  %v13038_v51 = vld [vmem:[#allocation142_spill] sm:$0xff]  ;;  %v13045_v12 = vld [vmem:[#allocation149_spill] sm:$0xff]  ;;  %v13049_v52 = vld [vmem:[#allocation152_spill] sm:$0xff]  ;;  %vm6680_vm1 = vcmask 261120  }
 0x529   : > { %v13042_v58 = vld [vmem:[#allocation146_spill] sm:$0xff] }
 0x52a   : > { %v3553_v1 = vsel %vm3538_vm3, %v3536_v8, %v13042_v58  ;;  %v13046_v40 = vld [vmem:[#allocation150_spill] sm:$0xff] }
 0x52b   : > { %v6130_v55 = vpop.permute.xlu1 %6129 }
 0x52c   : > { %v11529_v30 = vsel %vm3708_vm13, %v6472_v41, %v6130_v55  ;;  %v6128_v43 = vpop.permute.xlu0 %6127  ;;  %v3528_v41 = vsel %vm3521_vm2, %v3511_v6, %v13018_v50  ;;  %v13025_v6 = vld [vmem:[#allocation129_spill] sm:$0xff] }
 0x52d   : > { %v11538_v11 = vsel %vm3708_vm13, %v6471_v4, %v6128_v43  ;;  %v13023_v4 = vld [vmem:[#allocation127_spill] sm:$0xff]  ;;  %v3537_v20 = vsel %vm3521_vm2, %v3520_v46, %v13025_v6  ;;  %v3544_v46 = vsel %vm3538_vm3, %v3527_v7, %v13031_v34  ;;  %v13033_v43 = vld [vmem:[#allocation137_spill] sm:$0xff]  ;;  %v3545_v32 = vsel %vm3538_vm3, %v3528_v41, %v13034_v44 }
 0x52e   : > { %v3535_v28 = vsel %vm3521_vm2, %v3518_v18, %v13023_v4  ;;  %v13029_v18 = vld [vmem:[#allocation133_spill] sm:$0xff]  ;;  %v3546_v21 = vsel %vm3538_vm3, %v3529_v38, %v13033_v43  ;;  %v3549_v7 = vsel %vm3538_vm3, %v3532_v16, %v13038_v51  ;;  %v3551_v38 = vsel %vm3538_vm3, %v3534_v53, %v13040_v60 }
 0x52f   : > { %v11556_v56 = vpop.permute.xlu1 %6133  ;;  %v3542_v55 = vsel %vm3538_vm3, %v3525_v24, %v13029_v18  ;;  %v3547_v24 = vsel %vm3538_vm3, %v3530_v14, %v13036_v36  ;;  %v13037_v50 = vld [vmem:[#allocation141_spill] sm:$0xff]  ;;  %v3552_v48 = vsel %vm3538_vm3, %v3535_v28, %v13039_v2  ;;  %v13043_v14 = vld [vmem:[#allocation147_spill] sm:$0xff]  ;;  %v3556_v28 = vsel %vm3555_vm4, %v3539_v63, %v13044_v5  ;;  %v13051_v63 = vld [vmem:[#allocation154_spill] sm:$0xff] }
 0x530   : > { %v11566_v54 = vpop.permute.xlu0 %6131  ;;  %v3550_v49 = vsel %vm3538_vm3, %v3533_v42, %v13037_v50  ;;  %v13041_v41 = vld [vmem:[#allocation145_spill] sm:$0xff]  ;;  %v3557_v6 = vsel %vm3555_vm4, %v3540_v35, %v13043_v14  ;;  %v3559_v53 = vsel %vm3555_vm4, %v3542_v55, %v13045_v12  ;;  %v13048_v18 = vld [vmem:[#allocation151_spill] sm:$0xff]  ;;  %v3562_v43 = vsel %vm3555_vm4, %v3545_v32, %v13051_v63  ;;  %v13055_v50 = vld [vmem:[#allocation18_spill] sm:$0xff] }
 0x531   : > { %v3554_v4 = vsel %vm3538_vm3, %v3537_v20, %v13041_v41  ;;  %v3558_v20 = vsel %vm3555_vm4, %v3541_v37, %v13046_v40  ;;  %v3561_v35 = vsel %vm3555_vm4, %v3544_v46, %v13048_v18  ;;  %v13050_v34 = vld [vmem:[#allocation153_spill] sm:$0xff]  ;;  %v13052_v55 = vld [vmem:[#allocation155_spill] sm:$0xff]  ;;  %v13053_v37 = vld [vmem:[#allocation156_spill] sm:$0xff]  ;;  %v3566_v46 = vsel %vm3555_vm4, %v3549_v7, %v13055_v50 }
 0x532   : > { %v3563_v29 = vsel %vm3555_vm4, %v3546_v21, %v13050_v34  ;;  %v3565_v44 = vsel %vm3555_vm4, %v3548_v23, %v13052_v55  ;;  %v3564_v3 = vsel %vm3555_vm4, %v3547_v24, %v13053_v37  ;;  %v13058_v2 = vld [vmem:[#allocation17_spill] sm:$0xff]  ;;  %v13063_v7 = vld [vmem:[#allocation19_spill] sm:$0xff]  ;;  %v13065_v5 = vld [vmem:[#allocation22_spill] sm:$0xff] }
 0x533   : > { %v6138_v9 = vpop.permute.xlu1 %6137  ;;  %v3568_v32 = vsel %vm3555_vm4, %v3551_v38, %v13058_v2  ;;  %v13059_v60 = vld [vmem:[#allocation9_spill] sm:$0xff]  ;;  %v3573_v14 = vsel %vm3572_vm5, %v3556_v28, %v13063_v7  ;;  %v3575_v38 = vsel %vm3572_vm5, %v3558_v20, %v13065_v5  ;;  %v13066_v12 = vld [vmem:[#allocation14_spill] sm:$0xff]  ;;  %v13069_v34 = vld [vmem:[#allocation16_spill] sm:$0xff] }
 0x534   : > { %v11600_v42 = vsel %vm3708_vm13, %v11443_v61, %v6138_v9  ;;  %v6136_v16 = vpop.permute.xlu0 %6135  ;;  %v3560_v61 = vsel %vm3555_vm4, %v3543_v15, %v13049_v52  ;;  %v13057_v15 = vld [vmem:[#allocation10_spill] sm:$0xff]  ;;  %v3571_v23 = vsel %vm3555_vm4, %v3554_v4, %v13059_v60  ;;  %v13060_v9 = vld [vmem:[#allocation20_spill] sm:$0xff]  ;;  %v3578_v4 = vsel %vm3572_vm5, %v3561_v35, %v13066_v12  ;;  %v13067_v40 = vld [vmem:[#allocation21_spill] sm:$0xff] }
 0x535   : > { %v11610_v8 = vsel %vm3708_vm13, %v11446_v13, %v6136_v16  ;;  %v13054_v13 = vld [vmem:[#allocation8_spill] sm:$0xff]  ;;  %v3569_v21 = vsel %vm3555_vm4, %v3552_v48, %v13057_v15  ;;  %v3570_v24 = vsel %vm3555_vm4, %v3553_v1, %v13060_v9  ;;  %v13064_v16 = vld [vmem:[#allocation11_spill] sm:$0xff]  ;;  %v3577_v1 = vsel %vm3572_vm5, %v3560_v61, %v13067_v40  ;;  %v13068_v18 = vld [vmem:[#allocation13_spill] sm:$0xff] }
 0x536   : > { %13047 = vst [vmem:[#allocation312_spill] sm:$0xff] %v11610_v8  ;;  %v3567_v36 = vsel %vm3555_vm4, %v3550_v49, %v13054_v13  ;;  %v13062_v49 = vld [vmem:[#allocation12_spill] sm:$0xff]  ;;  %v3576_v48 = vsel %vm3572_vm5, %v3559_v53, %v13064_v16  ;;  %v3580_v52 = vsel %vm3572_vm5, %v3563_v29, %v13068_v18  ;;  %v13070_v63 = vld [vmem:[#allocation23_spill] sm:$0xff]  ;;  %v13072_v37 = vld [vmem:[#allocation157_spill] sm:$0xff] }
 0x537   : > { %v11628_v51 = vpop.permute.xlu1 %6141  ;;  %v3574_v58 = vsel %vm3572_vm5, %v3557_v6, %v13062_v49  ;;  %v3579_v6 = vsel %vm3572_vm5, %v3562_v43, %v13069_v34  ;;  %v3582_v28 = vsel %vm3572_vm5, %v3565_v44, %v13070_v63  ;;  %v13071_v55 = vld [vmem:[#allocation15_spill] sm:$0xff]  ;;  %v3584_v20 = vsel %vm3572_vm5, %v3567_v36, %v13072_v37  ;;  %v13073_v13 = vld [vmem:[#allocation158_spill] sm:$0xff]  ;;  %v13075_v15 = vld [vmem:[#allocation160_spill] sm:$0xff] }
 0x538   : > { %13056 = vst [vmem:[#allocation48_spill] sm:$0xff] %v11628_v51  ;;  %v11638_v41 = vpop.permute.xlu0 %6139  ;;  %v3581_v53 = vsel %vm3572_vm5, %v3564_v3, %v13071_v55  ;;  %v3583_v35 = vsel %vm3572_vm5, %v3566_v46, %v13073_v13  ;;  %v13074_v61 = vld [vmem:[#allocation159_spill] sm:$0xff]  ;;  %v3585_v43 = vsel %vm3572_vm5, %v3568_v32, %v13075_v15  ;;  %v13076_v2 = vld [vmem:[#allocation161_spill] sm:$0xff]  ;;  %v13077_v60 = vld [vmem:[#allocation162_spill] sm:$0xff] }
 0x539   : > { %13061 = vst [vmem:[#allocation313_spill] sm:$0xff] %v11638_v41  ;;  %v3586_v29 = vsel %vm3572_vm5, %v3569_v21, %v13074_v61  ;;  %v3588_v44 = vsel %vm3572_vm5, %v3571_v23, %v13076_v2  ;;  %v3587_v3 = vsel %vm3572_vm5, %v3570_v24, %v13077_v60  ;;  %v13078_v36 = vld [vmem:[#allocation163_spill] sm:$0xff]  ;;  %v13079_v46 = vld [vmem:[#allocation164_spill] sm:$0xff]  ;;  %v13080_v16 = vld [vmem:[#allocation165_spill] sm:$0xff] }
 0x53a   : > { %v3591_v49 = vsel %vm3589_vm6, %v3574_v58, %v13078_v36  ;;  %v3590_v7 = vsel %vm3589_vm6, %v3573_v14, %v13079_v46  ;;  %v3593_v21 = vsel %vm3589_vm6, %v3576_v48, %v13080_v16  ;;  %v13081_v5 = vld [vmem:[#allocation166_spill] sm:$0xff]  ;;  %v13082_v12 = vld [vmem:[#allocation167_spill] sm:$0xff]  ;;  %v13083_v40 = vld [vmem:[#allocation168_spill] sm:$0xff] }
 0x53b   : > { %v11664_v50 = vpop.permute.xlu1 %6177  ;;  %v3592_v32 = vsel %vm3589_vm6, %v3575_v38, %v13081_v5  ;;  %v3595_v23 = vsel %vm3589_vm6, %v3578_v4, %v13082_v12  ;;  %v3594_v24 = vsel %vm3589_vm6, %v3577_v1, %v13083_v40  ;;  %v13084_v18 = vld [vmem:[#allocation169_spill] sm:$0xff]  ;;  %v13085_v63 = vld [vmem:[#allocation170_spill] sm:$0xff]  ;;  %v13086_v55 = vld [vmem:[#allocation171_spill] sm:$0xff] }
 0x53c   : > { %v11674_v9 = vpop.permute.xlu0 %6175  ;;  %v3597_v34 = vsel %vm3589_vm6, %v3580_v52, %v13084_v18  ;;  %v3596_v58 = vsel %vm3589_vm6, %v3579_v6, %v13085_v63  ;;  %v3599_v14 = vsel %vm3589_vm6, %v3582_v28, %v13086_v55  ;;  %v13087_v37 = vld [vmem:[#allocation172_spill] sm:$0xff]  ;;  %v13088_v13 = vld [vmem:[#allocation173_spill] sm:$0xff]  ;;  %v13089_v61 = vld [vmem:[#allocation174_spill] sm:$0xff] }
 0x53d   : > { %v3598_v48 = vsel %vm3589_vm6, %v3581_v53, %v13087_v37  ;;  %v3601_v38 = vsel %vm3589_vm6, %v3584_v20, %v13088_v13  ;;  %v3600_v4 = vsel %vm3589_vm6, %v3583_v35, %v13089_v61  ;;  %v13090_v1 = vld [vmem:[#allocation175_spill] sm:$0xff]  ;;  %v13091_v2 = vld [vmem:[#allocation176_spill] sm:$0xff]  ;;  %v13092_v60 = vld [vmem:[#allocation177_spill] sm:$0xff] }
 0x53e   : > { %v3603_v52 = vsel %vm3589_vm6, %v3586_v29, %v13090_v1  ;;  %v3602_v6 = vsel %vm3589_vm6, %v3585_v43, %v13091_v2  ;;  %v3605_v28 = vsel %vm3589_vm6, %v3588_v44, %v13092_v60  ;;  %v13093_v36 = vld [vmem:[#allocation178_spill] sm:$0xff]  ;;  %v13094_v20 = vld [vmem:[#allocation179_spill] sm:$0xff]  ;;  %v13095_v35 = vld [vmem:[#allocation180_spill] sm:$0xff] }
 0x53f   : > { %v11700_v15 = vpop.permute.xlu1 %6181  ;;  %v3604_v53 = vsel %vm3589_vm6, %v3587_v3, %v13093_v36  ;;  %v3608_v16 = vsel %vm3606_vm7, %v3591_v49, %v13094_v20  ;;  %v3607_v5 = vsel %vm3606_vm7, %v3590_v7, %v13095_v35  ;;  %v13096_v12 = vld [vmem:[#allocation181_spill] sm:$0xff]  ;;  %v13097_v40 = vld [vmem:[#allocation182_spill] sm:$0xff]  ;;  %v13098_v18 = vld [vmem:[#allocation183_spill] sm:$0xff] }
 0x540   : > { %v11710_v46 = vpop.permute.xlu0 %6179  ;;  %v3610_v29 = vsel %vm3606_vm7, %v3593_v21, %v13096_v12  ;;  %v3609_v43 = vsel %vm3606_vm7, %v3592_v32, %v13097_v40  ;;  %v3612_v44 = vsel %vm3606_vm7, %v3595_v23, %v13098_v18  ;;  %v13099_v63 = vld [vmem:[#allocation184_spill] sm:$0xff]  ;;  %v13100_v55 = vld [vmem:[#allocation185_spill] sm:$0xff]  ;;  %v13101_v13 = vld [vmem:[#allocation186_spill] sm:$0xff] }
 0x541   : > { %v3611_v3 = vsel %vm3606_vm7, %v3594_v24, %v13099_v63  ;;  %v3614_v37 = vsel %vm3606_vm7, %v3597_v34, %v13100_v55  ;;  %v3613_v49 = vsel %vm3606_vm7, %v3596_v58, %v13101_v13  ;;  %v13102_v61 = vld [vmem:[#allocation187_spill] sm:$0xff]  ;;  %v13103_v1 = vld [vmem:[#allocation188_spill] sm:$0xff]  ;;  %v13104_v2 = vld [vmem:[#allocation189_spill] sm:$0xff] }
 0x542   : > { %v3616_v7 = vsel %vm3606_vm7, %v3599_v14, %v13102_v61  ;;  %v3615_v21 = vsel %vm3606_vm7, %v3598_v48, %v13103_v1  ;;  %v3618_v32 = vsel %vm3606_vm7, %v3601_v38, %v13104_v2  ;;  %v13105_v60 = vld [vmem:[#allocation190_spill] sm:$0xff]  ;;  %v13106_v24 = vld [vmem:[#allocation191_spill] sm:$0xff]  ;;  %v13107_v20 = vld [vmem:[#allocation192_spill] sm:$0xff] }
 0x543   : > { %v3617_v23 = vsel %vm3606_vm7, %v3600_v4, %v13105_v60  ;;  %v11736_v36 = vpop.permute.xlu1 %6185  ;;  %v3620_v34 = vsel %vm3606_vm7, %v3603_v52, %v13106_v24  ;;  %v3619_v58 = vsel %vm3606_vm7, %v3602_v6, %v13107_v20  ;;  %v13108_v35 = vld [vmem:[#allocation193_spill] sm:$0xff]  ;;  %v13109_v12 = vld [vmem:[#allocation194_spill] sm:$0xff]  ;;  %v13110_v38 = vld [vmem:[#allocation195_spill] sm:$0xff] }
 0x544   : > { %v3622_v14 = vsel %vm3606_vm7, %v3605_v28, %v13108_v35  ;;  %v3621_v48 = vsel %vm3606_vm7, %v3604_v53, %v13109_v12  ;;  %v11746_v40 = vpop.permute.xlu0 %6183  ;;  %v3625_v18 = vsel %vm3623_vm8, %v3608_v16, %v13110_v38  ;;  %v13111_v4 = vld [vmem:[#allocation196_spill] sm:$0xff]  ;;  %v13112_v55 = vld [vmem:[#allocation197_spill] sm:$0xff]  ;;  %v13113_v13 = vld [vmem:[#allocation198_spill] sm:$0xff] }
 0x545   : > { %v3624_v63 = vsel %vm3623_vm8, %v3607_v5, %v13111_v4  ;;  %v3627_v52 = vsel %vm3623_vm8, %v3610_v29, %v13112_v55  ;;  %v3626_v6 = vsel %vm3623_vm8, %v3609_v43, %v13113_v13  ;;  %v13114_v61 = vld [vmem:[#allocation199_spill] sm:$0xff]  ;;  %v13115_v1 = vld [vmem:[#allocation200_spill] sm:$0xff]  ;;  %v13116_v2 = vld [vmem:[#allocation201_spill] sm:$0xff] }
 0x546   : > { %v3629_v28 = vsel %vm3623_vm8, %v3612_v44, %v13114_v61  ;;  %v3628_v53 = vsel %vm3623_vm8, %v3611_v3, %v13115_v1  ;;  %v3631_v60 = vsel %vm3623_vm8, %v3614_v37, %v13116_v2  ;;  %v13117_v24 = vld [vmem:[#allocation202_spill] sm:$0xff]  ;;  %v13118_v20 = vld [vmem:[#allocation203_spill] sm:$0xff]  ;;  %v13119_v35 = vld [vmem:[#allocation204_spill] sm:$0xff] }
 0x547   : > { %v3630_v16 = vsel %vm3623_vm8, %v3613_v49, %v13117_v24  ;;  %v3633_v5 = vsel %vm3623_vm8, %v3616_v7, %v13118_v20  ;;  %v3632_v29 = vsel %vm3623_vm8, %v3615_v21, %v13119_v35  ;;  %v13120_v12 = vld [vmem:[#allocation205_spill] sm:$0xff]  ;;  %v13121_v38 = vld [vmem:[#allocation206_spill] sm:$0xff]  ;;  %v11772_v4 = vpop.permute.xlu1 %6189  ;;  %v13122_v3 = vld [vmem:[#allocation207_spill] sm:$0xff] }
 0x548   : > { %v3635_v43 = vsel %vm3623_vm8, %v3618_v32, %v13120_v12  ;;  %v3634_v44 = vsel %vm3623_vm8, %v3617_v23, %v13121_v38  ;;  %v3637_v37 = vsel %vm3623_vm8, %v3620_v34, %v13122_v3  ;;  %v13123_v55 = vld [vmem:[#allocation208_spill] sm:$0xff]  ;;  %v13124_v13 = vld [vmem:[#allocation209_spill] sm:$0xff]  ;;  %v13125_v61 = vld [vmem:[#allocation210_spill] sm:$0xff]  ;;  %v11782_v1 = vpop.permute.xlu0 %6187 }
 0x549   : > { %v3636_v49 = vsel %vm3623_vm8, %v3619_v58, %v13123_v55  ;;  %v3639_v7 = vsel %vm3623_vm8, %v3622_v14, %v13124_v13  ;;  %v3638_v21 = vsel %vm3623_vm8, %v3621_v48, %v13125_v61  ;;  %v13126_v32 = vld [vmem:[#allocation211_spill] sm:$0xff]  ;;  %v13127_v23 = vld [vmem:[#allocation212_spill] sm:$0xff]  ;;  %v13128_v20 = vld [vmem:[#allocation213_spill] sm:$0xff] }
 0x54a   : > { %v3642_v2 = vsel %vm3640_vm9, %v3625_v18, %v13126_v32  ;;  %v3641_v24 = vsel %vm3640_vm9, %v3624_v63, %v13127_v23  ;;  %v3644_v34 = vsel %vm3640_vm9, %v3627_v52, %v13128_v20  ;;  %v13129_v35 = vld [vmem:[#allocation214_spill] sm:$0xff]  ;;  %v13130_v12 = vld [vmem:[#allocation215_spill] sm:$0xff]  ;;  %v13131_v38 = vld [vmem:[#allocation216_spill] sm:$0xff] }
 0x54b   : > { %v3643_v58 = vsel %vm3640_vm9, %v3626_v6, %v13129_v35  ;;  %v3646_v14 = vsel %vm3640_vm9, %v3629_v28, %v13130_v12  ;;  %v3645_v48 = vsel %vm3640_vm9, %v3628_v53, %v13131_v38  ;;  %v13132_v3 = vld [vmem:[#allocation217_spill] sm:$0xff]  ;;  %v13133_v13 = vld [vmem:[#allocation218_spill] sm:$0xff]  ;;  %v13134_v61 = vld [vmem:[#allocation219_spill] sm:$0xff]  ;;  %v11808_v35 = vpop.permute.xlu1 %6193 }
 0x54c   : > { %v3648_v55 = vsel %vm3640_vm9, %v3631_v60, %v13132_v3  ;;  %v3647_v18 = vsel %vm3640_vm9, %v3630_v16, %v13133_v13  ;;  %v3650_v63 = vsel %vm3640_vm9, %v3633_v5, %v13134_v61  ;;  %v13135_v32 = vld [vmem:[#allocation220_spill] sm:$0xff]  ;;  %v13136_v23 = vld [vmem:[#allocation221_spill] sm:$0xff]  ;;  %v13137_v20 = vld [vmem:[#allocation222_spill] sm:$0xff]  ;;  %v11818_v13 = vpop.permute.xlu0 %6191 }
 0x54d   : > { %v3649_v52 = vsel %vm3640_vm9, %v3632_v29, %v13135_v32  ;;  %v3652_v6 = vsel %vm3640_vm9, %v3635_v43, %v13136_v23  ;;  %v3651_v28 = vsel %vm3640_vm9, %v3634_v44, %v13137_v20  ;;  %v13138_v53 = vld [vmem:[#allocation223_spill] sm:$0xff]  ;;  %v13139_v12 = vld [vmem:[#allocation224_spill] sm:$0xff]  ;;  %v13140_v38 = vld [vmem:[#allocation225_spill] sm:$0xff] }
 0x54e   : > { %v3654_v60 = vsel %vm3640_vm9, %v3637_v37, %v13138_v53  ;;  %v3653_v16 = vsel %vm3640_vm9, %v3636_v49, %v13139_v12  ;;  %v3656_v5 = vsel %vm3640_vm9, %v3639_v7, %v13140_v38  ;;  %v13141_v3 = vld [vmem:[#allocation226_spill] sm:$0xff]  ;;  %v13142_v43 = vld [vmem:[#allocation227_spill] sm:$0xff]  ;;  %v13143_v44 = vld [vmem:[#allocation228_spill] sm:$0xff] }
 0x54f   : > { %v3655_v29 = vsel %vm3640_vm9, %v3638_v21, %v13141_v3  ;;  %v3659_v61 = vsel %vm3657_vm10, %v3642_v2, %v13142_v43  ;;  %v3658_v32 = vsel %vm3657_vm10, %v3641_v24, %v13143_v44  ;;  %v13144_v23 = vld [vmem:[#allocation229_spill] sm:$0xff]  ;;  %v13145_v20 = vld [vmem:[#allocation230_spill] sm:$0xff]  ;;  %v13146_v53 = vld [vmem:[#allocation231_spill] sm:$0xff]  ;;  %v3664_v2 = vsel %vm3657_vm10, %v3647_v18, %v13149_v33 }
 0x550   : > { %v3661_v37 = vsel %vm3657_vm10, %v3644_v34, %v13144_v23  ;;  %v3660_v49 = vsel %vm3657_vm10, %v3643_v58, %v13145_v20  ;;  %v3663_v7 = vsel %vm3657_vm10, %v3646_v14, %v13146_v53  ;;  %v13147_v12 = vld [vmem:[#allocation232_spill] sm:$0xff]  ;;  %v13148_v38 = vld [vmem:[#allocation233_spill] sm:$0xff]  ;;  %v13150_v43 = vld [vmem:[#allocation235_spill] sm:$0xff]  ;;  %v11844_v53 = vpop.permute.xlu1 %6197 }
 0x551   : > { %v3662_v21 = vsel %vm3657_vm10, %v3645_v48, %v13147_v12  ;;  %v3665_v3 = vsel %vm3657_vm10, %v3648_v55, %v13148_v38  ;;  %v3667_v24 = vsel %vm3657_vm10, %v3650_v63, %v13150_v43  ;;  %v13151_v44 = vld [vmem:[#allocation236_spill] sm:$0xff]  ;;  %v13152_v23 = vld [vmem:[#allocation237_spill] sm:$0xff]  ;;  %v13153_v20 = vld [vmem:[#allocation238_spill] sm:$0xff]  ;;  %v11854_v43 = vpop.permute.xlu0 %6195 }
 0x552   : > { %v3666_v34 = vsel %vm3657_vm10, %v3649_v52, %v13151_v44  ;;  %v3669_v58 = vsel %vm3657_vm10, %v3652_v6, %v13152_v23  ;;  %v3668_v14 = vsel %vm3657_vm10, %v3651_v28, %v13153_v20  ;;  %v13154_v48 = vld [vmem:[#allocation239_spill] sm:$0xff]  ;;  %v13155_v12 = vld [vmem:[#allocation240_spill] sm:$0xff]  ;;  %v13156_v18 = vld [vmem:[#allocation241_spill] sm:$0xff] }
 0x553   : > { %v3671_v55 = vsel %vm3657_vm10, %v3654_v60, %v13154_v48  ;;  %v3670_v33 = vsel %vm3657_vm10, %v3653_v16, %v13155_v12  ;;  %v3673_v63 = vsel %vm3657_vm10, %v3656_v5, %v13156_v18  ;;  %v13157_v38 = vld [vmem:[#allocation242_spill] sm:$0xff]  ;;  %v13158_v6 = vld [vmem:[#allocation243_spill] sm:$0xff]  ;;  %v13159_v28 = vld [vmem:[#allocation244_spill] sm:$0xff] }
 0x554   : > { %v3672_v52 = vsel %vm3657_vm10, %v3655_v29, %v13157_v38  ;;  %v3676_v44 = vsel %vm3674_vm11, %v3659_v61, %v13158_v6  ;;  %v3675_v23 = vsel %vm3674_vm11, %v3658_v32, %v13159_v28  ;;  %v13160_v20 = vld [vmem:[#allocation245_spill] sm:$0xff]  ;;  %v13161_v48 = vld [vmem:[#allocation246_spill] sm:$0xff]  ;;  %v13162_v12 = vld [vmem:[#allocation247_spill] sm:$0xff]  ;;  %v3681_v61 = vsel %vm3674_vm11, %v3664_v2, %v13165_v17 }
 0x555   : > { %v3678_v60 = vsel %vm3674_vm11, %v3661_v37, %v13160_v20  ;;  %v3677_v16 = vsel %vm3674_vm11, %v3660_v49, %v13161_v48  ;;  %v3680_v5 = vsel %vm3674_vm11, %v3663_v7, %v13162_v12  ;;  %v13163_v18 = vld [vmem:[#allocation248_spill] sm:$0xff]  ;;  %v13164_v38 = vld [vmem:[#allocation249_spill] sm:$0xff]  ;;  %v13166_v32 = vld [vmem:[#allocation251_spill] sm:$0xff] }
 0x556   : > { %v3679_v29 = vsel %vm3674_vm11, %v3662_v21, %v13163_v18  ;;  %v3682_v41 = vsel %vm3674_vm11, %v3665_v3, %v13164_v38  ;;  %v3684_v6 = vsel %vm3674_vm11, %v3667_v24, %v13166_v32  ;;  %v13167_v37 = vld [vmem:[#allocation252_spill] sm:$0xff]  ;;  %v13168_v49 = vld [vmem:[#allocation253_spill] sm:$0xff]  ;;  %v13169_v7 = vld [vmem:[#allocation254_spill] sm:$0xff]  ;;  %v11880_v21 = vpop.permute.xlu1 %6201  ;;  %v11890_v32 = vpop.permute.xlu0 %6199 }
 0x557   : > { %v3683_v28 = vsel %vm3674_vm11, %v3666_v34, %v13167_v37  ;;  %v3686_v20 = vsel %vm3674_vm11, %v3669_v58, %v13168_v49  ;;  %v3685_v48 = vsel %vm3674_vm11, %v3668_v14, %v13169_v7  ;;  %v13170_v3 = vld [vmem:[#allocation255_spill] sm:$0xff]  ;;  %v13171_v17 = vld [vmem:[#allocation256_spill] sm:$0xff]  ;;  %v13172_v18 = vld [vmem:[#allocation257_spill] sm:$0xff] }
 0x558   : > { %v3688_v12 = vsel %vm3674_vm11, %v3671_v55, %v13170_v3  ;;  %v3687_v2 = vsel %vm3674_vm11, %v3670_v33, %v13171_v17  ;;  %v3690_v24 = vsel %vm3674_vm11, %v3673_v63, %v13172_v18  ;;  %v13173_v38 = vld [vmem:[#allocation258_spill] sm:$0xff]  ;;  %v13174_v58 = vld [vmem:[#allocation259_spill] sm:$0xff]  ;;  %v13175_v37 = vld [vmem:[#allocation260_spill] sm:$0xff] }
 0x559   : > { %v3689_v34 = vsel %vm3674_vm11, %v3672_v52, %v13173_v38  ;;  %v3693_v14 = vsel %vm3691_vm12, %v3676_v44, %v13174_v58  ;;  %v3692_v49 = vsel %vm3691_vm12, %v3675_v23, %v13175_v37  ;;  %v13176_v7 = vld [vmem:[#allocation261_spill] sm:$0xff]  ;;  %v13177_v3 = vld [vmem:[#allocation262_spill] sm:$0xff]  ;;  %v13181_v8 = vld [vmem:[#allocation76_spill] sm:$0xff] }
 0x55a   : > { %v3695_v55 = vsel %vm3691_vm12, %v3678_v60, %v13176_v7  ;;  %v3694_v33 = vsel %vm3691_vm12, %v3677_v16, %v13177_v3  ;;  %v13178_v17 = vld [vmem:[#allocation73_spill] sm:$0xff]  ;;  %v13180_v38 = vld [vmem:[#allocation78_spill] sm:$0xff]  ;;  %v3698_v44 = vsel %vm3691_vm12, %v3681_v61, %v13181_v8  ;;  %v13183_v37 = vld [vmem:[#allocation80_spill] sm:$0xff] }
 0x55b   : > { %v3697_v63 = vsel %vm3691_vm12, %v3680_v5, %v13178_v17  ;;  %v13179_v18 = vld [vmem:[#allocation29_spill] sm:$0xff]  ;;  %v3699_v51 = vsel %vm3691_vm12, %v3682_v41, %v13180_v38  ;;  %v13182_v58 = vld [vmem:[#allocation82_spill] sm:$0xff]  ;;  %v3700_v60 = vsel %vm3691_vm12, %v3683_v28, %v13183_v37  ;;  %v13185_v3 = vld [vmem:[#allocation84_spill] sm:$0xff]  ;;  %v11916_v17 = vpop.permute.xlu1 %6205 }
 0x55c   : > { %v3696_v52 = vsel %vm3691_vm12, %v3679_v29, %v13179_v18  ;;  %v3701_v23 = vsel %vm3691_vm12, %v3684_v6, %v13182_v58  ;;  %v13184_v7 = vld [vmem:[#allocation86_spill] sm:$0xff]  ;;  %v3702_v5 = vsel %vm3691_vm12, %v3685_v48, %v13185_v3  ;;  %13186 = vst [vmem:[#allocation44_spill] sm:$0xff] %v11916_v17  ;;  %v13188_v18 = vld [vmem:[#allocation88_spill] sm:$0xff]  ;;  %v13199_v17 = vld [vmem:[#allocation269_spill] sm:$0xff] }
 0x55d   : > { %v3703_v16 = vsel %vm3691_vm12, %v3686_v20, %v13184_v7  ;;  %v13187_v29 = vld [vmem:[#allocation90_spill] sm:$0xff]  ;;  %v3704_v8 = vsel %vm3691_vm12, %v3687_v2, %v13188_v18  ;;  %v13190_v38 = vld [vmem:[#allocation92_spill] sm:$0xff]  ;;  %v11930_v20 = vpop.permute.xlu0 %6203  ;;  %v13195_v2 = vld [vmem:[#allocation265_spill] sm:$0xff] }
 0x55e   : > { %v3705_v41 = vsel %vm3691_vm12, %v3688_v12, %v13187_v29  ;;  %v13189_v61 = vld [vmem:[#allocation94_spill] sm:$0xff]  ;;  %v11928_v28 = vsel %vm3691_vm12, %v3689_v34, %v13190_v38  ;;  %13191 = vst [vmem:[#allocation314_spill] sm:$0xff] %v11930_v20  ;;  %v13193_v37 = vld [vmem:[#allocation96_spill] sm:$0xff]  ;;  %v13194_v12 = vld [vmem:[#allocation263_spill] sm:$0xff]  ;;  %v3711_v29 = vsel %vm3708_vm13, %v3694_v33, %v13195_v2 }
 0x55f   : > { %v11924_v6 = vsel %vm3691_vm12, %v3690_v24, %v13189_v61  ;;  %v13192_v58 = vld [vmem:[#allocation98_spill] sm:$0xff]  ;;  %v3709_v7 = vsel %vm3708_vm13, %v3692_v49, %v13193_v37  ;;  %v3712_v3 = vsel %vm3708_vm13, %v3695_v55, %v13194_v12  ;;  %v13197_v61 = vld [vmem:[#allocation267_spill] sm:$0xff]  ;;  %v13198_v38 = vld [vmem:[#allocation268_spill] sm:$0xff] }
 0x560   : > { %v3710_v48 = vsel %vm3708_vm13, %v3693_v14, %v13192_v58  ;;  %v13196_v24 = vld [vmem:[#allocation266_spill] sm:$0xff]  ;;  %v3713_v34 = vsel %vm3708_vm13, %v3696_v52, %v13197_v61  ;;  %v3716_v20 = vsel %vm3708_vm13, %v3699_v51, %v13198_v38  ;;  %v11948_v14 = vsel %vm3708_vm13, %v3698_v44, %v13199_v17  ;;  %v13201_v55 = vld [vmem:[#allocation271_spill] sm:$0xff]  ;;  %v13202_v37 = vld [vmem:[#allocation272_spill] sm:$0xff]  ;;  %v6242_v52 = vpop.permute.xlu1 %6241 }
 0x561   : > { %v3714_v18 = vsel %vm3708_vm13, %v3697_v63, %v13196_v24  ;;  %v13200_v49 = vld [vmem:[#allocation270_spill] sm:$0xff]  ;;  %v11956_v33 = vsel %vm3708_vm13, %v3700_v60, %v13201_v55  ;;  %v11960_v63 = vsel %vm3708_vm13, %v3703_v16, %v13202_v37  ;;  %v6496_v51 = vsel %vm3725_vm14, %v11455_v10, %v11664_v50  ;;  %v13203_v12 = vld [vmem:[#allocation273_spill] sm:$0xff]  ;;  %v6240_v17 = vpop.permute.xlu0 %6239  ;;  %v13208_v37 = vld [vmem:[#allocation295_spill] sm:$0xff] }
 0x562   : > { %v11952_v58 = vsel %vm3708_vm13, %v3701_v23, %v13200_v49  ;;  %v11967_v44 = vsel %vm3708_vm13, %v3702_v5, %v13203_v12  ;;  %v6495_v23 = vsel %vm3725_vm14, %v11458_v25, %v11674_v9  ;;  %v6512_v60 = vsel %vm3742_vm15, %v6496_v51, %v6242_v52  ;;  %v13204_v2 = vld [vmem:[#allocation274_spill] sm:$0xff]  ;;  %v13206_v5 = vld [vmem:[#allocation279_spill] sm:$0xff] }
 0x563   : > { %v11975_v16 = vsel %vm3708_vm13, %v3705_v41, %v13204_v2  ;;  %v13205_v24 = vld [vmem:[#allocation278_spill] sm:$0xff]  ;;  %v6544_v50 = vrot.slane %v6512_v60, 7  ;;  %v6511_v61 = vsel %vm3742_vm15, %v6495_v23, %v6240_v17  ;;  %v3726_v38 = vsel %vm3725_vm14, %v3709_v7, %v13206_v5  ;;  %v13209_v12 = vld [vmem:[#allocation275_spill] sm:$0xff]  ;;  %v13210_v2 = vld [vmem:[#allocation280_spill] sm:$0xff] }
 0x564   : > { %v3727_v10 = vsel %vm3725_vm14, %v3710_v48, %v13205_v24  ;;  %v13207_v49 = vld [vmem:[#allocation294_spill] sm:$0xff]  ;;  %v6482_v9 = vsel %vm3708_vm13, %v11403_v26, %v11460_v39  ;;  %v6543_v55 = vrot.slane %v6511_v61, 7  ;;  %v3743_v41 = vsel %vm3742_vm15, %v3726_v38, %v13208_v37  ;;  %v6246_v52 = vpop.permute.xlu1 %6245 }
 0x565   : > { %v3744_v25 = vsel %vm3742_vm15, %v3727_v10, %v13207_v49  ;;  %v6481_v48 = vsel %vm3708_vm13, %v11409_v59, %v11462_v45  ;;  %v6498_v51 = vsel %vm3725_vm14, %v6482_v9, %v11700_v15  ;;  %v11997_v23 = vsel %vm3708_vm13, %v3704_v8, %v13209_v12  ;;  %v6244_v17 = vpop.permute.xlu0 %6243  ;;  %v13211_v10 = vld [vmem:[#allocation281_spill] sm:$0xff]  ;;  %v13214_v49 = vld [vmem:[#allocation283_spill] sm:$0xff] }
 0x566   : > { %v6577_v7 = vsel %vm6575_vm0, %v3744_v25, %v6544_v50  ;;  %v6497_v26 = vsel %vm3725_vm14, %v6481_v48, %v11710_v46  ;;  %v6576_v39 = vsel %vm6575_vm0, %v3743_v41, %v6543_v55  ;;  %v6514_v60 = vsel %vm3742_vm15, %v6498_v51, %v6246_v52  ;;  %v13212_v50 = vld [vmem:[#allocation282_spill] sm:$0xff]  ;;  %v13213_v46 = vld [vmem:[#allocation296_spill] sm:$0xff]  ;;  %v13215_v9 = vld [vmem:[#allocation297_spill] sm:$0xff] }
 0x567   : > { %v3729_v59 = vsel %vm3725_vm14, %v3712_v3, %v13210_v2  ;;  %v6608_v45 = vcombine.low %v6576_v39, %v6577_v7  ;;  %v6546_v15 = vrot.slane %v6514_v60, 7  ;;  %v6513_v24 = vsel %vm3742_vm15, %v6497_v26, %v6244_v17  ;;  %v13216_v41 = vld [vmem:[#allocation284_spill] sm:$0xff]  ;;  %v13217_v52 = vld [vmem:[#allocation298_spill] sm:$0xff]  ;;  %v13218_v39 = vld [vmem:[#allocation299_spill] sm:$0xff] }
 0x568   : > { %v3728_v8 = vsel %vm3725_vm14, %v3711_v29, %v13211_v10  ;;  %v3731_v61 = vsel %vm3725_vm14, %v3714_v18, %v13212_v50  ;;  %v3746_v5 = vsel %vm3742_vm15, %v3729_v59, %v13213_v46  ;;  %v6545_v38 = vrot.slane %v6513_v24, 7  ;;  %v6250_v29 = vpop.permute.xlu1 %6249  ;;  %v13219_v2 = vld [vmem:[#allocation25_spill] sm:$0xff] }
 0x569   : > { %v3730_v25 = vsel %vm3725_vm14, %v3713_v34, %v13214_v49  ;;  %v3745_v3 = vsel %vm3742_vm15, %v3728_v8, %v13215_v9  ;;  %v6500_v55 = vsel %vm3725_vm14, %v11465_v27, %v11736_v36  ;;  %v6579_v37 = vsel %vm6575_vm0, %v3746_v5, %v6546_v15  ;;  %v6248_v7 = vpop.permute.xlu0 %6247  ;;  %v13221_v5 = vld [vmem:[#allocation285_spill] sm:$0xff]  ;;  %v13223_v9 = vld [vmem:[#allocation286_spill] sm:$0xff] }
 0x56a   : > { %v3733_v18 = vsel %vm3725_vm14, %v3716_v20, %v13216_v41  ;;  %v6499_v48 = vsel %vm3725_vm14, %v11468_v22, %v11746_v40  ;;  %v6578_v51 = vsel %vm6575_vm0, %v3745_v3, %v6545_v38  ;;  %v6516_v34 = vsel %vm3742_vm15, %v6500_v55, %v6250_v29  ;;  %v13222_v38 = vld [vmem:[#allocation300_spill] sm:$0xff]  ;;  %v13224_v55 = vld [vmem:[#allocation301_spill] sm:$0xff]  ;;  %v13225_v41 = vld [vmem:[#allocation287_spill] sm:$0xff] }
 0x56b   : > { %v3748_v12 = vsel %vm3742_vm15, %v3731_v61, %v13217_v52  ;;  %v6609_v27 = vcombine.low %v6578_v51, %v6579_v37  ;;  %v6548_v36 = vrot.slane %v6516_v34, 7  ;;  %v6515_v26 = vsel %vm3742_vm15, %v6499_v48, %v6248_v7  ;;  %v13226_v51 = vld [vmem:[#allocation302_spill] sm:$0xff] }
 0x56c   : > { %v3747_v20 = vsel %vm3742_vm15, %v3730_v25, %v13218_v39  ;;  %v6486_v22 = vsel %vm3708_vm13, %v11425_v57, %v11470_v47  ;;  %v6485_v40 = vsel %vm3708_vm13, %v11429_v19, %v11484_v0  ;;  %v6547_v60 = vrot.slane %v6515_v26, 7  ;;  %v6254_v10 = vpop.permute.xlu1 %6253 }
 0x56d   : > { %v6502_v17 = vsel %vm3725_vm14, %v6486_v22, %v11772_v4  ;;  %v6616_v59 = vrot.slane %v6608_v45, %v13219_v2  ;;  %v6623_v15 = vrot.slane %v6609_v27, %v13219_v2  ;;  %v6581_v24 = vsel %vm6575_vm0, %v3748_v12, %v6548_v36  ;;  %v6252_v19 = vpop.permute.xlu0 %6251  ;;  %v13220_v45 = vld [vmem:[#allocation276_spill] sm:$0xff]  ;;  %v13227_v27 = vld [vmem:[#allocation303_spill] sm:$0xff] }
 0x56e   : > { %v6501_v8 = vsel %vm3725_vm14, %v6485_v40, %v11782_v1  ;;  %v6580_v57 = vsel %vm6575_vm0, %v3747_v20, %v6547_v60  ;;  %v6518_v47 = vsel %vm3742_vm15, %v6502_v17, %v6254_v10  ;;  %v12052_v46 = vsel %vm3708_vm13, %v11924_v6, %v13220_v45  ;;  %v13228_v60 = vld [vmem:[#allocation288_spill] sm:$0xff]  ;;  %v13229_v10 = vld [vmem:[#allocation277_spill] sm:$0xff] }
 0x56f   : > { %v6624_v0 = vcombine.low %v6616_v59, %v6623_v15  ;;  %v6625_v50 = vcombine.low %v6580_v57, %v6581_v24  ;;  %v6550_v61 = vrot.slane %v6518_v47, 7  ;;  %v6517_v4 = vsel %vm3742_vm15, %v6501_v8, %v6252_v19  ;;  %v13230_v57 = vld [vmem:[#allocation289_spill] sm:$0xff]  ;;  %v13231_v47 = vld [vmem:[#allocation304_spill] sm:$0xff] }
 0x570   : > { %v3732_v1 = vsel %vm3725_vm14, %v11948_v14, %v13221_v5  ;;  %v3750_v49 = vsel %vm3742_vm15, %v3733_v18, %v13222_v38  ;;  %v6549_v25 = vrot.slane %v6517_v4, 7  ;;  %v3735_v3 = vsel %vm3725_vm14, %v11952_v58, %v13223_v9  ;;  %v6258_v29 = vpop.permute.xlu1 %6257  ;;  %v13234_v5 = vld [vmem:[#allocation291_spill] sm:$0xff]  ;;  %v13235_v38 = vld [vmem:[#allocation312_spill] sm:$0xff] }
 0x571   : > { %v3749_v37 = vsel %vm3742_vm15, %v3732_v1, %v13224_v55  ;;  %v6504_v6 = vsel %vm3725_vm14, %v11529_v30, %v11808_v35  ;;  %6681 = vst.msk [vmem:[%s12067_s3] sm:$0xff] %vm6680_vm1, %v6624_v0  ;;  %v6583_v14 = vsel %vm6575_vm0, %v3750_v49, %v6550_v61  ;;  %v3734_v18 = vsel %vm3725_vm14, %v11956_v33, %v13225_v41  ;;  %v6256_v35 = vpop.permute.xlu0 %6255  ;;  %v13232_v0 = vld [vmem:[#allocation290_spill] sm:$0xff]  ;;  %v13233_v61 = vld [vmem:[#allocation305_spill] sm:$0xff] }
 0x572   : > { %v6503_v58 = vsel %vm3725_vm14, %v11538_v11, %v11818_v13  ;;  %v6582_v48 = vsel %vm6575_vm0, %v3749_v37, %v6549_v25  ;;  %v6520_v30 = vsel %vm3742_vm15, %v6504_v6, %v6258_v29  ;;  %v3752_v34 = vsel %vm3742_vm15, %v3735_v3, %v13226_v51  ;;  %v13236_v3 = vld [vmem:[#allocation306_spill] sm:$0xff]  ;;  %v13237_v6 = vld [vmem:[#allocation307_spill] sm:$0xff] }
 0x573   : > { %v6626_v7 = vcombine.low %v6582_v48, %v6583_v14  ;;  %v6552_v52 = vrot.slane %v6520_v30, 7  ;;  %v6519_v12 = vsel %vm3742_vm15, %v6503_v58, %v6256_v35  ;;  %v3751_v36 = vsel %vm3742_vm15, %v3734_v18, %v13227_v27  ;;  %v13239_v29 = vld [vmem:[#allocation311_spill] sm:$0xff]  ;;  %v13241_v18 = vld [vmem:[#allocation36_spill] sm:$0xff] }
 0x574   : > { %v6490_v33 = vsel %vm3708_vm13, %v11437_v31, %v11556_v56  ;;  %v6489_v11 = vsel %vm3708_vm13, %v11440_v62, %v11566_v54  ;;  %v6551_v13 = vrot.slane %v6519_v12, 7  ;;  %v6633_v39 = vrot.slane %v6625_v50, %v13219_v2  ;;  %v6262_v40 = vpop.permute.xlu1 %6261  ;;  %v13242_v30 = vld [vmem:[#allocation44_spill] sm:$0xff] }
 0x575   : > { %v6506_v26 = vsel %vm3725_vm14, %v6490_v33, %v11844_v53  ;;  %v6640_v20 = vrot.slane %v6626_v7, %v13219_v2  ;;  %v6585_v22 = vsel %vm6575_vm0, %v3752_v34, %v6552_v52  ;;  %v3737_v17 = vsel %vm3725_vm14, %v11960_v63, %v13228_v60  ;;  %v6260_v54 = vpop.permute.xlu0 %6259  ;;  %v13243_v12 = vld [vmem:[#allocation292_spill] sm:$0xff]  ;;  %v13245_v60 = vld [vmem:[#allocation293_spill] sm:$0xff] }
 0x576   : > { %v6505_v31 = vsel %vm3725_vm14, %v6489_v11, %v11854_v43  ;;  %v6584_v62 = vsel %vm6575_vm0, %v3751_v36, %v6551_v13  ;;  %v6522_v56 = vsel %vm3742_vm15, %v6506_v26, %v6262_v40  ;;  %v3723_v8 = vsel %vm3708_vm13, %v11928_v28, %v13229_v10  ;;  %v13244_v36 = vld [vmem:[#allocation314_spill] sm:$0xff] }
 0x577   : > { %v6641_v53 = vcombine.low %v6633_v39, %v6640_v20  ;;  %v6642_v59 = vcombine.low %v6584_v62, %v6585_v22  ;;  %v6554_v15 = vrot.slane %v6522_v56, 7  ;;  %v6521_v24 = vsel %vm3742_vm15, %v6505_v31, %v6260_v54  ;;  %v13247_v56 = vld [vmem:[#allocation309_spill] sm:$0xff] }
 0x578   : > { %v3736_v63 = vsel %vm3725_vm14, %v11967_v44, %v13230_v57  ;;  %v3754_v43 = vsel %vm3742_vm15, %v3737_v17, %v13231_v47  ;;  %v6553_v19 = vrot.slane %v6521_v24, 7  ;;  %v3739_v50 = vsel %vm3725_vm14, %v11975_v16, %v13232_v0  ;;  %v6266_v44 = vpop.permute.xlu1 %6265 }
 0x579   : > { %v3753_v4 = vsel %vm3742_vm15, %v3736_v63, %v13233_v61  ;;  %v6508_v45 = vsel %vm3725_vm14, %v11600_v42, %v11880_v21  ;;  %6682 = vst.msk [vmem:[%s12067_s3 + $0x8] sm:$0xff] %vm6680_vm1, %v6641_v53  ;;  %v6587_v28 = vsel %vm6575_vm0, %v3754_v43, %v6554_v15  ;;  %v3738_v1 = vsel %vm3725_vm14, %v11997_v23, %v13234_v5  ;;  %v6264_v9 = vpop.permute.xlu0 %6263  ;;  %v13238_v23 = vld [vmem:[#allocation48_spill] sm:$0xff] }
 0x57a   : > { %v6507_v16 = vsel %vm3725_vm14, %v13235_v38, %v11890_v32  ;;  %v6586_v49 = vsel %vm6575_vm0, %v3753_v4, %v6553_v19  ;;  %v6524_v25 = vsel %vm3742_vm15, %v6508_v45, %v6266_v44  ;;  %v3756_v42 = vsel %vm3742_vm15, %v3739_v50, %v13236_v3  ;;  %v13240_v32 = vld [vmem:[#allocation313_spill] sm:$0xff] }
 0x57b   : > { %v6643_v21 = vcombine.low %v6586_v49, %v6587_v28  ;;  %v6556_v55 = vrot.slane %v6524_v25, 7  ;;  %v6523_v37 = vsel %vm3742_vm15, %v6507_v16, %v6264_v9  ;;  %v3755_v14 = vsel %vm3742_vm15, %v3738_v1, %v13237_v6 }
 0x57c   : > { %v6494_v41 = vsel %vm3708_vm13, %v13239_v29, %v13238_v23  ;;  %v6493_v58 = vsel %vm3708_vm13, %v13241_v18, %v13240_v32  ;;  %v6555_v48 = vrot.slane %v6523_v37, 7  ;;  %v6650_v51 = vrot.slane %v6642_v59, %v13219_v2  ;;  %v6270_v52 = vpop.permute.xlu1 %6269 }
 0x57d   : > { %v6510_v35 = vsel %vm3725_vm14, %v6494_v41, %v13242_v30  ;;  %v6657_v34 = vrot.slane %v6643_v21, %v13219_v2  ;;  %v6589_v7 = vsel %vm6575_vm0, %v3756_v42, %v6556_v55  ;;  %v3741_v27 = vsel %vm3725_vm14, %v12052_v46, %v13243_v12  ;;  %v6268_v26 = vpop.permute.xlu0 %6267  ;;  %v13246_v46 = vld [vmem:[#allocation308_spill] sm:$0xff] }
 0x57e   : > { %v6509_v33 = vsel %vm3725_vm14, %v6493_v58, %v13244_v36  ;;  %v6588_v11 = vsel %vm6575_vm0, %v3755_v14, %v6555_v48  ;;  %v6526_v13 = vsel %vm3742_vm15, %v6510_v35, %v6270_v52  ;;  %v3740_v17 = vsel %vm3725_vm14, %v3723_v8, %v13245_v60 }
 0x57f   : > { %v6658_v39 = vcombine.low %v6650_v51, %v6657_v34  ;;  %v6659_v20 = vcombine.low %v6588_v11, %v6589_v7  ;;  %v6558_v22 = vrot.slane %v6526_v13, 7  ;;  %v6525_v40 = vsel %vm3742_vm15, %v6509_v33, %v6268_v26 }
 0x580   : > { %v3758_v31 = vsel %vm3742_vm15, %v3741_v27, %v13246_v46  ;;  %v6557_v62 = vrot.slane %v6525_v40, 7  ;;  %v3757_v54 = vsel %vm3742_vm15, %v3740_v17, %v13247_v56 }
 0x581   : > { %6683 = vst.msk [vmem:[%s12067_s3 + $0x10] sm:$0xff] %vm6680_vm1, %v6658_v39  ;;  %v6591_v53 = vsel %vm6575_vm0, %v3758_v31, %v6558_v22  ;;  %v6667_v24 = vrot.slane %v6659_v20, %v13219_v2 }
 0x582   : > { %v6590_v59 = vsel %vm6575_vm0, %v3757_v54, %v6557_v62 }
 0x583   : > { %v6660_v15 = vcombine.low %v6590_v59, %v6591_v53 }
 0x585   : > { %v6674_v10 = vrot.slane %v6660_v15, %v13219_v2 }
 0x587   : > { %v6675_v8 = vcombine.low %v6667_v24, %v6674_v10 }
 0x589   : > { %6684 = vst.msk [vmem:[%s12067_s3 + $0x18] sm:$0xff] %vm6680_vm1, %v6675_v8 }
 0x58a   : > { %6946 = shalt.err (!%p6943_p5)
}
 0x58b   : > { %s6947_s16 = scalar_lea.hbm %s12172_s2, 512  ;;  %s6951_s23 = scalar_lea.hbm %s12227_s1, 1024 }
 0x58c   : > { %p6948_p4 = scmp.ne.s32.totalorder %s12172_s2, %s6947_s16  ;;  %p6952_p12 = scmp.lt.u32.totalorder %s12172_s2, %s12227_s1 }
 0x58d   : > { %p6953_p1 = scmp.lt.u32.totalorder %s6951_s23, %s6947_s16  ;;  %p6955_p8 = scmp.lt.u32.totalorder %s6947_s16, %s12172_s2 }
 0x58e   : > { %p6949_p7 = pnand %p6948_p4, %p13248_p9 }
 0x58f   : > { %p6954_p3 = por %p6953_p1, %p6952_p12 }
 0x590   : > { %p6950_p10 = pneg %p6949_p7 }
 0x591   : > { %p6956_p11 = por %p6955_p8, %p6954_p3 }
 0x593   : > { %p6957_p0 = pnand %p6956_p11, %p6950_p10 }
 0x595   : > { %6960 = shalt.err (!%p6957_p0)
}
 0x596   : > { %s7039_s28 = smov 128  }
 0x597   : > { %6822 = dma.vmem_to_hbm [thread:$0]  (%p13248_p9), %s12174_s18, 512, %s12172_s2, %s6686_s5, %s7039_s28, %s7039_s28, %s7026_s30  }
 0x598 PF: > { %s6718_s3 = sand.u32 1, %s6995_s6   ;;  %p13249_p6 = scmp.ne.s32.totalorder %s12269_s21, 0 }
 0x599   : > { %p13250_p13 = scmp.ge.s32.totalorder %s7015_s11, 2  ;;  %s6719_s4 = scalar_lea.sflag [#allocation4], %s6718_s3 }
 0x59b   : > { %p6829_p2 = pnand %p13250_p13, %p13249_p6 }
 0x59d   : > { %6990 = dma.done.wait (!%p6829_p2), %s6719_s4, 512  }
 0x59e   : > { %6992 = vsyncadd (!%p6829_p2), %s6719_s4, 4294966784  ;;  %s17_s11 = sadd.s32 1, %s7015_s11   ;;  %s13251_s6 = smov %s6999_s7 }
 0x59f   : > { %p14_p5 = scmp.ge.s32.totalorder %s17_s11, 4   ;;  %s13252_s7 = smov %s7003_s8 }
 0x5a0   : > { %s13253_s8 = smov %s7106_s20  ;;  %s13254_s9 = smov %s7011_s10 }
 0x5a1   : > { %s13255_s10 = smov %s13257_s14  ;;  %16 = sbr.rel (!%p14_p5) target bundleno = 6 (0x6), region = 72 }
 0x5a8   :  { %6724 = vsyncpa [#allocation3], 1 }
 0x5a9   :  { %6726 = vsyncpa [#allocation3 + $0x1], 1 }
 0x5aa   :  { %6727 = vsyncpa [#allocation4], 1 }
 0x5ab   :  { %6729 = vsyncpa [#allocation4 + $0x1], 1 }

</bundles_post_ra>
